<compile_context>
chip_gen: v7x
topology: tpu7x:2x2x1
jax: 0.10.0
libtpu: 0.0.40
codegen_flags: <defaults>
</compile_context>

<pallas_src>
import functools

import jax
import jax.numpy as jnp
from jax import lax
from jax.experimental import pallas as pl
from jax.experimental.pallas import tpu as pltpu


# ------------------------------ Pallas kernel ------------------------------ #
def _predictor_kernel(src_ref,                       # (3, TB, D)  f32
                      wppi_ref, wseq_ref,            # (D, D)      bf16 pre-models
                      w1s_ref, w1p0_ref, w1p1_ref,   # (D, D)      bf16 (split w1)
                      b1_ref,                        # (1, D)      f32
                      w2_ref, b2_ref,                # (D, D//3) bf16 / (1, D//3) f32
                      w3_ref, b3_ref,                # (D//3, Cp) bf16 / (1, Cp) f32
                      hs_ref, out_ref):              # (TB, 3D) f32 / (TB, Cp) f32
    f32 = jnp.float32
    bf16 = jnp.bfloat16
    D = src_ref.shape[2]

    # ---- pre-model stand-ins, fused in-kernel (bf16 MXU, f32 accumulation) ----
    ppi0 = jnp.dot(src_ref[0].astype(bf16), wppi_ref[...], preferred_element_type=f32)
    ppi1 = jnp.dot(src_ref[1].astype(bf16), wppi_ref[...], preferred_element_type=f32)
    seq = jnp.dot(src_ref[2].astype(bf16), wseq_ref[...], preferred_element_type=f32)

    # ---- hs output: [ seq | channel-interleaved(ppi0, ppi1) ]  (TB, 3D) ----
    # Interleave (= torch.einsum('LBD->BDL').reshape) done with 0/1 scatter
    # matmuls on the MXU; no XLU lane concat/shuffle, stores stay lane-aligned.
    row = lax.broadcasted_iota(jnp.int32, (D, 2 * D), 0)
    col = lax.broadcasted_iota(jnp.int32, (D, 2 * D), 1)
    p_even = (col == 2 * row).astype(f32)        # scatter feature d -> lane 2d
    p_odd = (col == 2 * row + 1).astype(f32)     # scatter feature d -> lane 2d+1
    ppi_inter = (jnp.dot(ppi0, p_even, preferred_element_type=f32)
                 + jnp.dot(ppi1, p_odd, preferred_element_type=f32))
    hs_ref[:, :D] = seq
    hs_ref[:, D:] = ppi_inter

    # ---- FC_Decoder: Linear->Sigmoid->(Dropout=id)->Linear->Sigmoid->Linear ----
    h1 = (jnp.dot(seq.astype(bf16), w1s_ref[...], preferred_element_type=f32)
          + jnp.dot(ppi0.astype(bf16), w1p0_ref[...], preferred_element_type=f32)
          + jnp.dot(ppi1.astype(bf16), w1p1_ref[...], preferred_element_type=f32)
          + b1_ref[...])
    h1 = jax.nn.sigmoid(h1)                                   # f32 elementwise (v5e-safe)
    h2 = jnp.dot(h1.astype(bf16), w2_ref[...], preferred_element_type=f32) + b2_ref[...]
    h2 = jax.nn.sigmoid(h2)
    out = jnp.dot(h2.astype(bf16), w3_ref[...], preferred_element_type=f32) + b3_ref[...]
    out_ref[...] = out                                        # lane-dense padded slab


# ------------------------------ full forward ------------------------------ #
@functools.partial(jax.jit, static_argnums=(2,))
def predictor_forward(src, kp, num_class):
    """src: (3, B, D) — matches the `src` indexing in Predictor.forward."""
    _, B, D = src.shape
    D3 = kp["w2"].shape[1]
    Cp = kp["w3"].shape[1]

    # Batch tile: whole batch if small, 128-row tiles otherwise (sublane-/
    # lane-legal either way).  Grid axis is "parallel" so large batches shard
    # across TensorCores on megacore / v7x.
    TB = B if B <= 128 else 128
    assert B % TB == 0, "batch must be a multiple of 128 when batch > 128"
    grid = (B // TB,)

    const = lambda shape: pl.BlockSpec(shape, lambda b: (0,) * len(shape))
    hs, out_pad = pl.pallas_call(
        _predictor_kernel,
        grid=grid,
        out_shape=(jax.ShapeDtypeStruct((B, 3 * D), jnp.float32),   # hs (fusion out)
                   jax.ShapeDtypeStruct((B, Cp), jnp.float32)),      # padded logits
        in_specs=[
            pl.BlockSpec((3, TB, D), lambda b: (0, b, 0)),   # src (batch-tiled)
            const((D, D)),                                   # w_ppi_pre   (resident)
            const((D, D)),                                   # w_seq_pre   (resident)
            const((D, D)),                                   # w1_seq      (resident)
            const((D, D)),                                   # w1_ppi0     (resident)
            const((D, D)),                                   # w1_ppi1     (resident)
            const((1, D)),                                   # b1
            const((D, D3)),                                  # w2
            const((1, D3)),                                  # b2
            const((D3, Cp)),                                 # w3
            const((1, Cp)),                                  # b3
        ],
        out_specs=(pl.BlockSpec((TB, 3 * D), lambda b: (b, 0)),
                   pl.BlockSpec((TB, Cp), lambda b: (b, 0))),
        compiler_params=pltpu.CompilerParams(
            dimension_semantics=("parallel",),
            # tiny footprint today; explicit limit keeps the same config valid
            # on v7x (64 MiB physical VMEM) if D is ever scaled up.
            vmem_limit_bytes=32 * 1024 * 1024),
    )(src, kp["w_ppi_pre"], kp["w_seq_pre"],
      kp["w1_seq"], kp["w1_ppi0"], kp["w1_ppi1"], kp["b1"],
      kp["w2"], kp["b2"], kp["w3"], kp["b3"])
    return hs, out_pad[:, :num_class]


# ------------------------------- parameters -------------------------------- #
def init_params(key, dim_feedforward, num_class, input_num=3):
    """PyTorch-equivalent layout (x @ W convention == torch Linear weight.T)."""
    D = dim_feedforward
    k = jax.random.split(key, 8)
    s = 0.02
    return {
        # pre-model stand-ins
        "w_ppi_pre": s * jax.random.normal(k[0], (D, D), jnp.float32),
        "w_seq_pre": s * jax.random.normal(k[1], (D, D), jnp.float32),
        # FC_Decoder
        "w1": s * jax.random.normal(k[2], (D * input_num, D), jnp.float32),
        "b1": s * jax.random.normal(k[3], (D,), jnp.float32),
        "w2": s * jax.random.normal(k[4], (D, D // input_num), jnp.float32),
        "b2": s * jax.random.normal(k[5], (D // input_num,), jnp.float32),
        "w3": s * jax.random.normal(k[6], (D // input_num, num_class), jnp.float32),
        "b3": s * jax.random.normal(k[7], (num_class,), jnp.float32),
    }


def prepare_params(params, num_class):
    """One-time repack into the kernel layout:
       * split/de-interleave w1 rows (seq rows, ppi layer-0 rows, ppi layer-1
         rows) so no in-kernel lane concat is needed on the MXU path,
       * pad the classifier to a 128-lane-dense output slab,
       * cast matmul weights to bf16 (accumulation stays f32 in-kernel)."""
    D = params["w_seq_pre"].shape[0]
    C = num_class
    Cp = ((C + 127) // 128) * 128
    bf16, f32 = jnp.bfloat16, jnp.float32
    w1 = params["w1"]                 # rows: [0:D]=seq, [D:3D]=interleaved ppi
    w1_ppi = w1[D:]
    w3p = jnp.zeros((params["w3"].shape[0], Cp), f32).at[:, :C].set(params["w3"])
    b3p = jnp.zeros((1, Cp), f32).at[:, :C].set(params["b3"][None, :])
    return {
        "w_ppi_pre": params["w_ppi_pre"].astype(bf16),
        "w_seq_pre": params["w_seq_pre"].astype(bf16),
        "w1_seq": w1[:D].astype(bf16),
        "w1_ppi0": w1_ppi[0::2].astype(bf16),   # rows hit by ppi layer-0 channels
        "w1_ppi1": w1_ppi[1::2].astype(bf16),   # rows hit by ppi layer-1 channels
        "b1": params["b1"][None, :].astype(f32),
        "w2": params["w2"].astype(bf16),
        "b2": params["b2"][None, :].astype(f32),
        "w3": w3p.astype(bf16),
        "b3": b3p,
    }


# ------------------------- pure-JAX f32 reference -------------------------- #
def predictor_reference(src, params):
    hs_ppi = jnp.einsum("lbd,de->lbe", src[:2], params["w_ppi_pre"])   # (2,B,D)
    hs_seq = jnp.einsum("lbd,de->lbe", src[2:3], params["w_seq_pre"])  # (1,B,D)
    hs = jnp.concatenate([hs_ppi, hs_seq], axis=0)                     # (3,B,D)
    _, B, D = hs.shape
    seq = hs[2]                                                        # (B,D)
    ppi = jnp.einsum("LBD->BDL", hs[:2]).reshape(B, 2 * D)             # interleaved
    hs_f = jnp.concatenate([seq, ppi], axis=-1)                        # stand-in fusion
    h1 = jax.nn.sigmoid(hs_f @ params["w1"] + params["b1"])
    h2 = jax.nn.sigmoid(h1 @ params["w2"] + params["b2"])
    out = h2 @ params["w3"] + params["b3"]
    return hs_f, out


if __name__ == "__main__":
    # D chosen as a multiple of 3*128 so D, 2D, 3D and D//3 are all lane-dense.
    dim_feedforward = 384          # D ; hs width = 3*D = 1152 ; D//3 = 128
    num_class = 16                 # padded to 128 lanes inside the kernel
    batch = 8                      # one sublane group

    key = jax.random.PRNGKey(0)
    pkey, xkey = jax.random.split(key)
    params = init_params(pkey, dim_feedforward, num_class)
    kparams = prepare_params(params, num_class)

    src = jax.random.normal(xkey, (3, batch, dim_feedforward), jnp.float32)

    hs, out = predictor_forward(src, kparams, num_class)
    jax.block_until_ready((hs, out))

    assert hs.shape == (batch, 3 * dim_feedforward)
    assert out.shape == (batch, num_class)

    # correctness vs the f32 reference (loose tol for bf16 MXU operands)
    hs_expect, out_expect = predictor_reference(src, params)
    assert float(jnp.max(jnp.abs(hs - hs_expect))) < 5e-2
    assert float(jnp.max(jnp.abs(out - out_expect))) < 5e-2

    print("KERNEL_OK")
</pallas_src>

<mosaic_0001>
module attributes {stable_mosaic.version = 11 : i64} {
  func.func @_predictor_kernel(%arg0: i32, %arg1: memref<3x8x384xf32, #tpu.memory_space<vmem>>, %arg2: memref<384x384xbf16, #tpu.memory_space<vmem>>, %arg3: memref<384x384xbf16, #tpu.memory_space<vmem>>, %arg4: memref<384x384xbf16, #tpu.memory_space<vmem>>, %arg5: memref<384x384xbf16, #tpu.memory_space<vmem>>, %arg6: memref<384x384xbf16, #tpu.memory_space<vmem>>, %arg7: memref<1x384xf32, #tpu.memory_space<vmem>>, %arg8: memref<384x128xbf16, #tpu.memory_space<vmem>>, %arg9: memref<1x128xf32, #tpu.memory_space<vmem>>, %arg10: memref<128x128xbf16, #tpu.memory_space<vmem>>, %arg11: memref<1x128xf32, #tpu.memory_space<vmem>>, %arg12: memref<8x1152xf32, #tpu.memory_space<vmem>>, %arg13: memref<8x128xf32, #tpu.memory_space<vmem>>) attributes {dimension_semantics = [#tpu.dimension_semantics<parallel>], iteration_bounds = array<i64: 1>, scalar_prefetch = 0 : i64, scratch_operands = 0 : i64, tpu.core_type = #tpu.core_type<tc>, window_params = [{transform_indices = @transform_0, window_bounds = array<i64: 3, 8, 384>}, {pipeline_mode = #tpu.pipeline_mode<synchronous>, transform_indices = @transform_1, window_bounds = array<i64: 384, 384>}, {pipeline_mode = #tpu.pipeline_mode<synchronous>, transform_indices = @transform_2, window_bounds = array<i64: 384, 384>}, {pipeline_mode = #tpu.pipeline_mode<synchronous>, transform_indices = @transform_3, window_bounds = array<i64: 384, 384>}, {pipeline_mode = #tpu.pipeline_mode<synchronous>, transform_indices = @transform_4, window_bounds = array<i64: 384, 384>}, {pipeline_mode = #tpu.pipeline_mode<synchronous>, transform_indices = @transform_5, window_bounds = array<i64: 384, 384>}, {pipeline_mode = #tpu.pipeline_mode<synchronous>, transform_indices = @transform_6, window_bounds = array<i64: 1, 384>}, {pipeline_mode = #tpu.pipeline_mode<synchronous>, transform_indices = @transform_7, window_bounds = array<i64: 384, 128>}, {pipeline_mode = #tpu.pipeline_mode<synchronous>, transform_indices = @transform_8, window_bounds = array<i64: 1, 128>}, {pipeline_mode = #tpu.pipeline_mode<synchronous>, transform_indices = @transform_9, window_bounds = array<i64: 128, 128>}, {pipeline_mode = #tpu.pipeline_mode<synchronous>, transform_indices = @transform_10, window_bounds = array<i64: 1, 128>}, {transform_indices = @transform_11, window_bounds = array<i64: 8, 1152>}, {transform_indices = @transform_12, window_bounds = array<i64: 8, 128>}]} {
    %c0 = arith.constant 0 : index
    %c0_0 = arith.constant 0 : index
    %c0_1 = arith.constant 0 : index
    %0 = vector.load %arg1[%c0, %c0_0, %c0_1] : memref<3x8x384xf32, #tpu.memory_space<vmem>>, vector<1x8x384xf32>
    %1 = vector.shape_cast %0 : vector<1x8x384xf32> to vector<8x384xf32>
    %2 = arith.truncf %1 : vector<8x384xf32> to vector<8x384xbf16>
    %c0_2 = arith.constant 0 : index
    %c0_3 = arith.constant 0 : index
    %3 = vector.load %arg2[%c0_2, %c0_3] : memref<384x384xbf16, #tpu.memory_space<vmem>>, vector<384x384xbf16>
    %cst = arith.constant dense<0.000000e+00> : vector<8x384xf32>
    %4 = tpu.matmul %2, %3, %cst {dimension_numbers = #tpu.dot_dimension_numbers<[1], [0], [0], [1], [0, 0, 1, 1], [], []>} : vector<8x384xbf16>, vector<384x384xbf16>, vector<8x384xf32> -> vector<8x384xf32>
    %c1 = arith.constant 1 : index
    %c0_4 = arith.constant 0 : index
    %c0_5 = arith.constant 0 : index
    %5 = vector.load %arg1[%c1, %c0_4, %c0_5] : memref<3x8x384xf32, #tpu.memory_space<vmem>>, vector<1x8x384xf32>
    %6 = vector.shape_cast %5 : vector<1x8x384xf32> to vector<8x384xf32>
    %7 = arith.truncf %6 : vector<8x384xf32> to vector<8x384xbf16>
    %c0_6 = arith.constant 0 : index
    %c0_7 = arith.constant 0 : index
    %8 = vector.load %arg2[%c0_6, %c0_7] : memref<384x384xbf16, #tpu.memory_space<vmem>>, vector<384x384xbf16>
    %cst_8 = arith.constant dense<0.000000e+00> : vector<8x384xf32>
    %9 = tpu.matmul %7, %8, %cst_8 {dimension_numbers = #tpu.dot_dimension_numbers<[1], [0], [0], [1], [0, 0, 1, 1], [], []>} : vector<8x384xbf16>, vector<384x384xbf16>, vector<8x384xf32> -> vector<8x384xf32>
    %c2 = arith.constant 2 : index
    %c0_9 = arith.constant 0 : index
    %c0_10 = arith.constant 0 : index
    %10 = vector.load %arg1[%c2, %c0_9, %c0_10] : memref<3x8x384xf32, #tpu.memory_space<vmem>>, vector<1x8x384xf32>
    %11 = vector.shape_cast %10 : vector<1x8x384xf32> to vector<8x384xf32>
    %12 = arith.truncf %11 : vector<8x384xf32> to vector<8x384xbf16>
    %c0_11 = arith.constant 0 : index
    %c0_12 = arith.constant 0 : index
    %13 = vector.load %arg3[%c0_11, %c0_12] : memref<384x384xbf16, #tpu.memory_space<vmem>>, vector<384x384xbf16>
    %cst_13 = arith.constant dense<0.000000e+00> : vector<8x384xf32>
    %14 = tpu.matmul %12, %13, %cst_13 {dimension_numbers = #tpu.dot_dimension_numbers<[1], [0], [0], [1], [0, 0, 1, 1], [], []>} : vector<8x384xbf16>, vector<384x384xbf16>, vector<8x384xf32> -> vector<8x384xf32>
    %15 = tpu.iota {dimensions = array<i32: 0>} : vector<384x768xi32>
    %16 = tpu.iota {dimensions = array<i32: 1>} : vector<384x768xi32>
    %c2_i32 = arith.constant 2 : i32
    %17 = vector.broadcast %c2_i32 : i32 to vector<384x768xi32>
    %18 = arith.muli %17, %15 : vector<384x768xi32>
    %19 = arith.cmpi eq, %16, %18 : vector<384x768xi32>
    %20 = arith.extui %19 : vector<384x768xi1> to vector<384x768xi32>
    %21 = arith.sitofp %20 : vector<384x768xi32> to vector<384x768xf32>
    %c2_i32_14 = arith.constant 2 : i32
    %22 = vector.broadcast %c2_i32_14 : i32 to vector<384x768xi32>
    %23 = arith.muli %22, %15 : vector<384x768xi32>
    %c1_i32 = arith.constant 1 : i32
    %24 = vector.broadcast %c1_i32 : i32 to vector<384x768xi32>
    %25 = arith.addi %23, %24 : vector<384x768xi32>
    %26 = arith.cmpi eq, %16, %25 : vector<384x768xi32>
    %27 = arith.extui %26 : vector<384x768xi1> to vector<384x768xi32>
    %28 = arith.sitofp %27 : vector<384x768xi32> to vector<384x768xf32>
    %cst_15 = arith.constant dense<0.000000e+00> : vector<8x768xf32>
    %29 = tpu.matmul %4, %21, %cst_15 {dimension_numbers = #tpu.dot_dimension_numbers<[1], [0], [0], [1], [0, 0, 1, 1], [], []>} : vector<8x384xf32>, vector<384x768xf32>, vector<8x768xf32> -> vector<8x768xf32>
    %cst_16 = arith.constant dense<0.000000e+00> : vector<8x768xf32>
    %30 = tpu.matmul %9, %28, %cst_16 {dimension_numbers = #tpu.dot_dimension_numbers<[1], [0], [0], [1], [0, 0, 1, 1], [], []>} : vector<8x384xf32>, vector<384x768xf32>, vector<8x768xf32> -> vector<8x768xf32>
    %31 = arith.addf %29, %30 : vector<8x768xf32>
    %c0_17 = arith.constant 0 : index
    %c0_18 = arith.constant 0 : index
    %32 = vector.load %arg12[%c0_17, %c0_18] : memref<8x1152xf32, #tpu.memory_space<vmem>>, vector<8x384xf32>
    tpu.vector_store %arg12[%c0_17, %c0_18], %14 {strides = array<i32>} : memref<8x1152xf32, #tpu.memory_space<vmem>>, vector<8x384xf32>,
    %c0_19 = arith.constant 0 : index
    %c384 = arith.constant 384 : index
    %33 = vector.load %arg12[%c0_19, %c384] : memref<8x1152xf32, #tpu.memory_space<vmem>>, vector<8x768xf32>
    tpu.vector_store %arg12[%c0_19, %c384], %31 {strides = array<i32>} : memref<8x1152xf32, #tpu.memory_space<vmem>>, vector<8x768xf32>,
    %34 = arith.truncf %14 : vector<8x384xf32> to vector<8x384xbf16>
    %c0_20 = arith.constant 0 : index
    %c0_21 = arith.constant 0 : index
    %35 = vector.load %arg4[%c0_20, %c0_21] : memref<384x384xbf16, #tpu.memory_space<vmem>>, vector<384x384xbf16>
    %cst_22 = arith.constant dense<0.000000e+00> : vector<8x384xf32>
    %36 = tpu.matmul %34, %35, %cst_22 {dimension_numbers = #tpu.dot_dimension_numbers<[1], [0], [0], [1], [0, 0, 1, 1], [], []>} : vector<8x384xbf16>, vector<384x384xbf16>, vector<8x384xf32> -> vector<8x384xf32>
    %37 = arith.truncf %4 : vector<8x384xf32> to vector<8x384xbf16>
    %c0_23 = arith.constant 0 : index
    %c0_24 = arith.constant 0 : index
    %38 = vector.load %arg5[%c0_23, %c0_24] : memref<384x384xbf16, #tpu.memory_space<vmem>>, vector<384x384xbf16>
    %cst_25 = arith.constant dense<0.000000e+00> : vector<8x384xf32>
    %39 = tpu.matmul %37, %38, %cst_25 {dimension_numbers = #tpu.dot_dimension_numbers<[1], [0], [0], [1], [0, 0, 1, 1], [], []>} : vector<8x384xbf16>, vector<384x384xbf16>, vector<8x384xf32> -> vector<8x384xf32>
    %40 = arith.addf %36, %39 : vector<8x384xf32>
    %41 = arith.truncf %9 : vector<8x384xf32> to vector<8x384xbf16>
    %c0_26 = arith.constant 0 : index
    %c0_27 = arith.constant 0 : index
    %42 = vector.load %arg6[%c0_26, %c0_27] : memref<384x384xbf16, #tpu.memory_space<vmem>>, vector<384x384xbf16>
    %cst_28 = arith.constant dense<0.000000e+00> : vector<8x384xf32>
    %43 = tpu.matmul %41, %42, %cst_28 {dimension_numbers = #tpu.dot_dimension_numbers<[1], [0], [0], [1], [0, 0, 1, 1], [], []>} : vector<8x384xbf16>, vector<384x384xbf16>, vector<8x384xf32> -> vector<8x384xf32>
    %44 = arith.addf %40, %43 : vector<8x384xf32>
    %c0_29 = arith.constant 0 : index
    %c0_30 = arith.constant 0 : index
    %45 = vector.load %arg7[%c0_29, %c0_30] : memref<1x384xf32, #tpu.memory_space<vmem>>, vector<1x384xf32>
    %46 = vector.broadcast %45 : vector<1x384xf32> to vector<8x384xf32>
    %47 = arith.addf %44, %46 : vector<8x384xf32>
    %48 = arith.negf %47 : vector<8x384xf32>
    %49 = math.exp %48 : vector<8x384xf32>
    %cst_31 = arith.constant 1.000000e+00 : f32
    %50 = vector.broadcast %cst_31 : f32 to vector<8x384xf32>
    %51 = arith.addf %50, %49 : vector<8x384xf32>
    %52 = arith.divf %50, %51 : vector<8x384xf32>
    %53 = arith.truncf %52 : vector<8x384xf32> to vector<8x384xbf16>
    %c0_32 = arith.constant 0 : index
    %c0_33 = arith.constant 0 : index
    %54 = vector.load %arg8[%c0_32, %c0_33] : memref<384x128xbf16, #tpu.memory_space<vmem>>, vector<384x128xbf16>
    %cst_34 = arith.constant dense<0.000000e+00> : vector<8x128xf32>
    %55 = tpu.matmul %53, %54, %cst_34 {dimension_numbers = #tpu.dot_dimension_numbers<[1], [0], [0], [1], [0, 0, 1, 1], [], []>} : vector<8x384xbf16>, vector<384x128xbf16>, vector<8x128xf32> -> vector<8x128xf32>
    %c0_35 = arith.constant 0 : index
    %c0_36 = arith.constant 0 : index
    %56 = vector.load %arg9[%c0_35, %c0_36] : memref<1x128xf32, #tpu.memory_space<vmem>>, vector<1x128xf32>
    %57 = vector.broadcast %56 : vector<1x128xf32> to vector<8x128xf32>
    %58 = arith.addf %55, %57 : vector<8x128xf32>
    %59 = arith.negf %58 : vector<8x128xf32>
    %60 = math.exp %59 : vector<8x128xf32>
    %cst_37 = arith.constant 1.000000e+00 : f32
    %61 = vector.broadcast %cst_37 : f32 to vector<8x128xf32>
    %62 = arith.addf %61, %60 : vector<8x128xf32>
    %63 = arith.divf %61, %62 : vector<8x128xf32>
    %64 = arith.truncf %63 : vector<8x128xf32> to vector<8x128xbf16>
    %c0_38 = arith.constant 0 : index
    %c0_39 = arith.constant 0 : index
    %65 = vector.load %arg10[%c0_38, %c0_39] : memref<128x128xbf16, #tpu.memory_space<vmem>>, vector<128x128xbf16>
    %cst_40 = arith.constant dense<0.000000e+00> : vector<8x128xf32>
    %66 = tpu.matmul %64, %65, %cst_40 {dimension_numbers = #tpu.dot_dimension_numbers<[1], [0], [0], [1], [0, 0, 1, 1], [], []>} : vector<8x128xbf16>, vector<128x128xbf16>, vector<8x128xf32> -> vector<8x128xf32>
    %c0_41 = arith.constant 0 : index
    %c0_42 = arith.constant 0 : index
    %67 = vector.load %arg11[%c0_41, %c0_42] : memref<1x128xf32, #tpu.memory_space<vmem>>, vector<1x128xf32>
    %68 = vector.broadcast %67 : vector<1x128xf32> to vector<8x128xf32>
    %69 = arith.addf %66, %68 : vector<8x128xf32>
    %c0_43 = arith.constant 0 : index
    %c0_44 = arith.constant 0 : index
    %70 = vector.load %arg13[%c0_43, %c0_44] : memref<8x128xf32, #tpu.memory_space<vmem>>, vector<8x128xf32>
    tpu.vector_store %arg13[%c0_43, %c0_44], %69 {strides = array<i32>} : memref<8x128xf32, #tpu.memory_space<vmem>>, vector<8x128xf32>,
    return
  }
  func.func @transform_0(%arg0: i32) -> (i32, i32, i32) {
    %c0_i32 = arith.constant 0 : i32
    %c0_i32_0 = arith.constant 0 : i32
    %c0_i32_1 = arith.constant 0 : i32
    return %c0_i32, %arg0, %c0_i32_0 : i32, i32, i32
  }
  func.func @transform_1(%arg0: i32) -> (i32, i32) {
    %c0_i32 = arith.constant 0 : i32
    %c0_i32_0 = arith.constant 0 : i32
    %c0_i32_1 = arith.constant 0 : i32
    return %c0_i32, %c0_i32_0 : i32, i32
  }
  func.func @transform_2(%arg0: i32) -> (i32, i32) {
    %c0_i32 = arith.constant 0 : i32
    %c0_i32_0 = arith.constant 0 : i32
    %c0_i32_1 = arith.constant 0 : i32
    return %c0_i32, %c0_i32_0 : i32, i32
  }
  func.func @transform_3(%arg0: i32) -> (i32, i32) {
    %c0_i32 = arith.constant 0 : i32
    %c0_i32_0 = arith.constant 0 : i32
    %c0_i32_1 = arith.constant 0 : i32
    return %c0_i32, %c0_i32_0 : i32, i32
  }
  func.func @transform_4(%arg0: i32) -> (i32, i32) {
    %c0_i32 = arith.constant 0 : i32
    %c0_i32_0 = arith.constant 0 : i32
    %c0_i32_1 = arith.constant 0 : i32
    return %c0_i32, %c0_i32_0 : i32, i32
  }
  func.func @transform_5(%arg0: i32) -> (i32, i32) {
    %c0_i32 = arith.constant 0 : i32
    %c0_i32_0 = arith.constant 0 : i32
    %c0_i32_1 = arith.constant 0 : i32
    return %c0_i32, %c0_i32_0 : i32, i32
  }
  func.func @transform_6(%arg0: i32) -> (i32, i32) {
    %c0_i32 = arith.constant 0 : i32
    %c0_i32_0 = arith.constant 0 : i32
    %c0_i32_1 = arith.constant 0 : i32
    return %c0_i32, %c0_i32_0 : i32, i32
  }
  func.func @transform_7(%arg0: i32) -> (i32, i32) {
    %c0_i32 = arith.constant 0 : i32
    %c0_i32_0 = arith.constant 0 : i32
    %c0_i32_1 = arith.constant 0 : i32
    return %c0_i32, %c0_i32_0 : i32, i32
  }
  func.func @transform_8(%arg0: i32) -> (i32, i32) {
    %c0_i32 = arith.constant 0 : i32
    %c0_i32_0 = arith.constant 0 : i32
    %c0_i32_1 = arith.constant 0 : i32
    return %c0_i32, %c0_i32_0 : i32, i32
  }
  func.func @transform_9(%arg0: i32) -> (i32, i32) {
    %c0_i32 = arith.constant 0 : i32
    %c0_i32_0 = arith.constant 0 : i32
    %c0_i32_1 = arith.constant 0 : i32
    return %c0_i32, %c0_i32_0 : i32, i32
  }
  func.func @transform_10(%arg0: i32) -> (i32, i32) {
    %c0_i32 = arith.constant 0 : i32
    %c0_i32_0 = arith.constant 0 : i32
    %c0_i32_1 = arith.constant 0 : i32
    return %c0_i32, %c0_i32_0 : i32, i32
  }
  func.func @transform_11(%arg0: i32) -> (i32, i32) {
    %c0_i32 = arith.constant 0 : i32
    %c0_i32_0 = arith.constant 0 : i32
    return %arg0, %c0_i32 : i32, i32
  }
  func.func @transform_12(%arg0: i32) -> (i32, i32) {
    %c0_i32 = arith.constant 0 : i32
    %c0_i32_0 = arith.constant 0 : i32
    return %arg0, %c0_i32 : i32, i32
  }
}

</mosaic_0001>

<bundles_post_ra>
// kernel: predictor_forward.1
= control target key start
LH: loop header
LB: loop body
LE: loop exit
PB: predicated region body
PF: predicated region fallthrough
CT: control target
= control target key end

     0   :  { %18 = vsyncpa [#allocation3], 0  ;;  %s13277_s0 = inlined_call_operand.hbm [shape: f32[3,8,384], index: 0, kind: input, shape index: {}]   ;;  %s13278_s1 = inlined_call_operand.hbm [shape: bf16[384,384], index: 1, kind: input, shape index: {}]   ;;  %s13279_s2 = inlined_call_operand.hbm [shape: bf16[384,384], index: 2, kind: input, shape index: {}]   ;;  %s13280_s3 = inlined_call_operand.hbm [shape: bf16[384,384], index: 3, kind: input, shape index: {}]   ;;  %s13281_s4 = inlined_call_operand.hbm [shape: bf16[384,384], index: 4, kind: input, shape index: {}]   ;;  %s13282_s5 = inlined_call_operand.hbm [shape: bf16[384,384], index: 5, kind: input, shape index: {}]   ;;  %s13283_s6 = inlined_call_operand.vmem [shape: f32[1,384], index: 6, kind: input, shape index: {}]   ;;  %s13284_s7 = inlined_call_operand.hbm [shape: bf16[384,128], index: 7, kind: input, shape index: {}]   ;;  %s13285_s8 = inlined_call_operand.vmem [shape: f32[1,128], index: 8, kind: input, shape index: {}]   ;;  %s13286_s9 = inlined_call_operand.hbm [shape: bf16[128,128], index: 9, kind: input, shape index: {}]   ;;  %s13287_s10 = inlined_call_operand.vmem [shape: f32[1,128], index: 10, kind: input, shape index: {}]   ;;  %s13288_s11 = inlined_call_operand.hbm [shape: f32[8,1152], index: 11, kind: output, shape index: {0}]   ;;  %s13289_s12 = inlined_call_operand.hbm [shape: f32[8,128], index: 12, kind: output, shape index: {1}]  }
   0x1   :  { %19 = vsyncpa [#allocation6], 0 }
   0x2   :  { %20 = vsyncpa [#allocation9], 0 }
   0x3   :  { %21 = vsyncpa [#allocation12], 0 }
   0x4   :  { %22 = vsyncpa [#allocation15], 0 }
   0x5   :  { %23 = vsyncpa [#allocation4], 0 }
   0x6   :  { %24 = vsyncpa [#allocation18], 0  ;;  %s10096_s21 = smov [#allocation5]   ;;  %s9862_s25 = scalar_lea.hbm %s13278_s1, 9216 }
   0x7   :  { %s42_s22 = sshll.u32 %s10096_s21, 4  ;;  %p9863_p0 = scmp.ne.s32.totalorder %s13278_s1, %s9862_s25  ;;  %s43_s22 = int_to_ptr.vmem [resolvable:$true] %s42_s22 }
   0x8   :  { %p9866_p1 = scmp.lt.u32.totalorder %s9862_s25, %s13278_s1 }
   0xa   :  { %p9868_p2 = pnand %p9866_p1, %p9863_p0 }
   0xc   :  { %9871 = shalt.err (!%p9868_p2)
}
   0xd   :  { %s9872_s30 = scalar_lea.vmem %s43_s22, 9216  ;;  %p9877_p4 = scmp.lt.s32.totalorder %s43_s22, %s43_s22 }
   0xe   :  { %p9873_p3 = scmp.ne.s32.totalorder %s43_s22, %s9872_s30  ;;  %p9878_p5 = scmp.lt.s32.totalorder %s9872_s30, %s9872_s30 }
  0x10   :  { %p9879_p6 = por %p9878_p5, %p9877_p4 }
  0x12   :  { %p9880_p7 = pnand %p9879_p6, %p9873_p3 }
  0x14   :  { %9883 = shalt.err (!%p9880_p7)
}
  0x15   :  { %s10097_s13 = smov 192   ;;  %s10098_s14 = smov 12  }
  0x16   :  { %48 = dma.hbm_to_vmem [thread:$0]  %s13278_s1, 9216, %s43_s22, [#allocation6], %s10097_s13, %s10097_s13, %s10098_s14  }
  0x17   :  { %s10099_s17 = smov [#allocation8]   ;;  %s10100_s19 = smov [#allocation11]  }
  0x18   :  { %s66_s18 = sshll.u32 %s10099_s17, 4  ;;  %s90_s20 = sshll.u32 %s10100_s19, 4  ;;  %s67_s18 = int_to_ptr.vmem [resolvable:$true] %s66_s18  ;;  %s91_s20 = int_to_ptr.vmem [resolvable:$true] %s90_s20 }
  0x19   :  { %s9884_s24 = scalar_lea.hbm %s13280_s3, 9216 }
  0x1a   :  { %p9885_p8 = scmp.ne.s32.totalorder %s13280_s3, %s9884_s24  ;;  %p9888_p9 = scmp.lt.u32.totalorder %s9884_s24, %s13280_s3 }
  0x1c   :  { %p9890_p10 = pnand %p9888_p9, %p9885_p8 }
  0x1e   :  { %9893 = shalt.err (!%p9890_p10)
}
  0x1f   :  { %s9894_s1 = scalar_lea.vmem %s67_s18, 9216  ;;  %p9899_p12 = scmp.lt.s32.totalorder %s67_s18, %s67_s18 }
  0x20   :  { %p9895_p11 = scmp.ne.s32.totalorder %s67_s18, %s9894_s1  ;;  %p9900_p13 = scmp.lt.s32.totalorder %s9894_s1, %s9894_s1 }
  0x22   :  { %p9901_p0 = por %p9900_p13, %p9899_p12 }
  0x24   :  { %p9902_p1 = pnand %p9901_p0, %p9895_p11 }
  0x26   :  { %9905 = shalt.err (!%p9902_p1)
}
  0x27   :  { %72 = dma.hbm_to_vmem [thread:$0]  %s13280_s3, 9216, %s67_s18, [#allocation9], %s10097_s13, %s10097_s13, %s10098_s14  }
  0x28   :  { %s9906_s16 = scalar_lea.hbm %s13282_s5, 9216 }
  0x29   :  { %p9907_p2 = scmp.ne.s32.totalorder %s13282_s5, %s9906_s16  ;;  %p9910_p3 = scmp.lt.u32.totalorder %s9906_s16, %s13282_s5 }
  0x2b   :  { %p9912_p4 = pnand %p9910_p3, %p9907_p2 }
  0x2d   :  { %9915 = shalt.err (!%p9912_p4)
}
  0x2e   :  { %s9916_s24 = scalar_lea.vmem %s91_s20, 9216  ;;  %p9921_p6 = scmp.lt.s32.totalorder %s91_s20, %s91_s20 }
  0x2f   :  { %p9917_p5 = scmp.ne.s32.totalorder %s91_s20, %s9916_s24  ;;  %p9922_p7 = scmp.lt.s32.totalorder %s9916_s24, %s9916_s24 }
  0x31   :  { %p9923_p8 = por %p9922_p7, %p9921_p6 }
  0x33   :  { %p9924_p9 = pnand %p9923_p8, %p9917_p5 }
  0x35   :  { %9927 = shalt.err (!%p9924_p9)
}
  0x36   :  { %96 = dma.hbm_to_vmem [thread:$0]  %s13282_s5, 9216, %s91_s20, [#allocation12], %s10097_s13, %s10097_s13, %s10098_s14  }
  0x37   :  { %s10101_s25 = smov [#allocation2]   ;;  %s9928_s1 = scalar_lea.hbm %s13277_s0, 1152 }
  0x38   :  { %s30_s26 = sshll.u32 %s10101_s25, 4  ;;  %p9929_p10 = scmp.ne.s32.totalorder %s13277_s0, %s9928_s1  ;;  %s31_s26 = int_to_ptr.vmem [resolvable:$true] %s30_s26 }
  0x39   :  { %p9932_p11 = scmp.lt.u32.totalorder %s9928_s1, %s13277_s0 }
  0x3b   :  { %p9934_p12 = pnand %p9932_p11, %p9929_p10 }
  0x3d   :  { %9937 = shalt.err (!%p9934_p12)
}
  0x3e   :  { %s9938_s16 = scalar_lea.vmem %s31_s26, 1152  ;;  %p9943_p0 = scmp.lt.s32.totalorder %s31_s26, %s31_s26 }
  0x3f   :  { %p9939_p13 = scmp.ne.s32.totalorder %s31_s26, %s9938_s16  ;;  %p9944_p1 = scmp.lt.s32.totalorder %s9938_s16, %s9938_s16 }
  0x41   :  { %p9945_p2 = por %p9944_p1, %p9943_p0 }
  0x43   :  { %p9946_p3 = pnand %p9945_p2, %p9939_p13 }
  0x45   :  { %9949 = shalt.err (!%p9946_p3)
}
  0x46   :  { %s10102_s5 = smov 384   ;;  %s10103_s20 = smov 24  }
  0x47   :  { %36 = dma.hbm_to_vmem [thread:$0]  %s13277_s0, 1152, %s31_s26, [#allocation3], %s10102_s5, %s10102_s5, %s10103_s20  }
  0x48   :  { %s10104_s21 = smov [#allocation7]   ;;  %s10105_s24 = smov [#allocation10]  }
  0x49   :  { %s54_s23 = sshll.u32 %s10104_s21, 4  ;;  %s78_s3 = sshll.u32 %s10105_s24, 4  ;;  %s55_s23 = int_to_ptr.vmem [resolvable:$true] %s54_s23  ;;  %s10238_s3 = int_to_ptr.vmem [resolvable:$true] %s78_s3 }
  0x4a   :  { %s9950_s27 = scalar_lea.hbm %s13279_s2, 9216 }
  0x4b   :  { %p9951_p4 = scmp.ne.s32.totalorder %s13279_s2, %s9950_s27  ;;  %p9954_p5 = scmp.lt.u32.totalorder %s9950_s27, %s13279_s2 }
  0x4d   :  { %p9956_p6 = pnand %p9954_p5, %p9951_p4 }
  0x4f   :  { %9959 = shalt.err (!%p9956_p6)
}
  0x50   :  { %s9960_s0 = scalar_lea.vmem %s55_s23, 9216  ;;  %p9965_p8 = scmp.lt.s32.totalorder %s55_s23, %s55_s23 }
  0x51   :  { %p9961_p7 = scmp.ne.s32.totalorder %s55_s23, %s9960_s0  ;;  %p9966_p9 = scmp.lt.s32.totalorder %s9960_s0, %s9960_s0 }
  0x53   :  { %p9967_p10 = por %p9966_p9, %p9965_p8 }
  0x55   :  { %p9968_p11 = pnand %p9967_p10, %p9961_p7 }
  0x57   :  { %9971 = shalt.err (!%p9968_p11)
}
  0x58   :  { %60 = dma.hbm_to_vmem [thread:$0]  %s13279_s2, 9216, %s55_s23, [#allocation6], %s10097_s13, %s10097_s13, %s10098_s14  }
  0x59   :  { %s9972_s5 = scalar_lea.hbm %s13281_s4, 9216 }
  0x5a   :  { %p9973_p12 = scmp.ne.s32.totalorder %s13281_s4, %s9972_s5  ;;  %p9976_p13 = scmp.lt.u32.totalorder %s9972_s5, %s13281_s4 }
  0x5c   :  { %p9978_p0 = pnand %p9976_p13, %p9973_p12 }
  0x5e   :  { %9981 = shalt.err (!%p9978_p0)
}
  0x5f   :  { %s9982_s24 = scalar_lea.vmem %s10238_s3, 9216  ;;  %p9987_p2 = scmp.lt.s32.totalorder %s10238_s3, %s10238_s3 }
  0x60   :  { %p9983_p1 = scmp.ne.s32.totalorder %s10238_s3, %s9982_s24  ;;  %p9988_p3 = scmp.lt.s32.totalorder %s9982_s24, %s9982_s24 }
  0x62   :  { %p9989_p4 = por %p9988_p3, %p9987_p2 }
  0x64   :  { %p9990_p5 = pnand %p9989_p4, %p9983_p1 }
  0x66   :  { %9993 = shalt.err (!%p9990_p5)
}
  0x67   :  { %84 = dma.hbm_to_vmem [thread:$0]  %s13281_s4, 9216, %s10238_s3, [#allocation9], %s10097_s13, %s10097_s13, %s10098_s14  }
  0x68   :  { %s10106_s18 = smov [#allocation13]   ;;  %s9994_s1 = scalar_lea.hbm %s13284_s7, 3072 }
  0x69   :  { %s104_s25 = sshll.u32 %s10106_s18, 4  ;;  %p9995_p6 = scmp.ne.s32.totalorder %s13284_s7, %s9994_s1  ;;  %s105_s25 = int_to_ptr.vmem [resolvable:$true] %s104_s25 }
  0x6a   :  { %p9998_p7 = scmp.lt.u32.totalorder %s9994_s1, %s13284_s7 }
  0x6c   :  { %p10000_p8 = pnand %p9998_p7, %p9995_p6 }
  0x6e   :  { %10003 = shalt.err (!%p10000_p8)
}
  0x6f   :  { %s10004_s30 = scalar_lea.vmem %s105_s25, 3072  ;;  %p10009_p10 = scmp.lt.s32.totalorder %s105_s25, %s105_s25 }
  0x70   :  { %p10005_p9 = scmp.ne.s32.totalorder %s105_s25, %s10004_s30  ;;  %p10010_p11 = scmp.lt.s32.totalorder %s10004_s30, %s10004_s30 }
  0x72   :  { %p10011_p12 = por %p10010_p11, %p10009_p10 }
  0x74   :  { %p10012_p13 = pnand %p10011_p12, %p10005_p9 }
  0x76   :  { %10015 = shalt.err (!%p10012_p13)
}
  0x77   :  { %s10107_s4 = smov 64   ;;  %s10108_s13 = smov 4  }
  0x78   :  { %110 = dma.hbm_to_vmem [thread:$0]  %s13284_s7, 3072, %s105_s25, [#allocation12], %s10107_s4, %s10107_s4, %s10108_s13  }
  0x79   :  { %s10109_s15 = smov [#allocation14]   ;;  %s10016_s17 = scalar_lea.hbm %s13286_s9, 1024 }
  0x7a   :  { %s118_s16 = sshll.u32 %s10109_s15, 4  ;;  %p10017_p0 = scmp.ne.s32.totalorder %s13286_s9, %s10016_s17  ;;  %s119_s16 = int_to_ptr.vmem [resolvable:$true] %s118_s16 }
  0x7b   :  { %p10020_p1 = scmp.lt.u32.totalorder %s10016_s17, %s13286_s9 }
  0x7d   :  { %p10022_p2 = pnand %p10020_p1, %p10017_p0 }
  0x7f   :  { %10025 = shalt.err (!%p10022_p2)
}
  0x80   :  { %s10026_s23 = scalar_lea.vmem %s119_s16, 1024  ;;  %p10031_p4 = scmp.lt.s32.totalorder %s119_s16, %s119_s16 }
  0x81   :  { %p10027_p3 = scmp.ne.s32.totalorder %s119_s16, %s10026_s23  ;;  %p10032_p5 = scmp.lt.s32.totalorder %s10026_s23, %s10026_s23 }
  0x83   :  { %p10033_p6 = por %p10032_p5, %p10031_p4 }
  0x85   :  { %p10034_p7 = pnand %p10033_p6, %p10027_p3 }
  0x87   :  { %10037 = shalt.err (!%p10034_p7)
}
  0x88   :  { %124 = dma.hbm_to_vmem [thread:$0]  %s13286_s9, 1024, %s119_s16, [#allocation15], %s10107_s4, %s10107_s4, %s10108_s13  }
  0x89   :  { %10082 = dma.done.wait [#allocation3], 1152  }
  0x8a   :  { %10083 = vsyncadd [#allocation3], 4294966144 }
  0x8b   :  { %10084 = dma.done.wait [#allocation6], 18432  }
  0x8c   :  { %10085 = vsyncadd [#allocation6], 4294948864 }
  0x8d   :  { %10086 = dma.done.wait [#allocation9], 18432  }
  0x8e   :  { %10087 = vsyncadd [#allocation9], 4294948864 }
  0x8f   :  { %10088 = dma.done.wait [#allocation12], 12288  }
  0x90   :  { %10089 = vsyncadd [#allocation12], 4294955008 }
  0x91   :  { %10090 = dma.done.wait [#allocation15], 1024  }
  0x92   :  { %10091 = vsyncadd [#allocation15], 4294966272  ;;  %v10299_v0 = vld [vmem:[#allocation5 + $0x4] ss:$12 sps:$4 sm:$0xff]   ;;  %v10301_v1 = vld [vmem:[#allocation5 + $0xc8] ss:$12 sps:$4 sm:$0xff]  }
  0x93   :  { %638 = vmatprep.subr.bf16.mxu0 %v10299_v0  ;;  %v10304_v2 = vld [vmem:[#allocation5] ss:$12 sps:$4 sm:$0xff]   ;;  %8319 = vmatprep.subr.bf16.mxu1 %v10301_v1  ;;  %v10307_v3 = vld [vmem:[#allocation5 + $0x8] ss:$12 sps:$4 sm:$0xff]   ;;  %v10315_v6 = vld [vmem:[#allocation5 + $0x18] ss:$12 sps:$4 sm:$0xff]  }
  0x94   :  { %639 = vmatpush1.bf16.msra.mxu0 %v10304_v2  ;;  %v10310_v4 = vld [vmem:[#allocation5 + $0x1c] ss:$12 sps:$4 sm:$0xff]   ;;  %8320 = vmatpush3.bf16.msra.mxu1 %v10307_v3  ;;  %v10313_v5 = vld [vmem:[#allocation5 + $0xe0] ss:$12 sps:$4 sm:$0xff]   ;;  %v10324_v9 = vld [vmem:[#allocation5 + $0xf8] ss:$12 sps:$4 sm:$0xff]  }
  0x95   :  { %640 = vmatprep.subr.bf16.mxu0 %v10310_v4  ;;  %v10318_v7 = vld [vmem:[#allocation5 + $0x20] ss:$12 sps:$4 sm:$0xff]   ;;  %8321 = vmatprep.subr.bf16.mxu1 %v10313_v5  ;;  %v10326_v10 = vld [vmem:[#allocation5 + $0x30] ss:$12 sps:$4 sm:$0xff]   ;;  %v10330_v11 = vld [vmem:[#allocation5 + $0x38] ss:$12 sps:$4 sm:$0xff]  }
  0x96   :  { %v10321_v8 = vld [vmem:[#allocation5 + $0x34] ss:$12 sps:$4 sm:$0xff]   ;;  %v10333_v12 = vld [vmem:[#allocation5 + $0x4c] ss:$12 sps:$4 sm:$0xff]   ;;  %v10335_v13 = vld [vmem:[#allocation5 + $0x110] ss:$12 sps:$4 sm:$0xff]  }
  0x97   :  { %v10338_v14 = vld [vmem:[#allocation5 + $0x48] ss:$12 sps:$4 sm:$0xff]   ;;  %v10342_v15 = vld [vmem:[#allocation5 + $0x50] ss:$12 sps:$4 sm:$0xff]   ;;  %v10349_v18 = vld [vmem:[#allocation5 + $0x60] ss:$12 sps:$4 sm:$0xff]  }
  0x98   :  { %641 = vmatpush1.bf16.msra.mxu0 %v10315_v6  ;;  %8322 = vmatpush3.bf16.msra.mxu1 %v10318_v7  ;;  %v10345_v16 = vld [vmem:[#allocation5 + $0x64] ss:$12 sps:$4 sm:$0xff]   ;;  %v10347_v17 = vld [vmem:[#allocation5 + $0x128] ss:$12 sps:$4 sm:$0xff]   ;;  %v10359_v21 = vld [vmem:[#allocation5 + $0x140] ss:$12 sps:$4 sm:$0xff]  }
  0x99   :  { %642 = vmatprep.subr.bf16.mxu0 %v10321_v8  ;;  %8323 = vmatprep.subr.bf16.mxu1 %v10324_v9  ;;  %v10352_v19 = vld [vmem:[#allocation5 + $0x68] ss:$12 sps:$4 sm:$0xff]   ;;  %v10361_v22 = vld [vmem:[#allocation5 + $0x78] ss:$12 sps:$4 sm:$0xff]   ;;  %v10364_v23 = vld [vmem:[#allocation5 + $0x80] ss:$12 sps:$4 sm:$0xff]  }
  0x9a   :  { %v10356_v20 = vld [vmem:[#allocation5 + $0x7c] ss:$12 sps:$4 sm:$0xff]   ;;  %v10368_v24 = vld [vmem:[#allocation5 + $0x94] ss:$12 sps:$4 sm:$0xff]   ;;  %v10371_v25 = vld [vmem:[#allocation5 + $0x158] ss:$12 sps:$4 sm:$0xff]  }
  0x9b   :  { %v10374_v26 = vld [vmem:[#allocation5 + $0x90] ss:$12 sps:$4 sm:$0xff]   ;;  %v10378_v27 = vld [vmem:[#allocation5 + $0x98] ss:$12 sps:$4 sm:$0xff]   ;;  %v10385_v31 = vld [vmem:[#allocation5 + $0xa8] ss:$12 sps:$4 sm:$0xff]  }
  0x9c   :  { %643 = vmatpush1.bf16.msra.mxu0 %v10326_v10  ;;  %8324 = vmatpush3.bf16.msra.mxu1 %v10330_v11  ;;  %v10380_v28 = vld [vmem:[#allocation5 + $0xac] ss:$12 sps:$4 sm:$0xff]   ;;  %v10383_v29 = vld [vmem:[#allocation5 + $0x170] ss:$12 sps:$4 sm:$0xff]   ;;  %v153_v30 = vld [vmem:[#allocation2 + $0x8] sm:$0xff]  ;;  %v13291_v40 = vmov 0.0  }
  0x9d   :  { %644 = vmatprep.subr.bf16.mxu0 %v10333_v12  ;;  %8325 = vmatprep.subr.bf16.mxu1 %v10335_v13  ;;  %v156_v32 = vpack.c.bf16 %v153_v30, %v153_v30  ;;  %v10388_v33 = vld [vmem:[#allocation5 + $0xb0] ss:$12 sps:$4 sm:$0xff]   ;;  %v10395_v36 = vld [vmem:[#allocation5 + $0xc0] ss:$12 sps:$4 sm:$0xff]   ;;  %v10400_v38 = vld [vmem:[#allocation5 + $0x188] ss:$12 sps:$4 sm:$0xff]  }
  0x9e   :  { %v10390_v34 = vld [vmem:[#allocation5 + $0xc4] ss:$12 sps:$4 sm:$0xff]   ;;  %v152_v35 = vld [vmem:[#allocation2] sm:$0xff]  ;;  %v10413_v42 = vld [vmem:[#allocation5 + $0x1a0] ss:$12 sps:$4 sm:$0xff]   ;;  %vm13332_vm0 = vmmov 0  }
  0x9f   :  { %752 = vmatprep.mubr.bf16.mxu1 %v156_v32  ;;  %670 = vmatprep.mubr.bf16.mxu0 %v156_v32  ;;  %v10398_v37 = vpack.c.bf16 %v152_v35, %v152_v35  ;;  %v10404_v39 = vld [vmem:[#allocation5 + $0xdc] ss:$12 sps:$4 sm:$0xff]   ;;  %v10409_v41 = vld [vmem:[#allocation5 + $0xd8] ss:$12 sps:$4 sm:$0xff]   ;;  %v10415_v43 = vld [vmem:[#allocation5 + $0xf4] ss:$12 sps:$4 sm:$0xff]  }
  0xa0   :  { %645 = vmatpush1.bf16.msra.mxu0 %v10338_v14  ;;  %8326 = vmatpush3.bf16.msra.mxu1 %v10342_v15  ;;  %v10420_v44 = vld [vmem:[#allocation5 + $0xf0] ss:$12 sps:$4 sm:$0xff]   ;;  %v10423_v45 = vld [vmem:[#allocation5 + $0x1b8] ss:$12 sps:$4 sm:$0xff]   ;;  %v10431_v47 = vld [vmem:[#allocation5 + $0x108] ss:$12 sps:$4 sm:$0xff]  }
  0xa1   :  { %646 = vmatprep.subr.bf16.mxu0 %v10345_v16  ;;  %8327 = vmatprep.subr.bf16.mxu1 %v10347_v17  ;;  %v10427_v46 = vld [vmem:[#allocation5 + $0x10c] ss:$12 sps:$4 sm:$0xff]   ;;  %v10433_v48 = vld [vmem:[#allocation5 + $0x1d0] ss:$12 sps:$4 sm:$0xff]   ;;  %v10443_v51 = vld [vmem:[#allocation5 + $0x1e8] ss:$12 sps:$4 sm:$0xff]  }
  0xa2   :  { %v10437_v49 = vld [vmem:[#allocation5 + $0x124] ss:$12 sps:$4 sm:$0xff]   ;;  %v10441_v50 = vld [vmem:[#allocation5 + $0x120] ss:$12 sps:$4 sm:$0xff]   ;;  %v10447_v52 = vld [vmem:[#allocation5 + $0x13c] ss:$12 sps:$4 sm:$0xff]  }
  0xa3   :  { %v10451_v53 = vld [vmem:[#allocation5 + $0x138] ss:$12 sps:$4 sm:$0xff]   ;;  %v10453_v54 = vld [vmem:[#allocation5 + $0x200] ss:$12 sps:$4 sm:$0xff]   ;;  %v10461_v56 = vld [vmem:[#allocation5 + $0x150] ss:$12 sps:$4 sm:$0xff]  }
  0xa4   :  { %647 = vmatpush1.bf16.msra.mxu0 %v10349_v18  ;;  %8328 = vmatpush3.bf16.msra.mxu1 %v10352_v19  ;;  %v10457_v55 = vld [vmem:[#allocation5 + $0x154] ss:$12 sps:$4 sm:$0xff]   ;;  %v10465_v57 = vld [vmem:[#allocation5 + $0x218] ss:$12 sps:$4 sm:$0xff]   ;;  %v10473_v60 = vld [vmem:[#allocation5 + $0x230] ss:$12 sps:$4 sm:$0xff]  }
  0xa5   :  { %648 = vmatprep.subr.bf16.mxu0 %v10356_v20  ;;  %8329 = vmatprep.subr.bf16.mxu1 %v10359_v21  ;;  %13407 = vst [vmem:[#allocation26_spill] sm:$0xff] %v10465_v57  ;;  %v10467_v58 = vld [vmem:[#allocation5 + $0x16c] ss:$12 sps:$4 sm:$0xff]   ;;  %v10471_v59 = vld [vmem:[#allocation5 + $0x168] ss:$12 sps:$4 sm:$0xff]   ;;  %13408 = vst [vmem:[#allocation27_spill] sm:$0xff] %v10473_v60 }
  0xa6   :  { %v10477_v61 = vld [vmem:[#allocation5 + $0x184] ss:$12 sps:$4 sm:$0xff]   ;;  %v154_v62 = vld [vmem:[#allocation2 + $0x10] sm:$0xff]  ;;  %v802_v32 = vld [vmem:[#allocation2 + $0x20] sm:$0xff]  ;;  %s10114_s28 = smov [#allocation16]  }
  0xa7   :  { %v10480_v63 = vld [vmem:[#allocation5 + $0x180] ss:$12 sps:$4 sm:$0xff]   ;;  %v157_v30 = vpack.c.bf16 %v154_v62, %v154_v62  ;;  %v10485_v35 = vld [vmem:[#allocation5 + $0x19c] ss:$12 sps:$4 sm:$0xff]   ;;  %s6742_s1 = sshll.u32 %s10114_s28, 4  ;;  %s6743_s1 = int_to_ptr.vmem [resolvable:$true] %s6742_s1 }
  0xa8   :  { %649 = vmatpush1.bf16.msra.mxu0 %v10361_v22  ;;  %8330 = vmatpush3.bf16.msra.mxu1 %v10364_v23  ;;  %v10494_v62 = vld [vmem:[#allocation5 + $0x1b4] ss:$12 sps:$4 sm:$0xff]   ;;  %s10038_s22 = scalar_lea.vmem %s6743_s1, 1152  ;;  %p10043_p9 = scmp.lt.s32.totalorder %s6743_s1, %s6743_s1 }
  0xa9   :  { %650 = vmatprep.subr.bf16.mxu0 %v10368_v24  ;;  %8331 = vmatprep.subr.bf16.mxu1 %v10371_v25  ;;  %p10039_p8 = scmp.ne.s32.totalorder %s6743_s1, %s10038_s22  ;;  %p10044_p10 = scmp.lt.s32.totalorder %s10038_s22, %s10038_s22 }
  0xab   :  { %p10045_p11 = por %p10044_p10, %p10043_p9 }
  0xac   :  { %651 = vmatpush1.bf16.msra.mxu0 %v10374_v26  ;;  %8332 = vmatpush3.bf16.msra.mxu1 %v10378_v27 }
  0xad   :  { %652 = vmatprep.subr.bf16.mxu0 %v10380_v28  ;;  %8333 = vmatprep.subr.bf16.mxu1 %v10383_v29  ;;  %p10046_p12 = pnand %p10045_p11, %p10039_p8 }
  0xb0   :  { %653 = vmatpush1.bf16.msra.mxu0 %v10385_v31  ;;  %8334 = vmatpush3.bf16.msra.mxu1 %v10388_v33 }
  0xb1   :  { %654 = vmatprep.subr.bf16.mxu0 %v10390_v34  ;;  %8545 = vmatprep.subr.bf16.mxu1 %v13291_v40 }
  0xb3   :  { %753 = vmatmul.mubr.bf16.vlgmr.msra.gmra.mrb[0].mxu1 %v10398_v37 }
  0xb4   :  { %655 = vmatpush1.bf16.msra.mxu0 %v10395_v36  ;;  %8546 = vmatpush3.bf16.msra.mxu1 %v10400_v38 }
  0xb5   :  { %656 = vmatprep.subr.bf16.mxu0 %v10404_v39  ;;  %8547 = vmatprep.subr.bf16.mxu1 %v13291_v40 }
  0xb6   :  { %8561 = vmatprep.mubr.msk.bf16.mxu1 %vm13332_vm0, %v13291_v40 }
  0xb8   :  { %657 = vmatpush1.bf16.msra.mxu0 %v10409_v41  ;;  %8548 = vmatpush3.bf16.msra.mxu1 %v10413_v42 }
  0xb9   :  { %658 = vmatprep.subr.bf16.mxu0 %v10415_v43  ;;  %8549 = vmatprep.subr.bf16.mxu1 %v13291_v40 }
  0xbc   :  { %659 = vmatpush1.bf16.msra.mxu0 %v10420_v44  ;;  %8550 = vmatpush3.bf16.msra.mxu1 %v10423_v45 }
  0xbd   :  { %660 = vmatprep.subr.bf16.mxu0 %v10427_v46  ;;  %8551 = vmatprep.subr.bf16.mxu1 %v13291_v40 }
  0xc0   :  { %661 = vmatpush1.bf16.msra.mxu0 %v10431_v47  ;;  %8552 = vmatpush3.bf16.msra.mxu1 %v10433_v48 }
  0xc1   :  { %662 = vmatprep.subr.bf16.mxu0 %v10437_v49  ;;  %8553 = vmatprep.subr.bf16.mxu1 %v13291_v40 }
  0xc4   :  { %663 = vmatpush1.bf16.msra.mxu0 %v10441_v50  ;;  %8554 = vmatpush3.bf16.msra.mxu1 %v10443_v51 }
  0xc5   :  { %664 = vmatprep.subr.bf16.mxu0 %v10447_v52  ;;  %8555 = vmatprep.subr.bf16.mxu1 %v13291_v40 }
  0xc8   :  { %665 = vmatpush1.bf16.msra.mxu0 %v10451_v53  ;;  %8556 = vmatpush3.bf16.msra.mxu1 %v10453_v54 }
  0xc9   :  { %666 = vmatprep.subr.bf16.mxu0 %v10457_v55  ;;  %8557 = vmatprep.subr.bf16.mxu1 %v13291_v40 }
  0xcc   :  { %667 = vmatpush1.bf16.msra.mxu0 %v10461_v56  ;;  %8558 = vmatpush3.bf16.msra.mxu1 %v10465_v57  ;;  %v805_v57 = vpack.c.bf16 %v802_v32, %v802_v32  ;;  %v10522_v32 = vld [vmem:[#allocation5 + $0x1f8] ss:$12 sps:$4 sm:$0xff]  }
  0xcd   :  { %668 = vmatprep.subr.bf16.mxu0 %v10467_v58  ;;  %8559 = vmatprep.subr.bf16.mxu1 %v13291_v40  ;;  %v10490_v40 = vld [vmem:[#allocation5 + $0x198] ss:$12 sps:$4 sm:$0xff]  }
  0xd0   :  { %669 = vmatpush1.bf16.msra.mxu0 %v10471_v59  ;;  %8560 = vmatpush3.bf16.msra.mxu1 %v10473_v60  ;;  %v13294_v60 = vmov 0  }
  0xd1   :  { %679 = vmatprep.subr.bf16.mxu0 %v10477_v61  ;;  %807 = vmatprep.subr.bf16.mxu1 %v10299_v0  ;;  %v10499_v0 = vld [vmem:[#allocation5 + $0x1b0] ss:$12 sps:$4 sm:$0xff]  }
  0xd3   :  { %671 = vmatmul.mubr.bf16.vlgmr.msra.gmra.mrb[0].mxu0 %v10398_v37  ;;  %8562 = vmatmul.mubr.bf16.vlgmr.msra.gmra.mrb[4].mxu1 %v157_v30  ;;  %v10503_v37 = vld [vmem:[#allocation5 + $0x1cc] ss:$12 sps:$4 sm:$0xff]  }
  0xd4   :  { %680 = vmatpush1.bf16.msra.mxu0 %v10480_v63  ;;  %808 = vmatpush1.bf16.msra.mxu1 %v10304_v2  ;;  %v10507_v2 = vld [vmem:[#allocation5 + $0x1c8] ss:$12 sps:$4 sm:$0xff]  }
  0xd5   :  { %681 = vmatprep.subr.bf16.mxu0 %v10485_v35  ;;  %809 = vmatprep.subr.bf16.mxu1 %v10310_v4  ;;  %v10511_v4 = vld [vmem:[#allocation5 + $0x1e4] ss:$12 sps:$4 sm:$0xff]  }
  0xd6   :  { %711 = vmatprep.mubr.bf16.mxu0 %v13294_v60  ;;  %839 = vmatprep.mubr.bf16.mxu1 %v805_v57 }
  0xd8   :  { %682 = vmatpush1.bf16.msra.mxu0 %v10490_v40  ;;  %810 = vmatpush1.bf16.msra.mxu1 %v10315_v6  ;;  %v10515_v6 = vld [vmem:[#allocation5 + $0x1e0] ss:$12 sps:$4 sm:$0xff]  }
  0xd9   :  { %683 = vmatprep.subr.bf16.mxu0 %v10494_v62  ;;  %811 = vmatprep.subr.bf16.mxu1 %v10321_v8  ;;  %v10519_v8 = vld [vmem:[#allocation5 + $0x1fc] ss:$12 sps:$4 sm:$0xff]  }
  0xdc   :  { %684 = vmatpush1.bf16.msra.mxu0 %v10499_v0  ;;  %812 = vmatpush1.bf16.msra.mxu1 %v10326_v10  ;;  %v10524_v10 = vld [vmem:[#allocation5 + $0x214] ss:$12 sps:$4 sm:$0xff]  }
  0xdd   :  { %685 = vmatprep.subr.bf16.mxu0 %v10503_v37  ;;  %813 = vmatprep.subr.bf16.mxu1 %v10333_v12  ;;  %v10530_v12 = vld [vmem:[#allocation5 + $0x210] ss:$12 sps:$4 sm:$0xff]  }
  0xe0   :  { %686 = vmatpush1.bf16.msra.mxu0 %v10507_v2  ;;  %814 = vmatpush1.bf16.msra.mxu1 %v10338_v14  ;;  %v10532_v14 = vld [vmem:[#allocation5 + $0x22c] ss:$12 sps:$4 sm:$0xff]  }
  0xe1   :  { %687 = vmatprep.subr.bf16.mxu0 %v10511_v4  ;;  %815 = vmatprep.subr.bf16.mxu1 %v10345_v16  ;;  %v10538_v16 = vld [vmem:[#allocation5 + $0x228] ss:$12 sps:$4 sm:$0xff]  }
  0xe4   :  { %688 = vmatpush1.bf16.msra.mxu0 %v10515_v6  ;;  %816 = vmatpush1.bf16.msra.mxu1 %v10349_v18  ;;  %v9432_v18 = vld [vmem:[#allocation7 + $0x1c] ss:$12 sps:$4 sm:$0xff]  }
  0xe5   :  { %689 = vmatprep.subr.bf16.mxu0 %v10519_v8  ;;  %817 = vmatprep.subr.bf16.mxu1 %v10356_v20 }
  0xe8   :  { %690 = vmatpush1.bf16.msra.mxu0 %v10522_v32  ;;  %818 = vmatpush1.bf16.msra.mxu1 %v10361_v22  ;;  %v9441_v22 = vld [vmem:[#allocation7 + $0xe0] ss:$12 sps:$4 sm:$0xff]  }
  0xe9   :  { %691 = vmatprep.subr.bf16.mxu0 %v10524_v10  ;;  %819 = vmatprep.subr.bf16.mxu1 %v10368_v24 }
  0xec   :  { %692 = vmatpush1.bf16.msra.mxu0 %v10530_v12  ;;  %820 = vmatpush1.bf16.msra.mxu1 %v10374_v26  ;;  %v9442_v26 = vld [vmem:[#allocation7 + $0x20] ss:$12 sps:$4 sm:$0xff]  }
  0xed   :  { %693 = vmatprep.subr.bf16.mxu0 %v10532_v14  ;;  %821 = vmatprep.subr.bf16.mxu1 %v10380_v28  ;;  %v9433_v28 = vld [vmem:[#allocation7 + $0x30] ss:$12 sps:$4 sm:$0xff]  }
  0xf0   :  { %694 = vmatpush1.bf16.msra.mxu0 %v10538_v16  ;;  %822 = vmatpush1.bf16.msra.mxu1 %v10385_v31  ;;  %v9447_v31 = vld [vmem:[#allocation7 + $0x38] ss:$12 sps:$4 sm:$0xff]  }
  0xf1   :  { %8350 = vmatprep.subr.bf16.mxu0 %v10301_v1  ;;  %823 = vmatprep.subr.bf16.mxu1 %v10390_v34  ;;  %v801_v1 = vld [vmem:[#allocation2 + $0x18] sm:$0xff] }
  0xf2   :  { %v9438_v34 = vld [vmem:[#allocation7 + $0x48] ss:$12 sps:$4 sm:$0xff]  }
  0xf3   :  { %712 = vmatmul.mubr.bf16.vlgmr.msra.gmra.mrb[0].mxu0 %v157_v30  ;;  %v9480_v30 = vld [vmem:[#allocation7 + $0x1a0] ss:$12 sps:$4 sm:$0xff]  }
  0xf4   :  { %8351 = vmatpush3.bf16.msra.mxu0 %v10307_v3  ;;  %921 = vmatprep.mubr.bf16.mxu0 %v805_v57  ;;  %v804_v3 = vpack.c.bf16 %v801_v1, %v801_v1  ;;  %v9470_v57 = vld [vmem:[#allocation7 + $0xdc] ss:$12 sps:$4 sm:$0xff]  }
  0xf5   :  { %824 = vmatpush1.bf16.msra.mxu1 %v10395_v36  ;;  %8352 = vmatprep.subr.bf16.mxu0 %v10313_v5  ;;  %v13409_v5 = vmov 0.0   ;;  %v9445_v36 = vld [vmem:[#allocation7 + $0x64] ss:$12 sps:$4 sm:$0xff]  }
  0xf6   :  { %825 = vmatprep.subr.bf16.mxu1 %v10404_v39  ;;  %v9456_v39 = vld [vmem:[#allocation7 + $0x128] ss:$12 sps:$4 sm:$0xff]  }
  0xf8   :  { %8353 = vmatpush3.bf16.msra.mxu0 %v10318_v7  ;;  %v13410_v7 = vld [vmem:[#allocation26_spill] sm:$0xff] }
  0xf9   :  { %826 = vmatpush1.bf16.msra.mxu1 %v10409_v41  ;;  %8354 = vmatprep.subr.bf16.mxu0 %v10324_v9  ;;  %v803_v9 = vld [vmem:[#allocation2 + $0x28] sm:$0xff]  ;;  %v9450_v41 = vld [vmem:[#allocation7 + $0x7c] ss:$12 sps:$4 sm:$0xff]  }
  0xfa   :  { %827 = vmatprep.subr.bf16.mxu1 %v10415_v43  ;;  %v806_v20 = vpack.c.bf16 %v803_v9, %v803_v9  ;;  %v9461_v43 = vld [vmem:[#allocation7 + $0x140] ss:$12 sps:$4 sm:$0xff]  }
  0xfc   :  { %8355 = vmatpush3.bf16.msra.mxu0 %v10330_v11  ;;  %v9429_v11 = vld [vmem:[#allocation7 + $0x4] ss:$12 sps:$4 sm:$0xff]  }
  0xfd   :  { %828 = vmatpush1.bf16.msra.mxu1 %v10420_v44  ;;  %8356 = vmatprep.subr.bf16.mxu0 %v10335_v13  ;;  %v9436_v13 = vld [vmem:[#allocation7 + $0xc8] ss:$12 sps:$4 sm:$0xff]   ;;  %v9448_v44 = vld [vmem:[#allocation7 + $0x78] ss:$12 sps:$4 sm:$0xff]  }
  0xfe   :  { %829 = vmatprep.subr.bf16.mxu1 %v10427_v46  ;;  %v9462_v46 = vld [vmem:[#allocation7 + $0x80] ss:$12 sps:$4 sm:$0xff]  }
 0x100   :  { %8357 = vmatpush3.bf16.msra.mxu0 %v10342_v15  ;;  %v971_v15 = vld [vmem:[#allocation2 + $0x38] sm:$0xff] }
 0x101   :  { %830 = vmatpush1.bf16.msra.mxu1 %v10431_v47  ;;  %8358 = vmatprep.subr.bf16.mxu0 %v10347_v17  ;;  %v9427_v17 = vld [vmem:[#allocation7] ss:$12 sps:$4 sm:$0xff]   ;;  %v974_v24 = vpack.c.bf16 %v971_v15, %v971_v15  ;;  %v9466_v47 = vld [vmem:[#allocation7 + $0x158] ss:$12 sps:$4 sm:$0xff]  }
 0x102   :  { %831 = vmatprep.subr.bf16.mxu1 %v10437_v49  ;;  %v9460_v49 = vld [vmem:[#allocation7 + $0xac] ss:$12 sps:$4 sm:$0xff]  }
 0x104   :  { %8359 = vmatpush3.bf16.msra.mxu0 %v10352_v19  ;;  %v9437_v19 = vld [vmem:[#allocation7 + $0x8] ss:$12 sps:$4 sm:$0xff]  }
 0x105   :  { %832 = vmatpush1.bf16.msra.mxu1 %v10441_v50  ;;  %8360 = vmatprep.subr.bf16.mxu0 %v10359_v21  ;;  %v13411_v21 = vld [vmem:[#allocation27_spill] sm:$0xff] }
 0x106   :  { %833 = vmatprep.subr.bf16.mxu1 %v10447_v52  ;;  %v9467_v50 = vld [vmem:[#allocation7 + $0x98] ss:$12 sps:$4 sm:$0xff]   ;;  %v9471_v52 = vld [vmem:[#allocation7 + $0x170] ss:$12 sps:$4 sm:$0xff]  }
 0x108   :  { %8361 = vmatpush3.bf16.msra.mxu0 %v10364_v23  ;;  %v9430_v23 = vld [vmem:[#allocation7 + $0x18] ss:$12 sps:$4 sm:$0xff]  }
 0x109   :  { %834 = vmatpush1.bf16.msra.mxu1 %v10451_v53  ;;  %8362 = vmatprep.subr.bf16.mxu0 %v10371_v25  ;;  %v9435_v25 = vld [vmem:[#allocation7 + $0x34] ss:$12 sps:$4 sm:$0xff]   ;;  %v9465_v53 = vld [vmem:[#allocation7 + $0xc4] ss:$12 sps:$4 sm:$0xff]  }
 0x10a   :  { %835 = vmatprep.subr.bf16.mxu1 %v10457_v55  ;;  %v970_v55 = vld [vmem:[#allocation2 + $0x30] sm:$0xff] }
 0x10c   :  { %8363 = vmatpush3.bf16.msra.mxu0 %v10378_v27  ;;  %v9446_v27 = vld [vmem:[#allocation7 + $0xf8] ss:$12 sps:$4 sm:$0xff]  }
 0x10d   :  { %836 = vmatpush1.bf16.msra.mxu1 %v10461_v56  ;;  %8364 = vmatprep.subr.bf16.mxu0 %v10383_v29  ;;  %v9440_v29 = vld [vmem:[#allocation7 + $0x4c] ss:$12 sps:$4 sm:$0xff]  }
 0x10e   :  { %837 = vmatprep.subr.bf16.mxu1 %v10467_v58  ;;  %v9463_v56 = vld [vmem:[#allocation7 + $0xc0] ss:$12 sps:$4 sm:$0xff]   ;;  %v10613_v58 = vpack.c.bf16 %v970_v55, %v970_v55 }
 0x110   :  { %8365 = vmatpush3.bf16.msra.mxu0 %v10388_v33  ;;  %v9451_v33 = vld [vmem:[#allocation7 + $0x110] ss:$12 sps:$4 sm:$0xff]  }
 0x111   :  { %838 = vmatpush1.bf16.msra.mxu1 %v10471_v59  ;;  %8565 = vmatprep.subr.bf16.mxu0 %v13409_v5  ;;  %v9476_v59 = vld [vmem:[#allocation7 + $0x188] ss:$12 sps:$4 sm:$0xff]  }
 0x112   :  { %848 = vmatprep.subr.bf16.mxu1 %v10477_v61  ;;  %v9468_v61 = vld [vmem:[#allocation7 + $0xd8] ss:$12 sps:$4 sm:$0xff]  }
 0x113   :  { %922 = vmatmul.mubr.bf16.vlgmr.msra.gmra.mrb[4].mxu0 %v804_v3 }
 0x114   :  { %840 = vmatmul.mubr.bf16.vlgmr.msra.gmra.mrb[8].mxu1 %v804_v3  ;;  %8566 = vmatpush3.bf16.msra.mxu0 %v10400_v38  ;;  %v9452_v38 = vld [vmem:[#allocation7 + $0x50] ss:$12 sps:$4 sm:$0xff]   ;;  %v9491_v3 = vld [vmem:[#allocation7 + $0x154] ss:$12 sps:$4 sm:$0xff]  }
 0x115   :  { %849 = vmatpush1.bf16.msra.mxu1 %v10480_v63  ;;  %8567 = vmatprep.subr.bf16.mxu0 %v13409_v5  ;;  %v9475_v63 = vld [vmem:[#allocation7 + $0xf4] ss:$12 sps:$4 sm:$0xff]  }
 0x116   :  { %850 = vmatprep.subr.bf16.mxu1 %v10485_v35  ;;  %880 = vmatprep.mubr.bf16.mxu1 %v13294_v60  ;;  %v9473_v35 = vld [vmem:[#allocation7 + $0xf0] ss:$12 sps:$4 sm:$0xff]  }
 0x117   :  { %8581 = vmatprep.mubr.msk.bf16.mxu0 %vm13332_vm0, %v13409_v5 }
 0x118   :  { %8568 = vmatpush3.bf16.msra.mxu0 %v10413_v42  ;;  %v9457_v42 = vld [vmem:[#allocation7 + $0x68] ss:$12 sps:$4 sm:$0xff]  }
 0x119   :  { %851 = vmatpush1.bf16.msra.mxu1 %v10490_v40  ;;  %8569 = vmatprep.subr.bf16.mxu0 %v13409_v5  ;;  %v9443_v40 = vld [vmem:[#allocation7 + $0x60] ss:$12 sps:$4 sm:$0xff]  }
 0x11a   :  { %852 = vmatprep.subr.bf16.mxu1 %v10494_v62  ;;  %v1618_v62 = vlaneseq }
 0x11c   :  { %8570 = vmatpush3.bf16.msra.mxu0 %v10423_v45  ;;  %v9455_v45 = vld [vmem:[#allocation7 + $0x94] ss:$12 sps:$4 sm:$0xff]   ;;  %v10626_v1 = vand.u32 127, %v1618_v62 }
 0x11d   :  { %853 = vmatpush1.bf16.msra.mxu1 %v10499_v0  ;;  %8571 = vmatprep.subr.bf16.mxu0 %v13409_v5  ;;  %v9479_v0 = vld [vmem:[#allocation7 + $0x10c] ss:$12 sps:$4 sm:$0xff]  }
 0x11e   :  { %854 = vmatprep.subr.bf16.mxu1 %v10503_v37  ;;  %v9484_v37 = vld [vmem:[#allocation7 + $0x1b8] ss:$12 sps:$4 sm:$0xff]   ;;  %13413 = vst [vmem:[#allocation27_spill] sm:$0xff] %v10626_v1 }
 0x120   :  { %8572 = vmatpush3.bf16.msra.mxu0 %v10433_v48  ;;  %v9453_v48 = vld [vmem:[#allocation7 + $0x90] ss:$12 sps:$4 sm:$0xff]  }
 0x121   :  { %855 = vmatpush1.bf16.msra.mxu1 %v10507_v2  ;;  %8573 = vmatprep.subr.bf16.mxu0 %v13409_v5  ;;  %v10621_v2 = vshrl.u32 %v1618_v62, 7 }
 0x122   :  { %856 = vmatprep.subr.bf16.mxu1 %v10511_v4  ;;  %v9477_v4 = vld [vmem:[#allocation7 + $0x108] ss:$12 sps:$4 sm:$0xff]  }
 0x123   :  { %13412 = vst [vmem:[#allocation26_spill] sm:$0xff] %v10621_v2  ;;  %v1622_v15 = vadd.s32 24, %v10621_v2  ;;  %v1630_v55 = vadd.s32 88, %v10621_v2 }
 0x124   :  { %8574 = vmatpush3.bf16.msra.mxu0 %v10443_v51  ;;  %v9458_v51 = vld [vmem:[#allocation7 + $0xa8] ss:$12 sps:$4 sm:$0xff]  }
 0x125   :  { %857 = vmatpush1.bf16.msra.mxu1 %v10515_v6  ;;  %8575 = vmatprep.subr.bf16.mxu0 %v13409_v5  ;;  %v9483_v6 = vld [vmem:[#allocation7 + $0x124] ss:$12 sps:$4 sm:$0xff]  }
 0x126   :  { %858 = vmatprep.subr.bf16.mxu1 %v10519_v8  ;;  %v9488_v8 = vld [vmem:[#allocation7 + $0x1d0] ss:$12 sps:$4 sm:$0xff]  }
 0x128   :  { %8576 = vmatpush3.bf16.msra.mxu0 %v10453_v54  ;;  %v9472_v54 = vld [vmem:[#allocation7 + $0xb0] ss:$12 sps:$4 sm:$0xff]  }
 0x129   :  { %859 = vmatpush1.bf16.msra.mxu1 %v10522_v32  ;;  %8577 = vmatprep.subr.bf16.mxu0 %v13409_v5  ;;  %v9481_v32 = vld [vmem:[#allocation7 + $0x120] ss:$12 sps:$4 sm:$0xff]  }
 0x12a   :  { %860 = vmatprep.subr.bf16.mxu1 %v10524_v10  ;;  %v1620_v10 = vadd.s32 8, %v10621_v2 }
 0x12c   :  { %8578 = vmatpush3.bf16.msra.mxu0 %v13410_v7  ;;  %v10629_v7 = vmul.u32 2, %v10621_v2  ;;  %v10631_v9 = vmul.u32 2, %v1620_v10 }
 0x12d   :  { %861 = vmatpush1.bf16.msra.mxu1 %v10530_v12  ;;  %8579 = vmatprep.subr.bf16.mxu0 %v13409_v5  ;;  %v9487_v12 = vld [vmem:[#allocation7 + $0x13c] ss:$12 sps:$4 sm:$0xff]  }
 0x12e   :  { %862 = vmatprep.subr.bf16.mxu1 %v10532_v14  ;;  %v9492_v14 = vld [vmem:[#allocation7 + $0x1e8] ss:$12 sps:$4 sm:$0xff]   ;;  %13414 = vst [vmem:[#allocation28_spill] sm:$0xff] %v10631_v9 }
 0x130   :  { %8580 = vmatpush3.bf16.msra.mxu0 %v13411_v21  ;;  %v10643_v21 = vadd.s32 1, %v10631_v9 }
 0x131   :  { %863 = vmatpush1.bf16.msra.mxu1 %v10538_v16  ;;  %1456 = vmatprep.subr.bf16.mxu0 %v9429_v11  ;;  %v9485_v16 = vld [vmem:[#allocation7 + $0x138] ss:$12 sps:$4 sm:$0xff]   ;;  %v1621_v11 = vadd.s32 16, %v10621_v2 }
 0x132   :  { %8381 = vmatprep.subr.bf16.mxu1 %v9436_v13  ;;  %v9496_v13 = vld [vmem:[#allocation7 + $0x200] ss:$12 sps:$4 sm:$0xff]   ;;  %vm2640_vm5 = vcmp.eq.s32.totalorder %v10626_v1, %v10643_v21 }
 0x133   :  { %8582 = vmatmul.mubr.bf16.vlgmr.msra.gmra.mrb[8].mxu0 %v806_v20 }
 0x134   :  { %881 = vmatmul.mubr.bf16.vlgmr.msra.gmra.mrb[8].mxu1 %v806_v20  ;;  %1457 = vmatpush1.bf16.msra.mxu0 %v9427_v17  ;;  %v9489_v17 = vld [vmem:[#allocation7 + $0x150] ss:$12 sps:$4 sm:$0xff]   ;;  %v10640_v20 = vadd.s32 1, %v10629_v7 }
 0x135   :  { %1458 = vmatprep.subr.bf16.mxu0 %v9432_v18  ;;  %8382 = vmatpush3.bf16.msra.mxu1 %v9437_v19  ;;  %v10637_v18 = vadd.s32 128, %v10626_v1  ;;  %v9495_v19 = vld [vmem:[#allocation7 + $0x16c] ss:$12 sps:$4 sm:$0xff]  }
 0x136   :  { %8383 = vmatprep.subr.bf16.mxu1 %v9441_v22  ;;  %1570 = vmatprep.mubr.bf16.mxu1 %v974_v24  ;;  %v10645_v22 = vmul.u32 2, %v1621_v11  ;;  %vm2634_vm4 = vcmp.eq.s32.totalorder %v10626_v1, %v10640_v20  ;;  %v1634_v11 = vadd.s32 120, %v10621_v2 }
 0x137   :  { %1488 = vmatprep.mubr.bf16.mxu0 %v974_v24  ;;  %v9500_v24 = vld [vmem:[#allocation7 + $0x218] ss:$12 sps:$4 sm:$0xff]   ;;  %vm2635_vm1 = vcmp.eq.s32.totalorder %v10637_v18, %v10640_v20  ;;  %vm2641_vm2 = vcmp.eq.s32.totalorder %v10637_v18, %v10643_v21  ;;  %vm10702_vm8 = vmpackc.low %vm2640_vm5, %vm2634_vm4 }
 0x138   :  { %1459 = vmatpush1.bf16.msra.mxu0 %v9430_v23  ;;  %v1623_v23 = vadd.s32 32, %v10621_v2  ;;  %vm10674_vm3 = vmpackc.low %vm2641_vm2, %vm2635_vm1 }
 0x139   :  { %1460 = vmatprep.subr.bf16.mxu0 %v9435_v25  ;;  %8384 = vmatpush3.bf16.msra.mxu1 %v9442_v26  ;;  %v10648_v25 = vmul.u32 2, %v1622_v15  ;;  %v1624_v26 = vadd.s32 40, %v10621_v2  ;;  %v9516_v15 = vld [vmem:[#allocation7 + $0x1fc] ss:$12 sps:$4 sm:$0xff]  }
 0x13a   :  { %8385 = vmatprep.subr.bf16.mxu1 %v9446_v27  ;;  %v9493_v27 = vld [vmem:[#allocation7 + $0x168] ss:$12 sps:$4 sm:$0xff]  }
 0x13c   :  { %1461 = vmatpush1.bf16.msra.mxu0 %v9433_v28  ;;  %v9499_v28 = vld [vmem:[#allocation7 + $0x184] ss:$12 sps:$4 sm:$0xff]  }
 0x13d   :  { %1462 = vmatprep.subr.bf16.mxu0 %v9440_v29  ;;  %8386 = vmatpush3.bf16.msra.mxu1 %v9447_v31  ;;  %v9504_v29 = vld [vmem:[#allocation7 + $0x230] ss:$12 sps:$4 sm:$0xff]  }
 0x13e   :  { %8387 = vmatprep.subr.bf16.mxu1 %v9451_v33  ;;  %v972_v31 = vld [vmem:[#allocation2 + $0x40] sm:$0xff]  ;;  %v10657_v33 = vadd.s32 1, %v10645_v22 }
 0x140   :  { %1463 = vmatpush1.bf16.msra.mxu0 %v9438_v34  ;;  %v10659_v34 = vmul.u32 2, %v1623_v23  ;;  %vm2647_vm6 = vcmp.eq.s32.totalorder %v10637_v18, %v10657_v33  ;;  %vm2646_vm10 = vcmp.eq.s32.totalorder %v10626_v1, %v10657_v33  ;;  %v1635_v23 = vadd.s32 128, %v10621_v2 }
 0x141   :  { %1464 = vmatprep.subr.bf16.mxu0 %v9445_v36  ;;  %8388 = vmatpush3.bf16.msra.mxu1 %v9452_v38  ;;  %v1625_v36 = vadd.s32 48, %v10621_v2  ;;  %v1626_v38 = vadd.s32 56, %v10621_v2 }
 0x142   :  { %8389 = vmatprep.subr.bf16.mxu1 %v9456_v39  ;;  %v10664_v39 = vadd.s32 1, %v10648_v25 }
 0x144   :  { %1465 = vmatpush1.bf16.msra.mxu0 %v9443_v40  ;;  %v10666_v40 = vmul.u32 2, %v1624_v26  ;;  %vm2653_vm7 = vcmp.eq.s32.totalorder %v10637_v18, %v10664_v39  ;;  %vm2652_vm11 = vcmp.eq.s32.totalorder %v10626_v1, %v10664_v39 }
 0x145   :  { %1466 = vmatprep.subr.bf16.mxu0 %v9450_v41  ;;  %8390 = vmatpush3.bf16.msra.mxu1 %v9457_v42  ;;  %v9497_v41 = vld [vmem:[#allocation7 + $0x180] ss:$12 sps:$4 sm:$0xff]   ;;  %v9503_v42 = vld [vmem:[#allocation7 + $0x19c] ss:$12 sps:$4 sm:$0xff]   ;;  %vm8709_vm9 = vmpackc.low %vm2653_vm7, %vm2647_vm6 }
 0x146   :  { %8391 = vmatprep.subr.bf16.mxu1 %v9461_v43  ;;  %v10669_v43 = vpack.c.bf16 %v972_v31, %v972_v31  ;;  %vm8711_vm14 = vmpackc.low %vm2652_vm11, %vm2646_vm10  ;;  %v9514_v31 = vld [vmem:[#allocation7 + $0x1f8] ss:$12 sps:$4 sm:$0xff]  }
 0x148   :  { %1467 = vmatpush1.bf16.msra.mxu0 %v9448_v44  ;;  %v1638_v44 = vadd.s32 152, %v10621_v2 }
 0x149   :  { %1468 = vmatprep.subr.bf16.mxu0 %v9455_v45  ;;  %8392 = vmatpush3.bf16.msra.mxu1 %v9462_v46  ;;  %v1627_v45 = vadd.s32 64, %v10621_v2  ;;  %v1628_v46 = vadd.s32 72, %v10621_v2 }
 0x14a   :  { %8393 = vmatprep.subr.bf16.mxu1 %v9466_v47  ;;  %v10685_v47 = vadd.s32 1, %v10659_v34 }
 0x14c   :  { %1469 = vmatpush1.bf16.msra.mxu0 %v9453_v48  ;;  %v10687_v48 = vmul.u32 2, %v1625_v36  ;;  %vm2659_vm12 = vcmp.eq.s32.totalorder %v10637_v18, %v10685_v47  ;;  %vm2658_vm15 = vcmp.eq.s32.totalorder %v10626_v1, %v10685_v47  ;;  %v10811_v36 = vadd.s32 384, %v10626_v1 }
 0x14d   :  { %1470 = vmatprep.subr.bf16.mxu0 %v9460_v49  ;;  %8394 = vmatpush3.bf16.msra.mxu1 %v9467_v50  ;;  %v10694_v49 = vadd.s32 1, %v10666_v40  ;;  %v10696_v50 = vmul.u32 2, %v1626_v38  ;;  %v1637_v38 = vadd.s32 144, %v10621_v2 }
 0x14e   :  { %8395 = vmatprep.subr.bf16.mxu1 %v9471_v52  ;;  %v13326_v52 = vmov 1.0|1.0  }
 0x14f   :  { %vm2665_vm13 = vcmp.eq.s32.totalorder %v10637_v18, %v10694_v49  ;;  %vm2664_vm2 = vcmp.eq.s32.totalorder %v10626_v1, %v10694_v49 }
 0x150   :  { %1471 = vmatpush1.bf16.msra.mxu0 %v9458_v51  ;;  %v9501_v51 = vld [vmem:[#allocation7 + $0x198] ss:$12 sps:$4 sm:$0xff]   ;;  %vm8713_vm1 = vmpackc.low %vm2665_vm13, %vm2659_vm12 }
 0x151   :  { %1472 = vmatprep.subr.bf16.mxu0 %v9465_v53  ;;  %8396 = vmatpush3.bf16.msra.mxu1 %v9472_v54  ;;  %v1629_v54 = vadd.s32 80, %v10621_v2  ;;  %vm8715_vm5 = vmpackc.low %vm2664_vm2, %vm2658_vm15 }
 0x152   :  { %8585 = vmatprep.subr.bf16.mxu1 %v13409_v5 }
 0x154   :  { %1473 = vmatpush1.bf16.msra.mxu0 %v9463_v56  ;;  %1571 = vmatmul.mubr.bf16.vlgmr.msra.gmra.mrb[12].mxu1 %v10613_v58  ;;  %v9507_v56 = vld [vmem:[#allocation7 + $0x1b4] ss:$12 sps:$4 sm:$0xff]  }
 0x155   :  { %1474 = vmatprep.subr.bf16.mxu0 %v9470_v57  ;;  %8586 = vmatpush3.bf16.msra.mxu1 %v9476_v59  ;;  %v10715_v57 = vmul.u32 2, %v1627_v45  ;;  %v10724_v59 = vadd.s32 1, %v10696_v50  ;;  %v1641_v45 = vadd.s32 176, %v10621_v2 }
 0x156   :  { %8587 = vmatprep.subr.bf16.mxu1 %v13409_v5  ;;  %8601 = vmatprep.mubr.msk.bf16.mxu1 %vm13332_vm0, %v13409_v5 }
 0x157   :  { %v10742_v62 = vadd.s32 1, %v10715_v57  ;;  %vm2677_vm4 = vcmp.eq.s32.totalorder %v10637_v18, %v10724_v59 }
 0x158   :  { %1475 = vmatpush1.bf16.msra.mxu0 %v9468_v61  ;;  %v10726_v61 = vmul.u32 2, %v1628_v46  ;;  %v10838_v46 = vmul.u32 2, %v1635_v23  ;;  %v1640_v23 = vadd.s32 168, %v10621_v2 }
 0x159   :  { %1476 = vmatprep.subr.bf16.mxu0 %v9475_v63  ;;  %8588 = vmatpush3.bf16.msra.mxu1 %v9480_v30  ;;  %v9505_v63 = vld [vmem:[#allocation7 + $0x1b0] ss:$12 sps:$4 sm:$0xff]   ;;  %v9510_v30 = vld [vmem:[#allocation7 + $0x1cc] ss:$12 sps:$4 sm:$0xff]   ;;  %vm2682_vm13 = vcmp.eq.s32.totalorder %v10626_v1, %v10742_v62 }
 0x15a   :  { %8589 = vmatprep.subr.bf16.mxu1 %v13409_v5  ;;  %13426 = vst [vmem:[#allocation30_spill] sm:$0xff] %v10838_v46 }
 0x15c   :  { %1477 = vmatpush1.bf16.msra.mxu0 %v9473_v35  ;;  %v10734_v35 = vmul.u32 2, %v1629_v54 }
 0x15d   :  { %1478 = vmatprep.subr.bf16.mxu0 %v9479_v0  ;;  %8590 = vmatpush3.bf16.msra.mxu1 %v9484_v37  ;;  %v10744_v0 = vmul.u32 2, %v1630_v55  ;;  %v1631_v37 = vadd.s32 96, %v10621_v2  ;;  %v9517_v55 = vld [vmem:[#allocation7 + $0x210] ss:$12 sps:$4 sm:$0xff]  }
 0x15e   :  { %8591 = vmatprep.subr.bf16.mxu1 %v13409_v5  ;;  %v10761_v10 = vadd.s32 1, %v10734_v35 }
 0x160   :  { %1479 = vmatpush1.bf16.msra.mxu0 %v9477_v4  ;;  %v10752_v4 = vadd.s32 1, %v10726_v61  ;;  %vm2695_vm15 = vcmp.eq.s32.totalorder %v10637_v18, %v10761_v10 }
 0x161   :  { %1480 = vmatprep.subr.bf16.mxu0 %v9483_v6  ;;  %8592 = vmatpush3.bf16.msra.mxu1 %v9488_v8  ;;  %v1632_v6 = vadd.s32 104, %v10621_v2  ;;  %v9508_v8 = vld [vmem:[#allocation7 + $0x1c8] ss:$12 sps:$4 sm:$0xff]  }
 0x162   :  { %8593 = vmatprep.subr.bf16.mxu1 %v13409_v5  ;;  %vm2689_vm10 = vcmp.eq.s32.totalorder %v10637_v18, %v10752_v4 }
 0x164   :  { %1481 = vmatpush1.bf16.msra.mxu0 %v9481_v32  ;;  %v9513_v32 = vld [vmem:[#allocation7 + $0x1e4] ss:$12 sps:$4 sm:$0xff]  }
 0x165   :  { %1482 = vmatprep.subr.bf16.mxu0 %v9487_v12  ;;  %8594 = vmatpush3.bf16.msra.mxu1 %v9492_v14  ;;  %v1633_v12 = vadd.s32 112, %v10621_v2  ;;  %v10769_v14 = vadd.s32 1, %v10744_v0 }
 0x166   :  { %8595 = vmatprep.subr.bf16.mxu1 %v13409_v5 }
 0x168   :  { %1483 = vmatpush1.bf16.msra.mxu0 %v9485_v16  ;;  %v10771_v16 = vmul.u32 2, %v1631_v37  ;;  %v9522_v37 = vld [vmem:[#allocation7 + $0x22c] ss:$12 sps:$4 sm:$0xff]  }
 0x169   :  { %1484 = vmatprep.subr.bf16.mxu0 %v9491_v3  ;;  %8596 = vmatpush3.bf16.msra.mxu1 %v9496_v13  ;;  %v10777_v3 = vmul.u32 2, %v1632_v6  ;;  %v9511_v13 = vld [vmem:[#allocation7 + $0x1e0] ss:$12 sps:$4 sm:$0xff]  }
 0x16a   :  { %8597 = vmatprep.subr.bf16.mxu1 %v13409_v5  ;;  %v10798_v26 = vadd.s32 1, %v10771_v16 }
 0x16c   :  { %1485 = vmatpush1.bf16.msra.mxu0 %v9489_v17 }
 0x16d   :  { %1486 = vmatprep.subr.bf16.mxu0 %v9495_v19  ;;  %8598 = vmatpush3.bf16.msra.mxu1 %v9500_v24  ;;  %v10786_v19 = vmul.u32 2, %v1633_v12 }
 0x16e   :  { %8599 = vmatprep.subr.bf16.mxu1 %v13409_v5 }
 0x16f   :  { %v10847_v53 = vadd.s32 1, %v10786_v19 }
 0x170   :  { %1487 = vmatpush1.bf16.msra.mxu0 %v9493_v27  ;;  %v1636_v27 = vadd.s32 136, %v10621_v2 }
 0x171   :  { %1497 = vmatprep.subr.bf16.mxu0 %v9499_v28  ;;  %8600 = vmatpush3.bf16.msra.mxu1 %v9504_v29  ;;  %v10806_v28 = vadd.s32 1, %v10777_v3  ;;  %v10808_v29 = vmul.u32 2, %v1634_v11  ;;  %v10883_v11 = vadd.s32 1, %v10838_v46 }
 0x172   :  { %8706 = vmatprep.subr.msk.bf16.mxu1 %vm10674_vm3, %v13326_v52 }
 0x173   :  { %1489 = vmatmul.mubr.bf16.vlgmr.msra.gmra.mrb[12].mxu0 %v10613_v58  ;;  %v10721_v58 = vadd.s32 1, %v10687_v48  ;;  %13423 = vst [vmem:[#allocation29_spill] sm:$0xff] %v10808_v29  ;;  %v10850_v54 = vadd.s32 1, %v10808_v29 }
 0x174   :  { %1498 = vmatpush1.bf16.msra.mxu0 %v9497_v41  ;;  %8602 = vmatmul.mubr.bf16.vlgmr.msra.gmra.mrb[16].mxu1 %v10669_v43  ;;  %v9519_v41 = vld [vmem:[#allocation7 + $0x214] ss:$12 sps:$4 sm:$0xff]  }
 0x175   :  { %1499 = vmatprep.subr.bf16.mxu0 %v9503_v42  ;;  %1529 = vmatprep.mubr.bf16.mxu0 %v13294_v60  ;;  %vm2671_vm3 = vcmp.eq.s32.totalorder %v10637_v18, %v10721_v58  ;;  %vm2670_vm7 = vcmp.eq.s32.totalorder %v10626_v1, %v10721_v58  ;;  %v10818_v42 = vadd.s32 256, %v10626_v1  ;;  %v1646_v60 = vadd.s32 216, %v10621_v2 }
 0x176   :  { %8708 = vmatpush1.bf16.msk.msra.mxu1 %vm10702_vm8, %v13326_v52  ;;  %vm8717_vm6 = vmpackc.low %vm2677_vm4, %vm2671_vm3  ;;  %vm2676_vm8 = vcmp.eq.s32.totalorder %v10626_v1, %v10724_v59  ;;  %vm2694_vm4 = vcmp.eq.s32.totalorder %v10626_v1, %v10761_v10 }
 0x177   :  { %8710 = vmatprep.subr.msk.bf16.mxu1 %vm8709_vm9, %v13326_v52  ;;  %vm2683_vm9 = vcmp.eq.s32.totalorder %v10637_v18, %v10742_v62  ;;  %vm10782_vm11 = vmpackc.low %vm2676_vm8, %vm2670_vm7  ;;  %vm2713_vm7 = vcmp.eq.s32.totalorder %v10637_v18, %v10806_v28 }
 0x178   :  { %1500 = vmatpush1.bf16.msra.mxu0 %v9501_v51  ;;  %vm10789_vm12 = vmpackc.low %vm2689_vm10, %vm2683_vm9  ;;  %v10840_v51 = vmul.u32 2, %v1636_v27  ;;  %vm2706_vm10 = vcmp.eq.s32.totalorder %v10626_v1, %v10798_v26  ;;  %v9520_v27 = vld [vmem:[#allocation7 + $0x228] ss:$12 sps:$4 sm:$0xff]  }
 0x179   :  { %1501 = vmatprep.subr.bf16.mxu0 %v9507_v56  ;;  %v10853_v56 = vmul.u32 2, %v1637_v38 }
 0x17a   :  { %8712 = vmatpush1.bf16.msk.msra.mxu1 %vm8711_vm14, %v13326_v52  ;;  %vm2688_vm14 = vcmp.eq.s32.totalorder %v10626_v1, %v10752_v4  ;;  %13427 = vst [vmem:[#allocation31_spill] sm:$0xff] %v10840_v51 }
 0x17b   :  { %8714 = vmatprep.subr.msk.bf16.mxu1 %vm8713_vm1, %v13326_v52  ;;  %vm2701_vm1 = vcmp.eq.s32.totalorder %v10637_v18, %v10769_v14  ;;  %vm8723_vm2 = vmpackc.low %vm2688_vm14, %vm2682_vm13  ;;  %13428 = vst [vmem:[#allocation32_spill] sm:$0xff] %v10853_v56  ;;  %vm2725_vm13 = vcmp.eq.s32.totalorder %v10637_v18, %v10850_v54  ;;  %vm2637_vm14 = vcmp.eq.s32.totalorder %v10811_v36, %v10640_v20  ;;  %v10920_v38 = vadd.s32 1, %v10853_v56 }
 0x17c   :  { %1502 = vmatpush1.bf16.msra.mxu0 %v9505_v63  ;;  %vm10830_vm3 = vmpackc.low %vm2701_vm1, %vm2695_vm15  ;;  %v1639_v63 = vadd.s32 160, %v10621_v2  ;;  %vm2643_vm15 = vcmp.eq.s32.totalorder %v10811_v36, %v10643_v21  ;;  %vm2636_vm1 = vcmp.eq.s32.totalorder %v10818_v42, %v10640_v20 }
 0x17d   :  { %1503 = vmatprep.subr.bf16.mxu0 %v9510_v30 }
 0x17e   :  { %8716 = vmatpush1.bf16.msk.msra.mxu1 %vm8715_vm5, %v13326_v52  ;;  %vm2700_vm5 = vcmp.eq.s32.totalorder %v10626_v1, %v10769_v14 }
 0x17f   :  { %8718 = vmatprep.subr.msk.bf16.mxu1 %vm8717_vm6, %v13326_v52  ;;  %vm2707_vm6 = vcmp.eq.s32.totalorder %v10637_v18, %v10798_v26  ;;  %vm10865_vm8 = vmpackc.low %vm2700_vm5, %vm2694_vm4  ;;  %vm2718_vm5 = vcmp.eq.s32.totalorder %v10626_v1, %v10847_v53 }
 0x180   :  { %1504 = vmatpush1.bf16.msra.mxu0 %v9508_v8  ;;  %v10869_v8 = vmul.u32 2, %v1638_v44  ;;  %vm10874_vm9 = vmpackc.low %vm2713_vm7, %vm2707_vm6  ;;  %vm2724_vm6 = vcmp.eq.s32.totalorder %v10626_v1, %v10850_v54  ;;  %v10932_v44 = vmul.u32 2, %v1639_v63 }
 0x181   :  { %1505 = vmatprep.subr.bf16.mxu0 %v9513_v32  ;;  %vm10941_vm7 = vmpackc.low %vm2643_vm15, %vm2637_vm14  ;;  %v10949_v63 = vmul.u32 2, %v1640_v23  ;;  %vm2730_vm14 = vcmp.eq.s32.totalorder %v10626_v1, %v10883_v11  ;;  %v1643_v23 = vadd.s32 192, %v10621_v2 }
 0x182   :  { %8720 = vmatpush1.bf16.msk.msra.mxu1 %vm10782_vm11, %v13326_v52  ;;  %13431 = vst [vmem:[#allocation33_spill] sm:$0xff] %v10869_v8  ;;  %vm2712_vm11 = vcmp.eq.s32.totalorder %v10626_v1, %v10806_v28  ;;  %13437 = vst [vmem:[#allocation35_spill] sm:$0xff] %v10932_v44  ;;  %v10986_v12 = vadd.s32 1, %v10932_v44 }
 0x183   :  { %8722 = vmatprep.subr.msk.bf16.mxu1 %vm10789_vm12, %v13326_v52  ;;  %vm2719_vm12 = vcmp.eq.s32.totalorder %v10637_v18, %v10847_v53  ;;  %13440 = vst [vmem:[#allocation36_spill] sm:$0xff] %v10949_v63 }
 0x184   :  { %1506 = vmatpush1.bf16.msra.mxu0 %v9511_v13  ;;  %v10886_v13 = vadd.s32 1, %v10840_v51  ;;  %vm8733_vm4 = vmpackc.low %vm2725_vm13, %vm2719_vm12  ;;  %vm2655_vm12 = vcmp.eq.s32.totalorder %v10811_v36, %v10664_v39  ;;  %13447 = vst [vmem:[#allocation37_spill] sm:$0xff] %v10986_v12 }
 0x185   :  { %1507 = vmatprep.subr.bf16.mxu0 %v9516_v15  ;;  %vm10973_vm13 = vmpackc.low %vm2724_vm6, %vm2718_vm5  ;;  %vm2648_vm5 = vcmp.eq.s32.totalorder %v10818_v42, %v10657_v33  ;;  %vm2654_vm6 = vcmp.eq.s32.totalorder %v10818_v42, %v10664_v39 }
 0x186   :  { %8724 = vmatpush1.bf16.msk.msra.mxu1 %vm8723_vm2, %v13326_v52  ;;  %v8335_v30 = vpop.f32.mrb[0].mxu1  ;;  %vm2642_vm2 = vcmp.eq.s32.totalorder %v10818_v42, %v10643_v21  ;;  %vm2736_vm15 = vcmp.eq.s32.totalorder %v10626_v1, %v10886_v13 }
 0x187   :  { %8726 = vmatprep.subr.msk.bf16.mxu1 %vm10830_vm3, %v13326_v52  ;;  %v8336_v32 = vpop.f32.mrb[1].mxu1  ;;  %vm10915_vm3 = vmpackc.low %vm2712_vm11, %vm2706_vm10  ;;  %vm2649_vm11 = vcmp.eq.s32.totalorder %v10811_v36, %v10657_v33 }
 0x188   :  { %1508 = vmatpush1.bf16.msra.mxu0 %v9514_v31  ;;  %v10888_v15 = vadd.f32 %v8336_v32, %v8335_v30  ;;  %v8338_v17 = vpop.f32.mrb[2].mxu1  ;;  %v1642_v30 = vadd.s32 184, %v10621_v2  ;;  %vm10958_vm10 = vmpackc.low %vm2642_vm2, %vm2636_vm1  ;;  %v11051_v32 = vmul.u32 2, %v1643_v23 }
 0x189   :  { %1509 = vmatprep.subr.bf16.mxu0 %v9519_v41  ;;  %v8339_v24 = vpop.f32.mrb[3].mxu1  ;;  %v10923_v41 = vadd.s32 1, %v10869_v8  ;;  %v10988_v17 = vmul.u32 2, %v1641_v45  ;;  %vm10995_vm2 = vmpackc.low %vm2655_vm12, %vm2649_vm11  ;;  %vm2742_vm11 = vcmp.eq.s32.totalorder %v10626_v1, %v10920_v38 }
 0x18a   :  { %8728 = vmatpush1.bf16.msk.msra.mxu1 %vm10865_vm8, %v13326_v52  ;;  %vm2731_vm8 = vcmp.eq.s32.totalorder %v10637_v18, %v10883_v11  ;;  %v1644_v24 = vadd.s32 200, %v10621_v2  ;;  %v11006_v45 = vmul.u32 2, %v1642_v30  ;;  %13458 = vst [vmem:[#allocation42_spill] sm:$0xff] %v11051_v32 }
 0x18b   :  { %8730 = vmatprep.subr.msk.bf16.mxu1 %vm10874_vm9, %v13326_v52  ;;  %13436 = vst [vmem:[#allocation34_spill] sm:$0xff] %v10923_v41  ;;  %vm2737_vm9 = vcmp.eq.s32.totalorder %v10637_v18, %v10886_v13  ;;  %13448 = vst [vmem:[#allocation38_spill] sm:$0xff] %v10988_v17  ;;  %v11049_v6 = vadd.s32 1, %v10988_v17  ;;  %v11121_v17 = vmul.u32 2, %v1646_v60  ;;  %v11138_v60 = vadd.s32 1, %v11051_v32 }
 0x18c   :  { %1510 = vmatpush1.bf16.msra.mxu0 %v9517_v55  ;;  %vm10981_vm1 = vmpackc.low %vm2737_vm9, %vm2731_vm8  ;;  %13452 = vst [vmem:[#allocation40_spill] sm:$0xff] %v11006_v45  ;;  %vm2667_vm8 = vcmp.eq.s32.totalorder %v10811_v36, %v10694_v49  ;;  %v11070_v23 = vmul.u32 2, %v1644_v24 }
 0x18d   :  { %1511 = vmatprep.subr.bf16.mxu0 %v9522_v37  ;;  %vm11029_vm9 = vmpackc.low %vm2736_vm15, %vm2730_vm14  ;;  %13457 = vst [vmem:[#allocation41_spill] sm:$0xff] %v11049_v6  ;;  %vm2755_vm14 = vcmp.eq.s32.totalorder %v10637_v18, %v10986_v12  ;;  %v11068_v37 = vadd.s32 1, %v11006_v45  ;;  %v1647_v45 = vadd.s32 224, %v10621_v2  ;;  %v11193_v32 = vadd.s32 1, %v11121_v17 }
 0x18e   :  { %8732 = vmatpush1.bf16.msk.msra.mxu1 %vm10915_vm3, %v13326_v52  ;;  %vm2743_vm3 = vcmp.eq.s32.totalorder %v10637_v18, %v10920_v38  ;;  %13460 = vst [vmem:[#allocation44_spill] sm:$0xff] %v11070_v23  ;;  %13468 = vst [vmem:[#allocation46_spill] sm:$0xff] %v11121_v17 }
 0x18f   :  { %8734 = vmatprep.subr.msk.bf16.mxu1 %vm8733_vm4, %v13326_v52  ;;  %vm2749_vm4 = vcmp.eq.s32.totalorder %v10637_v18, %v10923_v41  ;;  %13459 = vst [vmem:[#allocation43_spill] sm:$0xff] %v11068_v37  ;;  %13469 = vst [vmem:[#allocation47_spill] sm:$0xff] %v11138_v60  ;;  %v11195_v44 = vmul.u32 2, %v1647_v45  ;;  %v1649_v45 = vadd.s32 240, %v10621_v2 }
 0x190   :  { %1512 = vmatpush1.bf16.msra.mxu0 %v9520_v27  ;;  %v11004_v27 = vadd.s32 1, %v10949_v63  ;;  %vm11042_vm12 = vmpackc.low %vm2749_vm4, %vm2743_vm3  ;;  %vm2666_vm3 = vcmp.eq.s32.totalorder %v10818_v42, %v10694_v49  ;;  %vm2673_vm4 = vcmp.eq.s32.totalorder %v10811_v36, %v10721_v58  ;;  %v11141_v63 = vadd.s32 1, %v11070_v23  ;;  %13478 = vst [vmem:[#allocation50_spill] sm:$0xff] %v11193_v32 }
 0x191   :  { %8802 = vmatprep.subr.msk.bf16.mxu0 %vm10941_vm7, %v13326_v52  ;;  %vm2661_vm7 = vcmp.eq.s32.totalorder %v10811_v36, %v10685_v47  ;;  %13479 = vst [vmem:[#allocation51_spill] sm:$0xff] %v11195_v44  ;;  %v11265_v24 = vadd.s32 1, %v11195_v44  ;;  %v11279_v56 = vmul.u32 2, %v1649_v45  ;;  %v1651_v44 = vadd.s32 256, %v10621_v2 }
 0x192   :  { %13451 = vst [vmem:[#allocation39_spill] sm:$0xff] %v11004_v27  ;;  %8736 = vmatpush1.bf16.msk.msra.mxu1 %vm10973_vm13, %v13326_v52  ;;  %vm2748_vm13 = vcmp.eq.s32.totalorder %v10626_v1, %v10923_v41  ;;  %vm2761_vm15 = vcmp.eq.s32.totalorder %v10637_v18, %v11004_v27  ;;  %13470 = vst [vmem:[#allocation48_spill] sm:$0xff] %v11141_v63 }
 0x193   :  { %1530 = vmatmul.mubr.bf16.vlgmr.msra.gmra.mrb[12].mxu0 %v10669_v43  ;;  %8738 = vmatprep.subr.msk.bf16.mxu1 %vm10981_vm1, %v13326_v52  ;;  %v1645_v43 = vadd.s32 208, %v10621_v2  ;;  %vm11078_vm1 = vmpackc.low %vm2667_vm8, %vm2661_vm7  ;;  %vm2754_vm8 = vcmp.eq.s32.totalorder %v10626_v1, %v10986_v12  ;;  %13487 = vst [vmem:[#allocation53_spill] sm:$0xff] %v11265_v24  ;;  %v11340_v31 = vadd.s32 1, %v11279_v56  ;;  %v11345_v46 = vmul.u32 2, %v1651_v44 }
 0x194   :  { %8804 = vmatpush1.bf16.msk.msra.mxu0 %vm10958_vm10, %v13326_v52  ;;  %vm8807_vm10 = vmpackc.low %vm2654_vm6, %vm2648_vm5  ;;  %vm2679_vm5 = vcmp.eq.s32.totalorder %v10811_v36, %v10724_v59  ;;  %13489 = vst [vmem:[#allocation55_spill] sm:$0xff] %v11279_v56  ;;  %v13503_v44 = vmov 1.0|1.0  }
 0x195   :  { %8806 = vmatprep.subr.msk.bf16.mxu0 %vm10995_vm2, %v13326_v52  ;;  %vm2660_vm2 = vcmp.eq.s32.totalorder %v10818_v42, %v10685_v47  ;;  %vm11102_vm6 = vmpackc.low %vm2748_vm13, %vm2742_vm11  ;;  %v11106_v55 = vmul.u32 2, %v1645_v43  ;;  %v1648_v43 = vadd.s32 232, %v10621_v2  ;;  %vm2773_vm13 = vcmp.eq.s32.totalorder %v10637_v18, %v11068_v37  ;;  %13497 = vst [vmem:[#allocation57_spill] sm:$0xff] %v11340_v31 }
 0x196   :  { %8740 = vmatpush1.bf16.msk.msra.mxu1 %vm11029_vm9, %v13326_v52  ;;  %vm11113_vm7 = vmpackc.low %vm2761_vm15, %vm2755_vm14  ;;  %vm2760_vm9 = vcmp.eq.s32.totalorder %v10626_v1, %v11004_v27  ;;  %vm2672_vm14 = vcmp.eq.s32.totalorder %v10818_v42, %v10721_v58  ;;  %vm2678_vm15 = vcmp.eq.s32.totalorder %v10818_v42, %v10724_v59  ;;  %13499 = vst [vmem:[#allocation59_spill] sm:$0xff] %v11345_v46 }
 0x197   :  { %8742 = vmatprep.subr.msk.bf16.mxu1 %vm11042_vm12, %v13326_v52  ;;  %13465 = vst [vmem:[#allocation45_spill] sm:$0xff] %v11106_v55  ;;  %vm8811_vm11 = vmpackc.low %vm2666_vm3, %vm2660_vm2  ;;  %vm2767_vm12 = vcmp.eq.s32.totalorder %v10637_v18, %v11049_v6  ;;  %vm2691_vm2 = vcmp.eq.s32.totalorder %v10811_v36, %v10752_v4  ;;  %v11190_v30 = vadd.s32 1, %v11106_v55  ;;  %v11197_v8 = vmul.u32 2, %v1648_v43 }
 0x198   :  { %8808 = vmatpush1.bf16.msk.msra.mxu0 %vm8807_vm10, %v13326_v52  ;;  %vm11149_vm10 = vmpackc.low %vm2679_vm5, %vm2673_vm4  ;;  %vm2766_vm4 = vcmp.eq.s32.totalorder %v10626_v1, %v11049_v6  ;;  %vm2772_vm5 = vcmp.eq.s32.totalorder %v10626_v1, %v11068_v37  ;;  %v1650_v43 = vadd.s32 248, %v10621_v2 }
 0x199   :  { %8810 = vmatprep.subr.msk.bf16.mxu0 %vm11078_vm1, %v13326_v52  ;;  %vm2685_vm1 = vcmp.eq.s32.totalorder %v10811_v36, %v10742_v62  ;;  %vm11173_vm3 = vmpackc.low %vm2760_vm9, %vm2754_vm8  ;;  %13477 = vst [vmem:[#allocation49_spill] sm:$0xff] %v11190_v30  ;;  %vm2779_vm8 = vcmp.eq.s32.totalorder %v10637_v18, %v11138_v60  ;;  %vm2785_vm9 = vcmp.eq.s32.totalorder %v10637_v18, %v11141_v63  ;;  %v11268_v55 = vadd.s32 1, %v11197_v8 }
 0x19a   :  { %8744 = vmatpush1.bf16.msk.msra.mxu1 %vm11102_vm6, %v13326_v52  ;;  %vm11185_vm6 = vmpackc.low %vm2773_vm13, %vm2767_vm12  ;;  %13480 = vst [vmem:[#allocation52_spill] sm:$0xff] %v11197_v8  ;;  %vm2684_vm12 = vcmp.eq.s32.totalorder %v10818_v42, %v10742_v62  ;;  %vm2690_vm13 = vcmp.eq.s32.totalorder %v10818_v42, %v10752_v4  ;;  %v11281_v51 = vmul.u32 2, %v1650_v43  ;;  %v1652_v8 = vadd.s32 264, %v10621_v2 }
 0x19b   :  { %8746 = vmatprep.subr.msk.bf16.mxu1 %vm11113_vm7, %v13326_v52  ;;  %vm8815_vm7 = vmpackc.low %vm2678_vm15, %vm2672_vm14  ;;  %vm2703_vm14 = vcmp.eq.s32.totalorder %v10811_v36, %v10769_v14  ;;  %13488 = vst [vmem:[#allocation54_spill] sm:$0xff] %v11268_v55 }
 0x19c   :  { %8812 = vmatpush1.bf16.msk.msra.mxu0 %vm8811_vm11, %v13326_v52  ;;  %vm11220_vm11 = vmpackc.low %vm2691_vm2, %vm2685_vm1  ;;  %vm2778_vm1 = vcmp.eq.s32.totalorder %v10626_v1, %v11138_v60  ;;  %vm2784_vm2 = vcmp.eq.s32.totalorder %v10626_v1, %v11141_v63  ;;  %13490 = vst [vmem:[#allocation56_spill] sm:$0xff] %v11281_v51  ;;  %v11343_v23 = vadd.s32 1, %v11281_v51  ;;  %v11347_v29 = vmul.u32 2, %v1652_v8 }
 0x19d   :  { %8814 = vmatprep.subr.msk.bf16.mxu0 %vm11149_vm10, %v13326_v52  ;;  %vm2697_vm10 = vcmp.eq.s32.totalorder %v10811_v36, %v10761_v10  ;;  %vm11244_vm15 = vmpackc.low %vm2772_vm5, %vm2766_vm4  ;;  %vm2791_vm4 = vcmp.eq.s32.totalorder %v10637_v18, %v11190_v30  ;;  %vm2797_vm5 = vcmp.eq.s32.totalorder %v10637_v18, %v11193_v32 }
 0x19e   :  { %8748 = vmatpush1.bf16.msk.msra.mxu1 %vm11173_vm3, %v13326_v52  ;;  %vm11256_vm3 = vmpackc.low %vm2785_vm9, %vm2779_vm8  ;;  %vm2696_vm8 = vcmp.eq.s32.totalorder %v10818_v42, %v10761_v10  ;;  %vm2702_vm9 = vcmp.eq.s32.totalorder %v10818_v42, %v10769_v14  ;;  %13498 = vst [vmem:[#allocation58_spill] sm:$0xff] %v11343_v23  ;;  %v11420_v43 = vadd.s32 1, %v11347_v29 }
 0x19f   :  { %8750 = vmatprep.subr.msk.bf16.mxu1 %vm11185_vm6, %v13326_v52  ;;  %vm8819_vm6 = vmpackc.low %vm2690_vm13, %vm2684_vm12  ;;  %vm2715_vm12 = vcmp.eq.s32.totalorder %v10811_v36, %v10806_v28  ;;  %13500 = vst [vmem:[#allocation60_spill] sm:$0xff] %v11347_v29  ;;  %v1653_v29 = vadd.s32 272, %v10621_v2 }
 0x1a0   :  { %8816 = vmatpush1.bf16.msk.msra.mxu0 %vm8815_vm7, %v13326_v52  ;;  %vm8821_vm7 = vmpackc.low %vm2703_vm14, %vm2697_vm10  ;;  %vm2790_vm14 = vcmp.eq.s32.totalorder %v10626_v1, %v11190_v30  ;;  %13510 = vst [vmem:[#allocation63_spill] sm:$0xff] %v11420_v43 }
 0x1a1   :  { %8818 = vmatprep.subr.msk.bf16.mxu0 %vm11220_vm11, %v13326_v52  ;;  %vm2709_vm11 = vcmp.eq.s32.totalorder %v10811_v36, %v10798_v26  ;;  %vm11311_vm13 = vmpackc.low %vm2784_vm2, %vm2778_vm1  ;;  %vm2803_vm1 = vcmp.eq.s32.totalorder %v10637_v18, %v11265_v24  ;;  %vm2809_vm2 = vcmp.eq.s32.totalorder %v10637_v18, %v11268_v55 }
 0x1a2   :  { %8752 = vmatpush1.bf16.msk.msra.mxu1 %vm11244_vm15, %v13326_v52  ;;  %vm11322_vm10 = vmpackc.low %vm2797_vm5, %vm2791_vm4  ;;  %vm2796_vm15 = vcmp.eq.s32.totalorder %v10626_v1, %v11193_v32  ;;  %vm2708_vm5 = vcmp.eq.s32.totalorder %v10818_v42, %v10798_v26 }
 0x1a3   :  { %8754 = vmatprep.subr.msk.bf16.mxu1 %vm11256_vm3, %v13326_v52  ;;  %vm11335_vm3 = vmpackc.low %vm2702_vm9, %vm2696_vm8  ;;  %vm2727_vm8 = vcmp.eq.s32.totalorder %v10811_v36, %v10850_v54 }
 0x1a4   :  { %8820 = vmatpush1.bf16.msk.msra.mxu0 %vm8819_vm6, %v13326_v52  ;;  %vm11355_vm4 = vmpackc.low %vm2715_vm12, %vm2709_vm11  ;;  %vm2714_vm6 = vcmp.eq.s32.totalorder %v10818_v42, %v10806_v28  ;;  %vm2802_vm12 = vcmp.eq.s32.totalorder %v10626_v1, %v11265_v24 }
 0x1a5   :  { %8822 = vmatprep.subr.msk.bf16.mxu0 %vm8821_vm7, %v13326_v52  ;;  %vm2721_vm7 = vcmp.eq.s32.totalorder %v10811_v36, %v10847_v53  ;;  %vm11379_vm9 = vmpackc.low %vm2796_vm15, %vm2790_vm14  ;;  %vm2815_vm14 = vcmp.eq.s32.totalorder %v10637_v18, %v11340_v31  ;;  %vm2821_vm15 = vcmp.eq.s32.totalorder %v10637_v18, %v11343_v23 }
 0x1a6   :  { %8756 = vmatpush1.bf16.msk.msra.mxu1 %vm11311_vm13, %v13503_v44  ;;  %v794_v8 = vpop.f32.mrb[4].mxu1  ;;  %vm11395_vm11 = vmpackc.low %vm2809_vm2, %vm2803_vm1  ;;  %vm2808_vm13 = vcmp.eq.s32.totalorder %v10626_v1, %v11268_v55  ;;  %vm2720_vm2 = vcmp.eq.s32.totalorder %v10818_v42, %v10847_v53 }
 0x1a7   :  { %8758 = vmatprep.subr.msk.bf16.mxu1 %vm11322_vm10, %v13503_v44  ;;  %v11384_v51 = vadd.f32 %v10888_v15, %v794_v8  ;;  %v8563_v56 = vpop.f32.mrb[5].mxu1  ;;  %vm8827_vm10 = vmpackc.low %vm2714_vm6, %vm2708_vm5  ;;  %v11417_v15 = vadd.s32 1, %v11345_v46  ;;  %vm2739_vm5 = vcmp.eq.s32.totalorder %v10811_v36, %v10886_v13  ;;  %v1654_v46 = vadd.s32 280, %v10621_v2 }
 0x1a8   :  { %8824 = vmatpush1.bf16.msk.msra.mxu0 %vm11335_vm3, %v13503_v44  ;;  %v797_v56 = vpop.f32.mrb[6].mxu1  ;;  %vm8829_vm1 = vmpackc.low %vm2727_vm8, %vm2721_vm7  ;;  %vm2726_vm3 = vcmp.eq.s32.totalorder %v10818_v42, %v10850_v54  ;;  %vm2814_vm8 = vcmp.eq.s32.totalorder %v10626_v1, %v11340_v31 }
 0x1a9   :  { %13506 = vst [vmem:[#allocation61_spill] sm:$0xff] %v11384_v51  ;;  %8826 = vmatprep.subr.msk.bf16.mxu0 %vm11355_vm4, %v13503_v44  ;;  %13509 = vst [vmem:[#allocation62_spill] sm:$0xff] %v11417_v15  ;;  %v8564_v52 = vpop.f32.mrb[7].mxu1  ;;  %vm2733_vm4 = vcmp.eq.s32.totalorder %v10811_v36, %v10883_v11 }
 0x1aa   :  { %8760 = vmatpush1.bf16.msk.msra.mxu1 %vm11379_vm9, %v13503_v44  ;;  %vm8763_vm6 = vmpackc.low %vm2808_vm13, %vm2802_vm12  ;;  %vm2820_vm9 = vcmp.eq.s32.totalorder %v10626_v1, %v11343_v23  ;;  %vm2833_vm12 = vcmp.eq.s32.totalorder %v10637_v18, %v11420_v43 }
 0x1ab   :  { %8762 = vmatprep.subr.msk.bf16.mxu1 %vm11395_vm11, %v13503_v44  ;;  %vm8765_vm7 = vmpackc.low %vm2821_vm15, %vm2815_vm14  ;;  %vm2827_vm11 = vcmp.eq.s32.totalorder %v10637_v18, %v11417_v15  ;;  %vm2738_vm14 = vcmp.eq.s32.totalorder %v10818_v42, %v10886_v13  ;;  %vm2745_vm15 = vcmp.eq.s32.totalorder %v10811_v36, %v10920_v38 }
 0x1ac   :  { %8828 = vmatpush1.bf16.msk.msra.mxu0 %vm8827_vm10, %v13503_v44  ;;  %vm8831_vm0 = vmpackc.low %vm2726_vm3, %vm2720_vm2  ;;  %vm2732_vm10 = vcmp.eq.s32.totalorder %v10818_v42, %v10883_v11 }
 0x1ad   :  { %8830 = vmatprep.subr.msk.bf16.mxu0 %vm8829_vm1, %v13503_v44  ;;  %vm8833_vm13 = vmpackc.low %vm2739_vm5, %vm2733_vm4  ;;  %vm2751_vm1 = vcmp.eq.s32.totalorder %v10811_v36, %v10923_v41 }
 0x1ae   :  { %8764 = vmatpush1.bf16.msk.msra.mxu1 %vm8763_vm6, %v13503_v44  ;;  %vm8767_vm2 = vmpackc.low %vm2820_vm9, %vm2814_vm8  ;;  %vm2744_vm6 = vcmp.eq.s32.totalorder %v10818_v42, %v10920_v38  ;;  %vm2757_vm8 = vcmp.eq.s32.totalorder %v10811_v36, %v10986_v12  ;;  %vm2763_vm9 = vcmp.eq.s32.totalorder %v10811_v36, %v11004_v27 }
 0x1af   :  { %8766 = vmatprep.subr.msk.bf16.mxu1 %vm8765_vm7, %v13503_v44  ;;  %vm8769_vm3 = vmpackc.low %vm2833_vm12, %vm2827_vm11  ;;  %vm2750_vm7 = vcmp.eq.s32.totalorder %v10818_v42, %v10923_v41  ;;  %vm2756_vm12 = vcmp.eq.s32.totalorder %v10818_v42, %v10986_v12 }
 0x1b0   :  { %8832 = vmatpush1.bf16.msk.msra.mxu0 %vm8831_vm0, %v13503_v44  ;;  %vm8835_vm4 = vmpackc.low %vm2738_vm14, %vm2732_vm10  ;;  %vm2769_vm10 = vcmp.eq.s32.totalorder %v10811_v36, %v11049_v6  ;;  %vm2775_vm14 = vcmp.eq.s32.totalorder %v10811_v36, %v11068_v37 }
 0x1b1   :  { %8834 = vmatprep.subr.msk.bf16.mxu0 %vm8833_vm13, %v13503_v44  ;;  %vm8837_vm5 = vmpackc.low %vm2751_vm1, %vm2745_vm15  ;;  %vm2762_vm13 = vcmp.eq.s32.totalorder %v10818_v42, %v11004_v27 }
 0x1b2   :  { %8768 = vmatpush1.bf16.msk.msra.mxu1 %vm8767_vm2, %v13503_v44  ;;  %vm8839_vm0 = vmpackc.low %vm2750_vm7, %vm2744_vm6  ;;  %vm2768_vm2 = vcmp.eq.s32.totalorder %v10818_v42, %v11049_v6 }
 0x1b3   :  { %8770 = vmatprep.subr.msk.bf16.mxu1 %vm8769_vm3, %v13503_v44  ;;  %vm8841_vm11 = vmpackc.low %vm2763_vm9, %vm2757_vm8  ;;  %vm2774_vm3 = vcmp.eq.s32.totalorder %v10818_v42, %v11068_v37  ;;  %vm2780_vm8 = vcmp.eq.s32.totalorder %v10818_v42, %v11138_v60  ;;  %vm2786_vm9 = vcmp.eq.s32.totalorder %v10818_v42, %v11141_v63  ;;  %v1661_v37 = vadd.s32 336, %v10621_v2 }
 0x1b4   :  { %8836 = vmatpush1.bf16.msk.msra.mxu0 %vm8835_vm4, %v13503_v44  ;;  %vm8843_vm15 = vmpackc.low %vm2762_vm13, %vm2756_vm12  ;;  %vm2781_vm4 = vcmp.eq.s32.totalorder %v10811_v36, %v11138_v60 }
 0x1b5   :  { %8838 = vmatprep.subr.msk.bf16.mxu0 %vm8837_vm5, %v13503_v44  ;;  %vm8845_vm1 = vmpackc.low %vm2775_vm14, %vm2769_vm10  ;;  %vm2787_vm5 = vcmp.eq.s32.totalorder %v10811_v36, %v11141_v63  ;;  %vm2792_vm10 = vcmp.eq.s32.totalorder %v10818_v42, %v11190_v30  ;;  %vm2798_vm14 = vcmp.eq.s32.totalorder %v10818_v42, %v11193_v32 }
 0x1b6   :  { %vm8847_vm6 = vmpackc.low %vm2774_vm3, %vm2768_vm2 }
 0x1b7   :  { %vm8849_vm7 = vmpackc.low %vm2787_vm5, %vm2781_vm4  ;;  %vm2804_vm4 = vcmp.eq.s32.totalorder %v10818_v42, %v11265_v24  ;;  %vm2810_vm5 = vcmp.eq.s32.totalorder %v10818_v42, %v11268_v55 }
 0x1b8   :  { %8840 = vmatpush1.bf16.msk.msra.mxu0 %vm8839_vm0, %v13503_v44  ;;  %vm2793_vm0 = vcmp.eq.s32.totalorder %v10811_v36, %v11190_v30  ;;  %vm8851_vm12 = vmpackc.low %vm2786_vm9, %vm2780_vm8 }
 0x1b9   :  { %8842 = vmatprep.subr.msk.bf16.mxu0 %vm8841_vm11, %v13503_v44  ;;  %vm2799_vm11 = vcmp.eq.s32.totalorder %v10811_v36, %v11193_v32  ;;  %vm8855_vm2 = vmpackc.low %vm2798_vm14, %vm2792_vm10 }
 0x1ba   :  { %vm8853_vm13 = vmpackc.low %vm2799_vm11, %vm2793_vm0  ;;  %vm2816_vm0 = vcmp.eq.s32.totalorder %v10818_v42, %v11340_v31  ;;  %vm2822_vm11 = vcmp.eq.s32.totalorder %v10818_v42, %v11343_v23 }
 0x1bb   :  { %vm8859_vm8 = vmpackc.low %vm2810_vm5, %vm2804_vm4 }
 0x1bc   :  { %8844 = vmatpush1.bf16.msk.msra.mxu0 %vm8843_vm15, %v13503_v44  ;;  %vm2805_vm15 = vcmp.eq.s32.totalorder %v10811_v36, %v11265_v24  ;;  %vm8863_vm10 = vmpackc.low %vm2822_vm11, %vm2816_vm0  ;;  %v1656_v24 = vadd.s32 296, %v10621_v2 }
 0x1bd   :  { %8846 = vmatprep.subr.msk.bf16.mxu0 %vm8845_vm1, %v13503_v44  ;;  %vm2811_vm1 = vcmp.eq.s32.totalorder %v10811_v36, %v11268_v55  ;;  %v1655_v55 = vadd.s32 288, %v10621_v2 }
 0x1be   :  { %vm8857_vm3 = vmpackc.low %vm2811_vm1, %vm2805_vm15  ;;  %vm2826_vm15 = vcmp.eq.s32.totalorder %v10626_v1, %v11417_v15  ;;  %vm2832_vm1 = vcmp.eq.s32.totalorder %v10626_v1, %v11420_v43 }
 0x1c0   :  { %8848 = vmatpush1.bf16.msk.msra.mxu0 %vm8847_vm6, %v13503_v44  ;;  %vm2817_vm6 = vcmp.eq.s32.totalorder %v10811_v36, %v11340_v31  ;;  %v11552_v31 = vmul.u32 2, %v1654_v46  ;;  %v1659_v46 = vadd.s32 320, %v10621_v2 }
 0x1c1   :  { %8850 = vmatprep.subr.msk.bf16.mxu0 %vm8849_vm7, %v13503_v44  ;;  %vm2823_vm7 = vcmp.eq.s32.totalorder %v10811_v36, %v11343_v23  ;;  %v11550_v23 = vmul.u32 2, %v1653_v29  ;;  %v1658_v29 = vadd.s32 312, %v10621_v2 }
 0x1c2   :  { %vm8861_vm9 = vmpackc.low %vm2823_vm7, %vm2817_vm6  ;;  %13513 = vst [vmem:[#allocation66_spill] sm:$0xff] %v11552_v31  ;;  %v11560_v30 = vadd.s32 1, %v11552_v31 }
 0x1c3   :  { %13512 = vst [vmem:[#allocation65_spill] sm:$0xff] %v11550_v23  ;;  %v11557_v32 = vadd.s32 1, %v11550_v23  ;;  %v11590_v23 = vmul.u32 2, %v1658_v29  ;;  %vm11592_vm6 = vmpackc.low %vm2832_vm1, %vm2826_vm15 }
 0x1c4   :  { %8852 = vmatpush1.bf16.msk.msra.mxu0 %vm8851_vm12, %v13503_v44  ;;  %vm2829_vm12 = vcmp.eq.s32.totalorder %v10811_v36, %v11417_v15  ;;  %vm2845_vm5 = vcmp.eq.s32.totalorder %v10637_v18, %v11560_v30  ;;  %vm2844_vm11 = vcmp.eq.s32.totalorder %v10626_v1, %v11560_v30 }
 0x1c5   :  { %8854 = vmatprep.subr.msk.bf16.mxu0 %vm8853_vm13, %v13503_v44  ;;  %vm2835_vm13 = vcmp.eq.s32.totalorder %v10811_v36, %v11420_v43  ;;  %vm2839_vm4 = vcmp.eq.s32.totalorder %v10637_v18, %v11557_v32  ;;  %13518 = vst [vmem:[#allocation71_spill] sm:$0xff] %v11590_v23  ;;  %vm2841_vm7 = vcmp.eq.s32.totalorder %v10811_v36, %v11557_v32 }
 0x1c6   :  { %v11522_v8 = vpop.f32.mrb[0].mxu0  ;;  %vm8865_vm14 = vmpackc.low %vm2835_vm13, %vm2829_vm12  ;;  %vm2840_vm12 = vcmp.eq.s32.totalorder %v10818_v42, %v11557_v32  ;;  %vm2846_vm13 = vcmp.eq.s32.totalorder %v10818_v42, %v11560_v30 }
 0x1c7   :  { %13511 = vst [vmem:[#allocation64_spill] sm:$0xff] %v11522_v8  ;;  %v11528_v45 = vpop.f32.mrb[1].mxu0 }
 0x1c8   :  { %v717_v17 = vpop.f32.mrb[2].mxu0  ;;  %8856 = vmatpush1.bf16.msk.msra.mxu0 %vm8855_vm2, %v13503_v44  ;;  %vm2828_vm2 = vcmp.eq.s32.totalorder %v10818_v42, %v11417_v15 }
 0x1c9   :  { %v718_v56 = vpop.f32.mrb[3].mxu0  ;;  %8858 = vmatprep.subr.msk.bf16.mxu0 %vm8857_vm3, %v13503_v44  ;;  %vm2834_vm3 = vcmp.eq.s32.totalorder %v10818_v42, %v11420_v43  ;;  %v11634_v43 = vmul.u32 2, %v1659_v46 }
 0x1ca   :  { %vm11612_vm0 = vmpackc.low %vm2834_vm3, %vm2828_vm2 }
 0x1cb   :  { %13528 = vst [vmem:[#allocation75_spill] sm:$0xff] %v11634_v43  ;;  %v11719_v29 = vadd.s32 1, %v11634_v43 }
 0x1cc   :  { %8860 = vmatpush1.bf16.msk.msra.mxu0 %vm8859_vm8, %v13503_v44  ;;  %vm2847_vm8 = vcmp.eq.s32.totalorder %v10811_v36, %v11560_v30 }
 0x1cd   :  { %8862 = vmatprep.subr.msk.bf16.mxu0 %vm8861_vm9, %v13503_v44  ;;  %vm2838_vm9 = vcmp.eq.s32.totalorder %v10626_v1, %v11557_v32 }
 0x1ce   :  { %vm11670_vm2 = vmpackc.low %vm2844_vm11, %vm2838_vm9 }
 0x1d0   :  { %8864 = vmatpush1.bf16.msk.msra.mxu0 %vm8863_vm10, %v13503_v44  ;;  %vm11630_vm10 = vmpackc.low %vm2845_vm5, %vm2839_vm4 }
 0x1d1   :  { %8866 = vmatprep.subr.msk.bf16.mxu0 %vm8865_vm14, %v13503_v44  ;;  %vm11648_vm14 = vmpackc.low %vm2847_vm8, %vm2841_vm7 }
 0x1d2   :  { %vm11692_vm7 = vmpackc.low %vm2846_vm13, %vm2840_vm12 }
 0x1e6   :  { %v8366_v52 = vpop.f32.mrb[4].mxu0 }
 0x1e7   :  { %v8367_v17 = vpop.f32.mrb[5].mxu0 }
 0x1e8   :  { %v8368_v56 = vadd.f32 %v8367_v17, %v8366_v52  ;;  %v8369_v51 = vpop.f32.mrb[6].mxu0  ;;  %v1657_v52 = vadd.s32 304, %v10621_v2 }
 0x1e9   :  { %v8370_v8 = vpop.f32.mrb[7].mxu0  ;;  %v11562_v51 = vmul.u32 2, %v1655_v55  ;;  %v1660_v55 = vadd.s32 328, %v10621_v2 }
 0x1ea   :  { %v11564_v8 = vmul.u32 2, %v1656_v24  ;;  %v11588_v31 = vmul.u32 2, %v1657_v52 }
 0x1eb   :  { %13514 = vst [vmem:[#allocation67_spill] sm:$0xff] %v11562_v51  ;;  %v11583_v24 = vadd.s32 1, %v11562_v51  ;;  %v11636_v15 = vmul.u32 2, %v1660_v55 }
 0x1ec   :  { %13515 = vst [vmem:[#allocation68_spill] sm:$0xff] %v11564_v8  ;;  %v11586_v17 = vadd.s32 1, %v11564_v8  ;;  %13517 = vst [vmem:[#allocation70_spill] sm:$0xff] %v11588_v31 }
 0x1ed   :  { %13529 = vst [vmem:[#allocation76_spill] sm:$0xff] %v11636_v15  ;;  %vm2851_vm15 = vcmp.eq.s32.totalorder %v10637_v18, %v11583_v24  ;;  %vm2853_vm3 = vcmp.eq.s32.totalorder %v10811_v36, %v11583_v24  ;;  %vm2850_vm5 = vcmp.eq.s32.totalorder %v10626_v1, %v11583_v24  ;;  %v11722_v51 = vadd.s32 1, %v11636_v15 }
 0x1ee   :  { %13516 = vst [vmem:[#allocation69_spill] sm:$0xff] %v11586_v17  ;;  %vm2857_vm1 = vcmp.eq.s32.totalorder %v10637_v18, %v11586_v17  ;;  %vm2859_vm4 = vcmp.eq.s32.totalorder %v10811_v36, %v11586_v17  ;;  %vm2856_vm8 = vcmp.eq.s32.totalorder %v10626_v1, %v11586_v17  ;;  %vm2858_vm9 = vcmp.eq.s32.totalorder %v10818_v42, %v11586_v17 }
 0x1ef   :  { %vm11734_vm11 = vmpackc.low %vm2859_vm4, %vm2853_vm3  ;;  %v1666_v17 = vadd.s32 376, %v10621_v2  ;;  %v13569_v15 = vmov 0 }
 0x206   :  { %v963_v63 = vpop.f32.mrb[8].mxu0 }
 0x207   :  { %v11602_v8 = vpop.f32.mrb[8].mxu1  ;;  %v11604_v52 = vadd.f32 %v8368_v56, %v963_v63  ;;  %v8583_v63 = vpop.f32.mrb[9].mxu0 }
 0x208   :  { %13521 = vst [vmem:[#allocation72_spill] sm:$0xff] %v11602_v8  ;;  %v11622_v56 = vpop.f32.mrb[9].mxu1  ;;  %v1662_v63 = vadd.s32 344, %v10621_v2  ;;  %v966_v6 = vpop.f32.mrb[10].mxu0 }
 0x209   :  { %13522 = vst [vmem:[#allocation73_spill] sm:$0xff] %v11604_v52  ;;  %13525 = vst [vmem:[#allocation74_spill] sm:$0xff] %v11622_v56  ;;  %v886_v27 = vpop.f32.mrb[10].mxu1  ;;  %3562 = vmatprep.mubr.f32.mxu1 %v11622_v56  ;;  %3704 = vmatprep.mubr.f32.mxu0 %v11622_v56  ;;  %v11660_v6 = vadd.s32 1, %v11590_v23  ;;  %v8584_v55 = vpop.f32.mrb[11].mxu0 }
 0x20a   :  { %v11657_v27 = vadd.s32 1, %v11588_v31  ;;  %v887_v12 = vpop.f32.mrb[11].mxu1  ;;  %3563 = vmatmul.mubr.f32.vlgmr.msra.gmra.mrb[20].mxu1 %v11602_v8  ;;  %3705 = vmatmul.mubr.f32.vlgmr.msra.gmra.mrb[16].mxu0 %v11602_v8  ;;  %v11724_v55 = vmul.u32 2, %v1661_v37  ;;  %v11726_v46 = vmul.u32 2, %v1662_v63  ;;  %v1663_v37 = vadd.s32 352, %v10621_v2 }
 0x20b   :  { %8772 = vmatpush1.bf16.msk.msra.mxu1 %vm11592_vm6, %v13503_v44  ;;  %8868 = vmatpush1.bf16.msk.msra.mxu0 %vm11612_vm0, %v13503_v44  ;;  %vm2852_vm6 = vcmp.eq.s32.totalorder %v10818_v42, %v11583_v24  ;;  %vm11714_vm0 = vmpackc.low %vm2857_vm1, %vm2851_vm15  ;;  %vm2869_vm13 = vcmp.eq.s32.totalorder %v10637_v18, %v11660_v6  ;;  %v1664_v63 = vadd.s32 360, %v10621_v2  ;;  %vm2871_vm15 = vcmp.eq.s32.totalorder %v10811_v36, %v11660_v6 }
 0x20c   :  { %8774 = vmatprep.subr.msk.bf16.mxu1 %vm11630_vm10, %v13503_v44  ;;  %8870 = vmatprep.subr.msk.bf16.mxu0 %vm11648_vm14, %v13503_v44  ;;  %13538 = vst [vmem:[#allocation77_spill] sm:$0xff] %v11724_v55  ;;  %13539 = vst [vmem:[#allocation78_spill] sm:$0xff] %v11726_v46  ;;  %vm2863_vm12 = vcmp.eq.s32.totalorder %v10637_v18, %v11657_v27  ;;  %vm2865_vm14 = vcmp.eq.s32.totalorder %v10811_v36, %v11657_v27  ;;  %v11805_v12 = vadd.s32 1, %v11724_v55 }
 0x20d   :  { %3633 = vmatprep.mubr.f32.mxu1 %v13409_v5  ;;  %3775 = vmatprep.mubr.f32.mxu0 %v13409_v5  ;;  %vm11752_vm10 = vmpackc.low %vm2856_vm8, %vm2850_vm5  ;;  %vm2862_vm1 = vcmp.eq.s32.totalorder %v10626_v1, %v11657_v27  ;;  %vm2868_vm4 = vcmp.eq.s32.totalorder %v10626_v1, %v11660_v6  ;;  %vm2870_vm5 = vcmp.eq.s32.totalorder %v10818_v42, %v11660_v6  ;;  %v11808_v23 = vadd.s32 1, %v11726_v46 }
 0x20e   :  { %vm11774_vm3 = vmpackc.low %vm2858_vm9, %vm2852_vm6  ;;  %vm2875_vm8 = vcmp.eq.s32.totalorder %v10637_v18, %v11719_v29  ;;  %vm2881_vm6 = vcmp.eq.s32.totalorder %v10637_v18, %v11722_v51  ;;  %v11816_v60 = vmul.u32 2, %v1663_v37  ;;  %v11818_v31 = vmul.u32 2, %v1664_v63 }
 0x20f   :  { %8776 = vmatpush1.bf16.msk.msra.mxu1 %vm11670_vm2, %v13503_v44  ;;  %8872 = vmatpush1.bf16.msk.msra.mxu0 %vm11692_vm7, %v13503_v44  ;;  %vm2864_vm2 = vcmp.eq.s32.totalorder %v10818_v42, %v11657_v27  ;;  %vm11796_vm7 = vmpackc.low %vm2869_vm13, %vm2863_vm12  ;;  %v1665_v5 = vadd.s32 368, %v10621_v2  ;;  %vm2883_vm12 = vcmp.eq.s32.totalorder %v10811_v36, %v11722_v51  ;;  %v11886_v2 = vmul.u32 2, %v1666_v17 }
 0x210   :  { %8778 = vmatprep.subr.msk.bf16.mxu1 %vm11714_vm0, %v13503_v44  ;;  %8874 = vmatprep.subr.msk.bf16.mxu0 %vm11734_vm11, %v13503_v44  ;;  %vm8877_vm9 = vmpackc.low %vm2871_vm15, %vm2865_vm14  ;;  %vm2877_vm11 = vcmp.eq.s32.totalorder %v10811_v36, %v11719_v29  ;;  %vm2874_vm14 = vcmp.eq.s32.totalorder %v10626_v1, %v11719_v29  ;;  %vm2876_vm15 = vcmp.eq.s32.totalorder %v10818_v42, %v11719_v29  ;;  %v11879_v43 = vadd.s32 1, %v11816_v60 }
 0x211   :  { %vm11828_vm0 = vmpackc.low %vm2868_vm4, %vm2862_vm1  ;;  %vm2887_vm4 = vcmp.eq.s32.totalorder %v10637_v18, %v11805_v12  ;;  %v11882_v63 = vadd.s32 1, %v11818_v31  ;;  %v11884_v41 = vmul.u32 2, %v1665_v5  ;;  %13554 = vst [vmem:[#allocation79_spill] sm:$0xff] %v11886_v2  ;;  %v11939_v37 = vadd.s32 1, %v11886_v2  ;;  %v13596_v5 = vld [vmem:[#allocation38_spill] sm:$0xff] }
 0x212   :  { %vm11848_vm13 = vmpackc.low %vm2870_vm5, %vm2864_vm2  ;;  %vm2893_vm2 = vcmp.eq.s32.totalorder %v10637_v18, %v11808_v23  ;;  %v11976_v55 = vadd.s32 640, %v10626_v1  ;;  %v12007_v2 = vadd.s32 512, %v10626_v1 }
 0x213   :  { %8780 = vmatpush1.bf16.msk.msra.mxu1 %vm11752_vm10, %v13503_v44  ;;  %8876 = vmatpush1.bf16.msk.msra.mxu0 %vm11774_vm3, %v13503_v44  ;;  %vm2880_vm10 = vcmp.eq.s32.totalorder %v10626_v1, %v11722_v51  ;;  %vm11868_vm1 = vmpackc.low %vm2881_vm6, %vm2875_vm8  ;;  %vm2882_vm3 = vcmp.eq.s32.totalorder %v10818_v42, %v11722_v51  ;;  %vm2889_vm8 = vcmp.eq.s32.totalorder %v10811_v36, %v11805_v12  ;;  %v11936_v46 = vadd.s32 1, %v11884_v41 }
 0x214   :  { %8782 = vmatprep.subr.msk.bf16.mxu1 %vm11796_vm7, %v13503_v44  ;;  %8878 = vmatprep.subr.msk.bf16.mxu0 %vm8877_vm9, %v13503_v44  ;;  %vm8881_vm5 = vmpackc.low %vm2883_vm12, %vm2877_vm11  ;;  %vm2895_vm6 = vcmp.eq.s32.totalorder %v10811_v36, %v11808_v23  ;;  %vm2886_vm11 = vcmp.eq.s32.totalorder %v10626_v1, %v11805_v12  ;;  %vm2892_vm12 = vcmp.eq.s32.totalorder %v10626_v1, %v11808_v23 }
 0x215   :  { %vm11888_vm7 = vmpackc.low %vm2880_vm10, %vm2874_vm14  ;;  %vm2894_vm14 = vcmp.eq.s32.totalorder %v10818_v42, %v11808_v23 }
 0x216   :  { %vm11905_vm9 = vmpackc.low %vm2882_vm3, %vm2876_vm15  ;;  %vm2899_vm15 = vcmp.eq.s32.totalorder %v10637_v18, %v11879_v43 }
 0x217   :  { %8784 = vmatpush1.bf16.msk.msra.mxu1 %vm11828_vm0, %v13503_v44  ;;  %8880 = vmatpush1.bf16.msk.msra.mxu0 %vm11848_vm13, %v13503_v44  ;;  %vm11923_vm0 = vmpackc.low %vm2893_vm2, %vm2887_vm4  ;;  %vm2888_vm13 = vcmp.eq.s32.totalorder %v10818_v42, %v11805_v12  ;;  %vm2901_vm4 = vcmp.eq.s32.totalorder %v10811_v36, %v11879_v43  ;;  %vm2907_vm2 = vcmp.eq.s32.totalorder %v10811_v36, %v11882_v63 }
 0x218   :  { %8786 = vmatprep.subr.msk.bf16.mxu1 %vm11868_vm1, %v13503_v44  ;;  %8882 = vmatprep.subr.msk.bf16.mxu0 %vm8881_vm5, %v13503_v44  ;;  %vm8885_vm10 = vmpackc.low %vm2895_vm6, %vm2889_vm8  ;;  %vm2905_vm1 = vcmp.eq.s32.totalorder %v10637_v18, %v11882_v63  ;;  %vm2898_vm8 = vcmp.eq.s32.totalorder %v10626_v1, %v11879_v43  ;;  %vm2904_vm6 = vcmp.eq.s32.totalorder %v10626_v1, %v11882_v63 }
 0x219   :  { %vm11941_vm3 = vmpackc.low %vm2892_vm12, %vm2886_vm11  ;;  %vm2906_vm11 = vcmp.eq.s32.totalorder %v10818_v42, %v11882_v63 }
 0x21a   :  { %vm11955_vm5 = vmpackc.low %vm2894_vm14, %vm2888_vm13  ;;  %vm2911_vm13 = vcmp.eq.s32.totalorder %v10637_v18, %v11936_v46  ;;  %vm2917_vm14 = vcmp.eq.s32.totalorder %v10637_v18, %v11939_v37 }
 0x21b   :  { %8788 = vmatpush1.bf16.msk.msra.mxu1 %vm11888_vm7, %v13503_v44  ;;  %8884 = vmatpush1.bf16.msk.msra.mxu0 %vm11905_vm9, %v13503_v44  ;;  %vm8793_vm7 = vmpackc.low %vm2905_vm1, %vm2899_vm15  ;;  %vm2900_vm9 = vcmp.eq.s32.totalorder %v10818_v42, %v11879_v43  ;;  %vm2919_vm15 = vcmp.eq.s32.totalorder %v10811_v36, %v11939_v37 }
 0x21c   :  { %8790 = vmatprep.subr.msk.bf16.mxu1 %vm11923_vm0, %v13503_v44  ;;  %8886 = vmatprep.subr.msk.bf16.mxu0 %vm8885_vm10, %v13503_v44  ;;  %vm8889_vm12 = vmpackc.low %vm2907_vm2, %vm2901_vm4  ;;  %vm2913_vm10 = vcmp.eq.s32.totalorder %v10811_v36, %v11936_v46  ;;  %vm2910_vm4 = vcmp.eq.s32.totalorder %v10626_v1, %v11936_v46  ;;  %vm2916_vm2 = vcmp.eq.s32.totalorder %v10626_v1, %v11939_v37 }
 0x21d   :  { %vm11978_vm0 = vmpackc.low %vm2904_vm6, %vm2898_vm8 }
 0x21e   :  { %vm11992_vm1 = vmpackc.low %vm2906_vm11, %vm2900_vm9  ;;  %vm2639_vm9 = vcmp.eq.s32.totalorder %v11976_v55, %v10640_v20  ;;  %vm2645_vm11 = vcmp.eq.s32.totalorder %v11976_v55, %v10643_v21 }
 0x21f   :  { %8792 = vmatpush1.bf16.msk.msra.mxu1 %vm11941_vm3, %v13503_v44  ;;  %8888 = vmatpush1.bf16.msk.msra.mxu0 %vm11955_vm5, %v13503_v44  ;;  %vm8797_vm8 = vmpackc.low %vm2917_vm14, %vm2911_vm13  ;;  %vm2912_vm3 = vcmp.eq.s32.totalorder %v10818_v42, %v11936_v46  ;;  %vm2918_vm5 = vcmp.eq.s32.totalorder %v10818_v42, %v11939_v37  ;;  %vm1731_vm13 = vcmp.eq.s32.totalorder %v10811_v36, %v10631_v9 }
 0x220   :  { %8794 = vmatprep.subr.msk.bf16.mxu1 %vm8793_vm7, %v13503_v44  ;;  %8890 = vmatprep.subr.msk.bf16.mxu0 %vm8889_vm12, %v13503_v44  ;;  %vm8893_vm6 = vmpackc.low %vm2919_vm15, %vm2913_vm10  ;;  %vm1725_vm12 = vcmp.eq.s32.totalorder %v10811_v36, %v10629_v7  ;;  %vm2638_vm15 = vcmp.eq.s32.totalorder %v12007_v2, %v10640_v20  ;;  %v13595_v20 = vld [vmem:[#allocation43_spill] sm:$0xff] }
 0x221   :  { %vm12013_vm7 = vmpackc.low %vm2916_vm2, %vm2910_vm4  ;;  %vm2644_vm4 = vcmp.eq.s32.totalorder %v12007_v2, %v10643_v21 }
 0x222   :  { %v13570_v15 = vsel %vm12013_vm7, 4294967295, %v13569_v15  ;;  %vm8895_vm14 = vmpackc.low %vm2918_vm5, %vm2912_vm3  ;;  %vm1730_vm7 = vcmp.eq.s32.totalorder %v10818_v42, %v10631_v9 }
 0x223   :  { %8796 = vmatpush1.bf16.msk.msra.mxu1 %vm11978_vm0, %v13503_v44  ;;  %8892 = vmatpush1.bf16.msk.msra.mxu0 %vm11992_vm1, %v13503_v44  ;;  %vm8897_vm10 = vmpackc.low %vm2645_vm11, %vm2639_vm9  ;;  %vm1724_vm0 = vcmp.eq.s32.totalorder %v10818_v42, %v10629_v7  ;;  %vm2651_vm1 = vcmp.eq.s32.totalorder %v11976_v55, %v10657_v33  ;;  %vm13571_vm3 = vnez %v13570_v15  ;;  %vm1743_vm9 = vcmp.eq.s32.totalorder %v10811_v36, %v10648_v25  ;;  %v13598_v15 = vld [vmem:[#allocation47_spill] sm:$0xff] }
 0x224   :  { %8798 = vmatprep.subr.msk.bf16.mxu1 %vm8797_vm8, %v13503_v44  ;;  %8894 = vmatprep.subr.msk.bf16.mxu0 %vm8893_vm6, %v13503_v44  ;;  %vm9089_vm2 = vmpackc.low %vm1731_vm13, %vm1725_vm12  ;;  %vm2657_vm8 = vcmp.eq.s32.totalorder %v11976_v55, %v10664_v39  ;;  %vm1737_vm6 = vcmp.eq.s32.totalorder %v10811_v36, %v10645_v22  ;;  %vm2650_vm12 = vcmp.eq.s32.totalorder %v12007_v2, %v10657_v33  ;;  %v13580_v33 = vld [vmem:[#allocation29_spill] sm:$0xff] }
 0x225   :  { %vm12045_vm5 = vmpackc.low %vm2644_vm4, %vm2638_vm15  ;;  %vm2656_vm13 = vcmp.eq.s32.totalorder %v12007_v2, %v10664_v39  ;;  %vm2663_vm4 = vcmp.eq.s32.totalorder %v11976_v55, %v10685_v47  ;;  %v13581_v39 = vld [vmem:[#allocation30_spill] sm:$0xff] }
 0x226   :  { %vm12055_vm11 = vmpackc.low %vm1730_vm7, %vm1724_vm0  ;;  %vm1742_vm7 = vcmp.eq.s32.totalorder %v10818_v42, %v10648_v25 }
 0x227   :  { %8800 = vmatpush1.bf16.msk.msra.mxu1 %vm13571_vm3, %v13503_v44  ;;  %8896 = vmatpush1.bf16.msk.msra.mxu0 %vm8895_vm14, %v13503_v44  ;;  %v8397_v21 = vpop.f32.mrb[12].mxu1  ;;  %vm12063_vm14 = vmpackc.low %vm2657_vm8, %vm2651_vm1  ;;  %vm1749_vm1 = vcmp.eq.s32.totalorder %v10811_v36, %v10659_v34  ;;  %vm1755_vm8 = vcmp.eq.s32.totalorder %v10811_v36, %v10666_v40 }
 0x228   :  { %8898 = vmatprep.subr.msk.bf16.mxu1 %vm8897_vm10, %v13503_v44  ;;  %9090 = vmatprep.subr.msk.bf16.mxu0 %vm9089_vm2, %v13503_v44  ;;  %v8398_v17 = vpop.f32.mrb[13].mxu1  ;;  %vm1736_vm10 = vcmp.eq.s32.totalorder %v10818_v42, %v10645_v22  ;;  %vm9093_vm15 = vmpackc.low %vm1743_vm9, %vm1737_vm6  ;;  %vm2669_vm2 = vcmp.eq.s32.totalorder %v11976_v55, %v10694_v49  ;;  %vm2668_vm6 = vcmp.eq.s32.totalorder %v12007_v2, %v10694_v49  ;;  %v13583_v49 = vld [vmem:[#allocation34_spill] sm:$0xff] }
 0x229   :  { %v12071_v1 = vadd.f32 %v8398_v17, %v8397_v21  ;;  %v8400_v9 = vpop.f32.mrb[14].mxu1  ;;  %vm12095_vm0 = vmpackc.low %vm2656_vm13, %vm2650_vm12  ;;  %vm1754_vm12 = vcmp.eq.s32.totalorder %v10818_v42, %v10666_v40  ;;  %v13597_v17 = vld [vmem:[#allocation40_spill] sm:$0xff] }
 0x22a   :  { %3634 = vmatmul.mubr.f32.vlgmr.msra.gmra.mrb[20].mxu1 %v11604_v52  ;;  %3776 = vmatmul.mubr.f32.vlgmr.msra.gmra.mrb[16].mxu0 %v11604_v52  ;;  %v8401_v21 = vpop.f32.mrb[15].mxu1  ;;  %vm9095_vm3 = vmpackc.low %vm1742_vm7, %vm1736_vm10  ;;  %vm2675_vm10 = vcmp.eq.s32.totalorder %v11976_v55, %v10721_v58  ;;  %vm2681_vm7 = vcmp.eq.s32.totalorder %v11976_v55, %v10724_v59  ;;  %v13600_v9 = vld [vmem:[#allocation42_spill] sm:$0xff] }
 0x22b   :  { %8900 = vmatpush1.bf16.msk.msra.mxu1 %vm12045_vm5, %v13503_v44  ;;  %3846 = vmatprep.mubr.f32.mxu1 %v11622_v56  ;;  %vm2662_vm5 = vcmp.eq.s32.totalorder %v12007_v2, %v10685_v47  ;;  %vm8905_vm9 = vmpackc.low %vm2669_vm2, %vm2663_vm4  ;;  %vm1767_vm4 = vcmp.eq.s32.totalorder %v10811_v36, %v10696_v50  ;;  %v13582_v47 = vld [vmem:[#allocation31_spill] sm:$0xff]  ;;  %v13599_v21 = vld [vmem:[#allocation48_spill] sm:$0xff] }
 0x22c   :  { %9092 = vmatpush1.bf16.msk.msra.mxu0 %vm12055_vm11, %v13503_v44  ;;  %4130 = vmatprep.mubr.f32.mxu0 %v11528_v45  ;;  %vm1748_vm11 = vcmp.eq.s32.totalorder %v10818_v42, %v10659_v34  ;;  %vm9097_vm13 = vmpackc.low %vm1755_vm8, %vm1749_vm1  ;;  %vm2674_vm1 = vcmp.eq.s32.totalorder %v12007_v2, %v10721_v58  ;;  %vm2680_vm8 = vcmp.eq.s32.totalorder %v12007_v2, %v10724_v59  ;;  %v13586_v59 = vld [vmem:[#allocation32_spill] sm:$0xff]  ;;  %v13602_v58 = vld [vmem:[#allocation49_spill] sm:$0xff] }
 0x22d   :  { %8902 = vmatprep.subr.msk.bf16.mxu1 %vm12063_vm14, %v13503_v44  ;;  %9094 = vmatprep.subr.msk.bf16.mxu0 %vm9093_vm15, %v13503_v44  ;;  %vm8907_vm14 = vmpackc.low %vm2668_vm6, %vm2662_vm5  ;;  %vm1761_vm15 = vcmp.eq.s32.totalorder %v10811_v36, %v10687_v48  ;;  %vm1760_vm5 = vcmp.eq.s32.totalorder %v10818_v42, %v10687_v48  ;;  %vm1766_vm6 = vcmp.eq.s32.totalorder %v10818_v42, %v10696_v50  ;;  %v13626_v56 = vld [vmem:[#allocation65_spill] sm:$0xff] }
 0x22e   :  { %vm9099_vm2 = vmpackc.low %vm1754_vm12, %vm1748_vm11  ;;  %vm2693_vm11 = vcmp.eq.s32.totalorder %v11976_v55, %v10752_v4 }
 0x22f   :  { %8904 = vmatpush1.bf16.msk.msra.mxu1 %vm12095_vm0, %v13503_v44  ;;  %vm8909_vm0 = vmpackc.low %vm2681_vm7, %vm2675_vm10  ;;  %vm1779_vm10 = vcmp.eq.s32.totalorder %v10811_v36, %v10726_v61 }
 0x230   :  { %9096 = vmatpush1.bf16.msk.msra.mxu0 %vm9095_vm3, %v13503_v44  ;;  %8906 = vmatprep.subr.msk.bf16.mxu1 %vm8905_vm9, %v13503_v44  ;;  %vm9101_vm3 = vmpackc.low %vm1767_vm4, %vm1761_vm15  ;;  %vm2687_vm9 = vcmp.eq.s32.totalorder %v11976_v55, %v10742_v62  ;;  %vm2686_vm15 = vcmp.eq.s32.totalorder %v12007_v2, %v10742_v62  ;;  %vm2692_vm4 = vcmp.eq.s32.totalorder %v12007_v2, %v10752_v4  ;;  %v13587_v62 = vld [vmem:[#allocation33_spill] sm:$0xff] }
 0x231   :  { %9098 = vmatprep.subr.msk.bf16.mxu0 %vm9097_vm13, %v13503_v44  ;;  %vm8911_vm12 = vmpackc.low %vm2680_vm8, %vm2674_vm1  ;;  %vm1773_vm13 = vcmp.eq.s32.totalorder %v10811_v36, %v10715_v57  ;;  %vm1772_vm1 = vcmp.eq.s32.totalorder %v10818_v42, %v10715_v57  ;;  %vm1778_vm8 = vcmp.eq.s32.totalorder %v10818_v42, %v10726_v61 }
 0x232   :  { %vm9103_vm7 = vmpackc.low %vm1766_vm6, %vm1760_vm5  ;;  %vm2705_vm5 = vcmp.eq.s32.totalorder %v11976_v55, %v10769_v14 }
 0x233   :  { %8908 = vmatpush1.bf16.msk.msra.mxu1 %vm8907_vm14, %v13503_v44  ;;  %vm8913_vm14 = vmpackc.low %vm2693_vm11, %vm2687_vm9  ;;  %vm1791_vm9 = vcmp.eq.s32.totalorder %v10811_v36, %v10744_v0 }
 0x234   :  { %9100 = vmatpush1.bf16.msk.msra.mxu0 %vm9099_vm2, %v13503_v44  ;;  %8910 = vmatprep.subr.msk.bf16.mxu1 %vm8909_vm0, %v13503_v44  ;;  %vm9105_vm2 = vmpackc.low %vm1779_vm10, %vm1773_vm13  ;;  %vm2699_vm0 = vcmp.eq.s32.totalorder %v11976_v55, %v10761_v10  ;;  %vm2698_vm13 = vcmp.eq.s32.totalorder %v12007_v2, %v10761_v10  ;;  %vm2704_vm10 = vcmp.eq.s32.totalorder %v12007_v2, %v10769_v14  ;;  %v13604_v10 = vld [vmem:[#allocation45_spill] sm:$0xff] }
 0x235   :  { %9102 = vmatprep.subr.msk.bf16.mxu0 %vm9101_vm3, %v13503_v44  ;;  %vm8915_vm6 = vmpackc.low %vm2692_vm4, %vm2686_vm15  ;;  %vm1785_vm3 = vcmp.eq.s32.totalorder %v10811_v36, %v10734_v35  ;;  %vm1784_vm15 = vcmp.eq.s32.totalorder %v10818_v42, %v10734_v35  ;;  %vm1790_vm4 = vcmp.eq.s32.totalorder %v10818_v42, %v10744_v0 }
 0x236   :  { %vm9107_vm11 = vmpackc.low %vm1778_vm8, %vm1772_vm1  ;;  %vm2717_vm1 = vcmp.eq.s32.totalorder %v11976_v55, %v10806_v28 }
 0x237   :  { %8912 = vmatpush1.bf16.msk.msra.mxu1 %vm8911_vm12, %v13503_v44  ;;  %vm8917_vm12 = vmpackc.low %vm2705_vm5, %vm2699_vm0  ;;  %vm1803_vm0 = vcmp.eq.s32.totalorder %v10811_v36, %v10777_v3 }
 0x238   :  { %9104 = vmatpush1.bf16.msk.msra.mxu0 %vm9103_vm7, %v13503_v44  ;;  %8914 = vmatprep.subr.msk.bf16.mxu1 %vm8913_vm14, %v13503_v44  ;;  %vm9109_vm7 = vmpackc.low %vm1791_vm9, %vm1785_vm3  ;;  %vm2711_vm14 = vcmp.eq.s32.totalorder %v11976_v55, %v10798_v26  ;;  %vm2710_vm3 = vcmp.eq.s32.totalorder %v12007_v2, %v10798_v26  ;;  %vm2716_vm9 = vcmp.eq.s32.totalorder %v12007_v2, %v10806_v28 }
 0x239   :  { %9106 = vmatprep.subr.msk.bf16.mxu0 %vm9105_vm2, %v13503_v44  ;;  %vm8919_vm8 = vmpackc.low %vm2704_vm10, %vm2698_vm13  ;;  %vm1797_vm2 = vcmp.eq.s32.totalorder %v10811_v36, %v10771_v16  ;;  %vm1796_vm13 = vcmp.eq.s32.totalorder %v10818_v42, %v10771_v16  ;;  %vm1802_vm10 = vcmp.eq.s32.totalorder %v10818_v42, %v10777_v3 }
 0x23a   :  { %vm9111_vm5 = vmpackc.low %vm1790_vm4, %vm1784_vm15  ;;  %vm2729_vm15 = vcmp.eq.s32.totalorder %v11976_v55, %v10850_v54 }
 0x23b   :  { %8916 = vmatpush1.bf16.msk.msra.mxu1 %vm8915_vm6, %v13503_v44  ;;  %vm8921_vm6 = vmpackc.low %vm2717_vm1, %vm2711_vm14  ;;  %vm1815_vm14 = vcmp.eq.s32.totalorder %v10811_v36, %v13580_v33 }
 0x23c   :  { %9108 = vmatpush1.bf16.msk.msra.mxu0 %vm9107_vm11, %v13503_v44  ;;  %8918 = vmatprep.subr.msk.bf16.mxu1 %vm8917_vm12, %v13503_v44  ;;  %vm9113_vm11 = vmpackc.low %vm1803_vm0, %vm1797_vm2  ;;  %vm2723_vm12 = vcmp.eq.s32.totalorder %v11976_v55, %v10847_v53  ;;  %vm2722_vm2 = vcmp.eq.s32.totalorder %v12007_v2, %v10847_v53  ;;  %vm2728_vm0 = vcmp.eq.s32.totalorder %v12007_v2, %v10850_v54  ;;  %v13590_v53 = vld [vmem:[#allocation37_spill] sm:$0xff] }
 0x23d   :  { %9110 = vmatprep.subr.msk.bf16.mxu0 %vm9109_vm7, %v13503_v44  ;;  %vm8923_vm4 = vmpackc.low %vm2716_vm9, %vm2710_vm3  ;;  %vm1809_vm7 = vcmp.eq.s32.totalorder %v10811_v36, %v10786_v19  ;;  %vm1808_vm3 = vcmp.eq.s32.totalorder %v10818_v42, %v10786_v19  ;;  %vm1814_vm9 = vcmp.eq.s32.totalorder %v10818_v42, %v13580_v33 }
 0x23e   :  { %vm9115_vm1 = vmpackc.low %vm1802_vm10, %vm1796_vm13  ;;  %vm2741_vm13 = vcmp.eq.s32.totalorder %v11976_v55, %v10886_v13 }
 0x23f   :  { %8920 = vmatpush1.bf16.msk.msra.mxu1 %vm8919_vm8, %v13503_v44  ;;  %vm8925_vm8 = vmpackc.low %vm2729_vm15, %vm2723_vm12  ;;  %vm1827_vm12 = vcmp.eq.s32.totalorder %v10811_v36, %v13582_v47 }
 0x240   :  { %9112 = vmatpush1.bf16.msk.msra.mxu0 %vm9111_vm5, %v13503_v44  ;;  %8922 = vmatprep.subr.msk.bf16.mxu1 %vm8921_vm6, %v13503_v44  ;;  %vm9117_vm5 = vmpackc.low %vm1815_vm14, %vm1809_vm7  ;;  %vm2735_vm6 = vcmp.eq.s32.totalorder %v11976_v55, %v10883_v11  ;;  %vm2734_vm7 = vcmp.eq.s32.totalorder %v12007_v2, %v10883_v11  ;;  %vm2740_vm14 = vcmp.eq.s32.totalorder %v12007_v2, %v10886_v13  ;;  %v13592_v11 = vld [vmem:[#allocation35_spill] sm:$0xff]  ;;  %v13593_v13 = vld [vmem:[#allocation36_spill] sm:$0xff] }
 0x241   :  { %9114 = vmatprep.subr.msk.bf16.mxu0 %vm9113_vm11, %v13503_v44  ;;  %vm8927_vm10 = vmpackc.low %vm2728_vm0, %vm2722_vm2  ;;  %vm1821_vm11 = vcmp.eq.s32.totalorder %v10811_v36, %v13581_v39  ;;  %vm1820_vm2 = vcmp.eq.s32.totalorder %v10818_v42, %v13581_v39  ;;  %vm1826_vm0 = vcmp.eq.s32.totalorder %v10818_v42, %v13582_v47 }
 0x242   :  { %vm9119_vm15 = vmpackc.low %vm1814_vm9, %vm1808_vm3  ;;  %vm2753_vm3 = vcmp.eq.s32.totalorder %v11976_v55, %v13583_v49 }
 0x243   :  { %8924 = vmatpush1.bf16.msk.msra.mxu1 %vm8923_vm4, %v13503_v44  ;;  %vm8929_vm4 = vmpackc.low %vm2741_vm13, %vm2735_vm6  ;;  %vm1839_vm6 = vcmp.eq.s32.totalorder %v10811_v36, %v13587_v62 }
 0x244   :  { %9116 = vmatpush1.bf16.msk.msra.mxu0 %vm9115_vm1, %v13503_v44  ;;  %8926 = vmatprep.subr.msk.bf16.mxu1 %vm8925_vm8, %v13503_v44  ;;  %vm9121_vm1 = vmpackc.low %vm1827_vm12, %vm1821_vm11  ;;  %vm2747_vm8 = vcmp.eq.s32.totalorder %v11976_v55, %v10920_v38  ;;  %vm2752_vm11 = vcmp.eq.s32.totalorder %v12007_v2, %v13583_v49  ;;  %v13601_v49 = vld [vmem:[#allocation44_spill] sm:$0xff] }
 0x245   :  { %9118 = vmatprep.subr.msk.bf16.mxu0 %vm9117_vm5, %v13503_v44  ;;  %vm12255_vm9 = vmpackc.low %vm2740_vm14, %vm2734_vm7  ;;  %vm1833_vm5 = vcmp.eq.s32.totalorder %v10811_v36, %v13586_v59  ;;  %vm1838_vm7 = vcmp.eq.s32.totalorder %v10818_v42, %v13587_v62 }
 0x246   :  { %vm12265_vm13 = vmpackc.low %vm1826_vm0, %vm1820_vm2 }
 0x247   :  { %8928 = vmatpush1.bf16.msk.msra.mxu1 %vm8927_vm10, %v13503_v44  ;;  %v1612_v4 = vpop.f32.mrb[16].mxu1  ;;  %vm2746_vm10 = vcmp.eq.s32.totalorder %v12007_v2, %v10920_v38  ;;  %vm8933_vm12 = vmpackc.low %vm2753_vm3, %vm2747_vm8  ;;  %vm1851_vm8 = vcmp.eq.s32.totalorder %v10811_v36, %v13593_v13  ;;  %v13594_v38 = vld [vmem:[#allocation41_spill] sm:$0xff] }
 0x248   :  { %9120 = vmatpush1.bf16.msk.msra.mxu0 %vm9119_vm15, %v13503_v44  ;;  %8930 = vmatprep.subr.msk.bf16.mxu1 %vm8929_vm4, %v13503_v44  ;;  %v1613_v14 = vadd.f32 %v12071_v1, %v1612_v4  ;;  %v8603_v26 = vpop.f32.mrb[17].mxu1  ;;  %vm1832_vm15 = vcmp.eq.s32.totalorder %v10818_v42, %v13586_v59  ;;  %vm9125_vm14 = vmpackc.low %vm1839_vm6, %vm1833_vm5  ;;  %vm2759_vm4 = vcmp.eq.s32.totalorder %v11976_v55, %v13590_v53  ;;  %v13591_v1 = vld [vmem:[#allocation39_spill] sm:$0xff]  ;;  %v13603_v4 = vld [vmem:[#allocation50_spill] sm:$0xff] }
 0x249   :  { %9122 = vmatprep.subr.msk.bf16.mxu0 %vm9121_vm1, %v13503_v44  ;;  %v1615_v28 = vpop.f32.mrb[18].mxu1  ;;  %vm2765_vm2 = vcmp.eq.s32.totalorder %v11976_v55, %v13591_v1  ;;  %vm8935_vm0 = vmpackc.low %vm2752_vm11, %vm2746_vm10  ;;  %vm1845_vm1 = vcmp.eq.s32.totalorder %v10811_v36, %v13592_v11  ;;  %vm2764_vm5 = vcmp.eq.s32.totalorder %v12007_v2, %v13591_v1  ;;  %vm1844_vm10 = vcmp.eq.s32.totalorder %v10818_v42, %v13592_v11  ;;  %v13606_v26 = vld [vmem:[#allocation53_spill] sm:$0xff]  ;;  %v13609_v1 = vld [vmem:[#allocation52_spill] sm:$0xff] }
 0x24a   :  { %4352 = vst [vmem:[#allocation16 + $0x10] sm:$0xff] %v1613_v14  ;;  %v8604_v54 = vpop.f32.mrb[19].mxu1  ;;  %vm9127_vm3 = vmpackc.low %vm1838_vm7, %vm1832_vm15  ;;  %vm1850_vm11 = vcmp.eq.s32.totalorder %v10818_v42, %v13593_v13  ;;  %vm2777_vm15 = vcmp.eq.s32.totalorder %v11976_v55, %v13595_v20  ;;  %v13605_v14 = vld [vmem:[#allocation46_spill] sm:$0xff] }
 0x24b   :  { %8932 = vmatpush1.bf16.msk.msra.mxu1 %vm12255_vm9, %v13503_v44  ;;  %vm2758_vm9 = vcmp.eq.s32.totalorder %v12007_v2, %v13590_v53  ;;  %vm8937_vm6 = vmpackc.low %vm2765_vm2, %vm2759_vm4  ;;  %vm1863_vm4 = vcmp.eq.s32.totalorder %v10811_v36, %v13597_v17  ;;  %v13607_v28 = vld [vmem:[#allocation54_spill] sm:$0xff]  ;;  %v13608_v53 = vld [vmem:[#allocation51_spill] sm:$0xff] }
 0x24c   :  { %9124 = vmatpush1.bf16.msk.msra.mxu0 %vm12265_vm13, %v13503_v44  ;;  %8934 = vmatprep.subr.msk.bf16.mxu1 %vm8933_vm12, %v13503_v44  ;;  %vm9129_vm13 = vmpackc.low %vm1851_vm8, %vm1845_vm1  ;;  %vm2771_vm12 = vcmp.eq.s32.totalorder %v11976_v55, %v13594_v38  ;;  %vm2770_vm1 = vcmp.eq.s32.totalorder %v12007_v2, %v13594_v38  ;;  %vm2776_vm8 = vcmp.eq.s32.totalorder %v12007_v2, %v13595_v20  ;;  %v13610_v54 = vld [vmem:[#allocation57_spill] sm:$0xff]  ;;  %v13611_v38 = vld [vmem:[#allocation58_spill] sm:$0xff] }
 0x24d   :  { %9126 = vmatprep.subr.msk.bf16.mxu0 %vm9125_vm14, %v13503_v44  ;;  %vm8939_vm7 = vmpackc.low %vm2764_vm5, %vm2758_vm9  ;;  %vm1857_vm14 = vcmp.eq.s32.totalorder %v10811_v36, %v13596_v5  ;;  %vm1856_vm9 = vcmp.eq.s32.totalorder %v10818_v42, %v13596_v5  ;;  %vm1862_vm5 = vcmp.eq.s32.totalorder %v10818_v42, %v13597_v17  ;;  %v13612_v20 = vld [vmem:[#allocation55_spill] sm:$0xff] }
 0x24e   :  { %vm9131_vm2 = vmpackc.low %vm1850_vm11, %vm1844_vm10  ;;  %vm2789_vm10 = vcmp.eq.s32.totalorder %v11976_v55, %v13599_v21 }
 0x24f   :  { %8936 = vmatpush1.bf16.msk.msra.mxu1 %vm8935_vm0, %v13503_v44  ;;  %vm8941_vm0 = vmpackc.low %vm2777_vm15, %vm2771_vm12  ;;  %vm1875_vm12 = vcmp.eq.s32.totalorder %v10811_v36, %v13601_v49 }
 0x250   :  { %9128 = vmatpush1.bf16.msk.msra.mxu0 %vm9127_vm3, %v13503_v44  ;;  %8938 = vmatprep.subr.msk.bf16.mxu1 %vm8937_vm6, %v13503_v44  ;;  %vm9133_vm3 = vmpackc.low %vm1863_vm4, %vm1857_vm14  ;;  %vm2783_vm6 = vcmp.eq.s32.totalorder %v11976_v55, %v13598_v15  ;;  %vm2782_vm14 = vcmp.eq.s32.totalorder %v12007_v2, %v13598_v15  ;;  %vm2788_vm4 = vcmp.eq.s32.totalorder %v12007_v2, %v13599_v21  ;;  %v13613_v15 = vld [vmem:[#allocation56_spill] sm:$0xff]  ;;  %v13614_v21 = vld [vmem:[#allocation62_spill] sm:$0xff] }
 0x251   :  { %9130 = vmatprep.subr.msk.bf16.mxu0 %vm9129_vm13, %v13503_v44  ;;  %vm8943_vm11 = vmpackc.low %vm2776_vm8, %vm2770_vm1  ;;  %vm1869_vm13 = vcmp.eq.s32.totalorder %v10811_v36, %v13600_v9  ;;  %vm1868_vm1 = vcmp.eq.s32.totalorder %v10818_v42, %v13600_v9  ;;  %vm1874_vm8 = vcmp.eq.s32.totalorder %v10818_v42, %v13601_v49 }
 0x252   :  { %vm9135_vm15 = vmpackc.low %vm1862_vm5, %vm1856_vm9  ;;  %vm2801_vm9 = vcmp.eq.s32.totalorder %v11976_v55, %v13603_v4 }
 0x253   :  { %8940 = vmatpush1.bf16.msk.msra.mxu1 %vm8939_vm7, %v13503_v44  ;;  %vm8945_vm7 = vmpackc.low %vm2789_vm10, %vm2783_vm6  ;;  %vm1887_vm6 = vcmp.eq.s32.totalorder %v10811_v36, %v13605_v14 }
 0x254   :  { %9132 = vmatpush1.bf16.msk.msra.mxu0 %vm9131_vm2, %v13503_v44  ;;  %8942 = vmatprep.subr.msk.bf16.mxu1 %vm8941_vm0, %v13503_v44  ;;  %vm9137_vm2 = vmpackc.low %vm1875_vm12, %vm1869_vm13  ;;  %vm2795_vm0 = vcmp.eq.s32.totalorder %v11976_v55, %v13602_v58  ;;  %vm2794_vm13 = vcmp.eq.s32.totalorder %v12007_v2, %v13602_v58  ;;  %vm2800_vm12 = vcmp.eq.s32.totalorder %v12007_v2, %v13603_v4  ;;  %v13615_v58 = vld [vmem:[#allocation63_spill] sm:$0xff] }
 0x255   :  { %9134 = vmatprep.subr.msk.bf16.mxu0 %vm9133_vm3, %v13503_v44  ;;  %vm8947_vm5 = vmpackc.low %vm2788_vm4, %vm2782_vm14  ;;  %vm1881_vm3 = vcmp.eq.s32.totalorder %v10811_v36, %v13604_v10  ;;  %vm1880_vm14 = vcmp.eq.s32.totalorder %v10818_v42, %v13604_v10  ;;  %vm1886_vm4 = vcmp.eq.s32.totalorder %v10818_v42, %v13605_v14  ;;  %v13640_v4 = vld [vmem:[#allocation71_spill] sm:$0xff] }
 0x256   :  { %vm9139_vm10 = vmpackc.low %vm1874_vm8, %vm1868_vm1  ;;  %vm2813_vm1 = vcmp.eq.s32.totalorder %v11976_v55, %v13607_v28 }
 0x257   :  { %8944 = vmatpush1.bf16.msk.msra.mxu1 %vm8943_vm11, %v13503_v44  ;;  %vm8949_vm11 = vmpackc.low %vm2801_vm9, %vm2795_vm0  ;;  %vm1899_vm0 = vcmp.eq.s32.totalorder %v10811_v36, %v13609_v1 }
 0x258   :  { %9136 = vmatpush1.bf16.msk.msra.mxu0 %vm9135_vm15, %v13503_v44  ;;  %8946 = vmatprep.subr.msk.bf16.mxu1 %vm8945_vm7, %v13503_v44  ;;  %vm9141_vm15 = vmpackc.low %vm1887_vm6, %vm1881_vm3  ;;  %vm2807_vm7 = vcmp.eq.s32.totalorder %v11976_v55, %v13606_v26  ;;  %vm2806_vm3 = vcmp.eq.s32.totalorder %v12007_v2, %v13606_v26  ;;  %vm2812_vm6 = vcmp.eq.s32.totalorder %v12007_v2, %v13607_v28  ;;  %v13618_v26 = vld [vmem:[#allocation59_spill] sm:$0xff]  ;;  %v13619_v28 = vld [vmem:[#allocation60_spill] sm:$0xff] }
 0x259   :  { %9138 = vmatprep.subr.msk.bf16.mxu0 %vm9137_vm2, %v13503_v44  ;;  %vm8951_vm8 = vmpackc.low %vm2800_vm12, %vm2794_vm13  ;;  %vm1893_vm2 = vcmp.eq.s32.totalorder %v10811_v36, %v13608_v53  ;;  %vm1892_vm13 = vcmp.eq.s32.totalorder %v10818_v42, %v13608_v53  ;;  %vm1898_vm12 = vcmp.eq.s32.totalorder %v10818_v42, %v13609_v1 }
 0x25a   :  { %vm9143_vm9 = vmpackc.low %vm1886_vm4, %vm1880_vm14  ;;  %vm2825_vm14 = vcmp.eq.s32.totalorder %v11976_v55, %v13611_v38 }
 0x25b   :  { %8948 = vmatpush1.bf16.msk.msra.mxu1 %vm8947_vm5, %v13503_v44  ;;  %vm8953_vm5 = vmpackc.low %vm2813_vm1, %vm2807_vm7  ;;  %vm1911_vm7 = vcmp.eq.s32.totalorder %v10811_v36, %v13613_v15 }
 0x25c   :  { %9140 = vmatpush1.bf16.msk.msra.mxu0 %vm9139_vm10, %v13503_v44  ;;  %8950 = vmatprep.subr.msk.bf16.mxu1 %vm8949_vm11, %v13503_v44  ;;  %vm9145_vm10 = vmpackc.low %vm1899_vm0, %vm1893_vm2  ;;  %vm2819_vm11 = vcmp.eq.s32.totalorder %v11976_v55, %v13610_v54  ;;  %vm2818_vm2 = vcmp.eq.s32.totalorder %v12007_v2, %v13610_v54  ;;  %vm2824_vm0 = vcmp.eq.s32.totalorder %v12007_v2, %v13611_v38  ;;  %v13634_v38 = vld [vmem:[#allocation67_spill] sm:$0xff] }
 0x25d   :  { %9142 = vmatprep.subr.msk.bf16.mxu0 %vm9141_vm15, %v13503_v44  ;;  %vm8955_vm4 = vmpackc.low %vm2812_vm6, %vm2806_vm3  ;;  %vm1905_vm15 = vcmp.eq.s32.totalorder %v10811_v36, %v13612_v20  ;;  %vm1904_vm3 = vcmp.eq.s32.totalorder %v10818_v42, %v13612_v20  ;;  %vm1910_vm6 = vcmp.eq.s32.totalorder %v10818_v42, %v13613_v15 }
 0x25e   :  { %vm9147_vm1 = vmpackc.low %vm1898_vm12, %vm1892_vm13  ;;  %vm2837_vm13 = vcmp.eq.s32.totalorder %v11976_v55, %v13615_v58 }
 0x25f   :  { %8952 = vmatpush1.bf16.msk.msra.mxu1 %vm8951_vm8, %v13503_v44  ;;  %vm8957_vm8 = vmpackc.low %vm2825_vm14, %vm2819_vm11  ;;  %vm1923_vm11 = vcmp.eq.s32.totalorder %v10811_v36, %v13619_v28 }
 0x260   :  { %9144 = vmatpush1.bf16.msk.msra.mxu0 %vm9143_vm9, %v13503_v44  ;;  %8954 = vmatprep.subr.msk.bf16.mxu1 %vm8953_vm5, %v13503_v44  ;;  %vm9149_vm9 = vmpackc.low %vm1911_vm7, %vm1905_vm15  ;;  %vm2831_vm5 = vcmp.eq.s32.totalorder %v11976_v55, %v13614_v21  ;;  %vm2836_vm15 = vcmp.eq.s32.totalorder %v12007_v2, %v13615_v58  ;;  %v9534_v58 = vld [vmem:[#allocation10 + $0x4c] ss:$12 sps:$4 sm:$0xff]  }
 0x261   :  { %9146 = vmatprep.subr.msk.bf16.mxu0 %vm9145_vm10, %v13503_v44  ;;  %vm12417_vm12 = vmpackc.low %vm2824_vm0, %vm2818_vm2  ;;  %vm1917_vm10 = vcmp.eq.s32.totalorder %v10811_v36, %v13618_v26  ;;  %vm1916_vm2 = vcmp.eq.s32.totalorder %v10818_v42, %v13618_v26 }
 0x262   :  { %vm12427_vm14 = vmpackc.low %vm1910_vm6, %vm1904_vm3  ;;  %vm2849_vm3 = vcmp.eq.s32.totalorder %v11976_v55, %v11560_v30 }
 0x263   :  { %8956 = vmatpush1.bf16.msk.msra.mxu1 %vm8955_vm4, %v13503_v44  ;;  %vm2830_vm4 = vcmp.eq.s32.totalorder %v12007_v2, %v13614_v21  ;;  %vm8961_vm7 = vmpackc.low %vm2837_vm13, %vm2831_vm5 }
 0x264   :  { %9148 = vmatpush1.bf16.msk.msra.mxu0 %vm9147_vm1, %v13503_v44  ;;  %8958 = vmatprep.subr.msk.bf16.mxu1 %vm8957_vm8, %v13503_v44  ;;  %vm1922_vm1 = vcmp.eq.s32.totalorder %v10818_v42, %v13619_v28  ;;  %vm12440_vm0 = vmpackc.low %vm1923_vm11, %vm1917_vm10  ;;  %vm2843_vm8 = vcmp.eq.s32.totalorder %v11976_v55, %v11557_v32  ;;  %v13627_v28 = vld [vmem:[#allocation66_spill] sm:$0xff]  ;;  %vm2848_vm10 = vcmp.eq.s32.totalorder %v12007_v2, %v11560_v30  ;;  %v13630_v30 = vld [vmem:[#allocation69_spill] sm:$0xff] }
 0x265   :  { %9150 = vmatprep.subr.msk.bf16.mxu0 %vm9149_vm9, %v13503_v44  ;;  %vm12451_vm6 = vmpackc.low %vm2836_vm15, %vm2830_vm4  ;;  %vm1929_vm9 = vcmp.eq.s32.totalorder %v10811_v36, %v13626_v56  ;;  %vm1935_vm5 = vcmp.eq.s32.totalorder %v10811_v36, %v13627_v28  ;;  %vm1934_vm4 = vcmp.eq.s32.totalorder %v10818_v42, %v13627_v28 }
 0x266   :  { %v1531_v21 = vpop.f32.mrb[12].mxu0  ;;  %vm12463_vm13 = vmpackc.low %vm1922_vm1, %vm1916_vm2  ;;  %vm2861_vm2 = vcmp.eq.s32.totalorder %v11976_v55, %v13630_v30 }
 0x267   :  { %8960 = vmatpush1.bf16.msk.msra.mxu1 %vm12417_vm12, %v13503_v44  ;;  %4350 = vst [vmem:[#allocation16] sm:$0xff] %v1531_v21  ;;  %v1533_v26 = vpop.f32.mrb[13].mxu0  ;;  %vm2842_vm12 = vcmp.eq.s32.totalorder %v12007_v2, %v11557_v32  ;;  %vm8965_vm11 = vmpackc.low %vm2849_vm3, %vm2843_vm8  ;;  %v13635_v21 = vld [vmem:[#allocation68_spill] sm:$0xff]  ;;  %v13638_v32 = vmov 0.0  }
 0x268   :  { %9152 = vmatpush1.bf16.msk.msra.mxu0 %vm12427_vm14, %v13503_v44  ;;  %8962 = vmatprep.subr.msk.bf16.mxu1 %vm8961_vm7, %v13503_v44  ;;  %4351 = vst [vmem:[#allocation16 + $0x8] sm:$0xff] %v1533_v26  ;;  %v1535_v15 = vpop.f32.mrb[14].mxu0  ;;  %vm1928_vm14 = vcmp.eq.s32.totalorder %v10818_v42, %v13626_v56  ;;  %vm9157_vm15 = vmpackc.low %vm1935_vm5, %vm1929_vm9  ;;  %vm2855_vm7 = vcmp.eq.s32.totalorder %v11976_v55, %v11583_v24  ;;  %v9529_v26 = vld [vmem:[#allocation10 + $0x30] ss:$12 sps:$4 sm:$0xff]  }
 0x269   :  { %9154 = vmatprep.subr.msk.bf16.mxu0 %vm12440_vm0, %v13503_v44  ;;  %v1536_v54 = vpop.f32.mrb[15].mxu0  ;;  %v13631_v15 = vld [vmem:[#allocation64_spill] sm:$0xff]  ;;  %vm12502_vm1 = vmpackc.low %vm2848_vm10, %vm2842_vm12  ;;  %vm1941_vm0 = vcmp.eq.s32.totalorder %v10811_v36, %v13634_v38  ;;  %vm1947_vm8 = vcmp.eq.s32.totalorder %v10811_v36, %v13635_v21  ;;  %vm2860_vm9 = vcmp.eq.s32.totalorder %v12007_v2, %v13630_v30  ;;  %vm1940_vm12 = vcmp.eq.s32.totalorder %v10818_v42, %v13634_v38 }
 0x26a   :  { %3847 = vmatmul.mubr.f32.vlgmr.msra.gmra.mrb[22].mxu1 %v11602_v8  ;;  %vm12514_vm3 = vmpackc.low %vm1934_vm4, %vm1928_vm14  ;;  %vm2873_vm14 = vcmp.eq.s32.totalorder %v11976_v55, %v11660_v6  ;;  %v9526_v54 = vld [vmem:[#allocation10 + $0x18] ss:$12 sps:$4 sm:$0xff]   ;;  %v9531_v30 = vld [vmem:[#allocation10 + $0x34] ss:$12 sps:$4 sm:$0xff]  }
 0x26b   :  { %4131 = vmatmul.mubr.f32.vlgmr.msra.gmra.mrb[16].mxu0 %v13631_v15  ;;  %8964 = vmatpush1.bf16.msk.msra.mxu1 %vm12451_vm6, %v13503_v44  ;;  %vm2854_vm6 = vcmp.eq.s32.totalorder %v12007_v2, %v11583_v24  ;;  %vm8969_vm5 = vmpackc.low %vm2861_vm2, %vm2855_vm7  ;;  %v13639_v24 = vld [vmem:[#allocation70_spill] sm:$0xff]  ;;  %vm1959_vm7 = vcmp.eq.s32.totalorder %v10811_v36, %v13640_v4  ;;  %v9576_v8 = vld [vmem:[#allocation10 + $0x19c] ss:$12 sps:$4 sm:$0xff]  }
 0x26c   :  { %9156 = vmatpush1.bf16.msk.msra.mxu0 %vm12463_vm13, %v13503_v44  ;;  %8966 = vmatprep.subr.msk.bf16.mxu1 %vm8965_vm11, %v13503_v44  ;;  %vm1946_vm13 = vcmp.eq.s32.totalorder %v10818_v42, %v13635_v21  ;;  %vm9161_vm10 = vmpackc.low %vm1947_vm8, %vm1941_vm0  ;;  %vm2867_vm11 = vcmp.eq.s32.totalorder %v11976_v55, %v11657_v27  ;;  %vm2866_vm0 = vcmp.eq.s32.totalorder %v12007_v2, %v11657_v27  ;;  %v13641_v27 = vld [vmem:[#allocation75_spill] sm:$0xff] }
 0x26d   :  { %9158 = vmatprep.subr.msk.bf16.mxu0 %vm9157_vm15, %v13503_v44  ;;  %3917 = vmatprep.mubr.f32.mxu1 %v13638_v32  ;;  %vm8971_vm4 = vmpackc.low %vm2860_vm9, %vm2854_vm6  ;;  %vm1953_vm15 = vcmp.eq.s32.totalorder %v10811_v36, %v13639_v24  ;;  %vm1952_vm6 = vcmp.eq.s32.totalorder %v10818_v42, %v13639_v24  ;;  %vm1958_vm9 = vcmp.eq.s32.totalorder %v10818_v42, %v13640_v4 }
 0x26e   :  { %4201 = vmatprep.mubr.f32.mxu0 %v13638_v32  ;;  %vm9163_vm2 = vmpackc.low %vm1946_vm13, %vm1940_vm12  ;;  %vm2885_vm12 = vcmp.eq.s32.totalorder %v11976_v55, %v11722_v51 }
 0x26f   :  { %8968 = vmatpush1.bf16.msk.msra.mxu1 %vm12502_vm1, %v13503_v44  ;;  %vm2872_vm1 = vcmp.eq.s32.totalorder %v12007_v2, %v11660_v6  ;;  %vm8973_vm8 = vmpackc.low %vm2873_vm14, %vm2867_vm11  ;;  %v13642_v6 = vld [vmem:[#allocation76_spill] sm:$0xff] }
 0x270   :  { %9160 = vmatpush1.bf16.msk.msra.mxu0 %vm12514_vm3, %v13503_v44  ;;  %8970 = vmatprep.subr.msk.bf16.mxu1 %vm8969_vm5, %v13503_v44  ;;  %vm9165_vm3 = vmpackc.low %vm1959_vm7, %vm1953_vm15  ;;  %vm2879_vm5 = vcmp.eq.s32.totalorder %v11976_v55, %v11719_v29  ;;  %vm1971_vm11 = vcmp.eq.s32.totalorder %v10811_v36, %v13642_v6  ;;  %vm2878_vm15 = vcmp.eq.s32.totalorder %v12007_v2, %v11719_v29  ;;  %v13643_v29 = vld [vmem:[#allocation77_spill] sm:$0xff] }
 0x271   :  { %9162 = vmatprep.subr.msk.bf16.mxu0 %vm9161_vm10, %v13503_v44  ;;  %vm8975_vm13 = vmpackc.low %vm2872_vm1, %vm2866_vm0  ;;  %vm1965_vm10 = vcmp.eq.s32.totalorder %v10811_v36, %v13641_v27  ;;  %vm2884_vm7 = vcmp.eq.s32.totalorder %v12007_v2, %v11722_v51  ;;  %vm1964_vm0 = vcmp.eq.s32.totalorder %v10818_v42, %v13641_v27  ;;  %vm1970_vm1 = vcmp.eq.s32.totalorder %v10818_v42, %v13642_v6  ;;  %v13644_v51 = vld [vmem:[#allocation78_spill] sm:$0xff] }
 0x272   :  { %vm9167_vm14 = vmpackc.low %vm1958_vm9, %vm1952_vm6  ;;  %vm2897_vm6 = vcmp.eq.s32.totalorder %v11976_v55, %v11808_v23 }
 0x273   :  { %8972 = vmatpush1.bf16.msk.msra.mxu1 %vm8971_vm4, %v13503_v44  ;;  %vm8977_vm4 = vmpackc.low %vm2885_vm12, %vm2879_vm5  ;;  %vm1983_vm5 = vcmp.eq.s32.totalorder %v10811_v36, %v13644_v51 }
 0x274   :  { %9164 = vmatpush1.bf16.msk.msra.mxu0 %vm9163_vm2, %v13503_v44  ;;  %8974 = vmatprep.subr.msk.bf16.mxu1 %vm8973_vm8, %v13503_v44  ;;  %vm9169_vm2 = vmpackc.low %vm1971_vm11, %vm1965_vm10  ;;  %vm2891_vm8 = vcmp.eq.s32.totalorder %v11976_v55, %v11805_v12  ;;  %vm2890_vm10 = vcmp.eq.s32.totalorder %v12007_v2, %v11805_v12  ;;  %vm2896_vm11 = vcmp.eq.s32.totalorder %v12007_v2, %v11808_v23  ;;  %v13645_v12 = vld [vmem:[#allocation79_spill] sm:$0xff]  ;;  %v9525_v23 = vld [vmem:[#allocation10 + $0x4] ss:$12 sps:$4 sm:$0xff]  }
 0x275   :  { %9166 = vmatprep.subr.msk.bf16.mxu0 %vm9165_vm3, %v13503_v44  ;;  %vm8979_vm9 = vmpackc.low %vm2884_vm7, %vm2878_vm15  ;;  %vm1977_vm3 = vcmp.eq.s32.totalorder %v10811_v36, %v13643_v29  ;;  %vm1976_vm15 = vcmp.eq.s32.totalorder %v10818_v42, %v13643_v29  ;;  %vm1982_vm7 = vcmp.eq.s32.totalorder %v10818_v42, %v13644_v51 }
 0x276   :  { %vm9171_vm12 = vmpackc.low %vm1970_vm1, %vm1964_vm0  ;;  %vm2909_vm0 = vcmp.eq.s32.totalorder %v11976_v55, %v11882_v63 }
 0x277   :  { %8976 = vmatpush1.bf16.msk.msra.mxu1 %vm8975_vm13, %v13503_v44  ;;  %vm8981_vm13 = vmpackc.low %vm2897_vm6, %vm2891_vm8  ;;  %vm1995_vm8 = vcmp.eq.s32.totalorder %v10811_v36, %v11818_v31 }
 0x278   :  { %9168 = vmatpush1.bf16.msk.msra.mxu0 %vm9167_vm14, %v13503_v44  ;;  %8978 = vmatprep.subr.msk.bf16.mxu1 %vm8977_vm4, %v13503_v44  ;;  %vm9173_vm14 = vmpackc.low %vm1983_vm5, %vm1977_vm3  ;;  %vm2903_vm4 = vcmp.eq.s32.totalorder %v11976_v55, %v11879_v43  ;;  %vm2902_vm3 = vcmp.eq.s32.totalorder %v12007_v2, %v11879_v43  ;;  %vm2908_vm5 = vcmp.eq.s32.totalorder %v12007_v2, %v11882_v63  ;;  %v9523_v43 = vld [vmem:[#allocation10] ss:$12 sps:$4 sm:$0xff]   ;;  %v9528_v63 = vld [vmem:[#allocation10 + $0x1c] ss:$12 sps:$4 sm:$0xff]  }
 0x279   :  { %9170 = vmatprep.subr.msk.bf16.mxu0 %vm9169_vm2, %v13503_v44  ;;  %vm8983_vm1 = vmpackc.low %vm2896_vm11, %vm2890_vm10  ;;  %vm1989_vm2 = vcmp.eq.s32.totalorder %v10811_v36, %v11816_v60  ;;  %vm1988_vm10 = vcmp.eq.s32.totalorder %v10818_v42, %v11816_v60  ;;  %vm1994_vm11 = vcmp.eq.s32.totalorder %v10818_v42, %v11818_v31 }
 0x27a   :  { %vm9175_vm6 = vmpackc.low %vm1982_vm7, %vm1976_vm15  ;;  %vm2921_vm15 = vcmp.eq.s32.totalorder %v11976_v55, %v11939_v37 }
 0x27b   :  { %8980 = vmatpush1.bf16.msk.msra.mxu1 %vm8979_vm9, %v13503_v44  ;;  %vm8985_vm9 = vmpackc.low %vm2909_vm0, %vm2903_vm4  ;;  %vm2007_vm4 = vcmp.eq.s32.totalorder %v10811_v36, %v13645_v12 }
 0x27c   :  { %9172 = vmatpush1.bf16.msk.msra.mxu0 %vm9171_vm12, %v13503_v44  ;;  %8982 = vmatprep.subr.msk.bf16.mxu1 %vm8981_vm13, %v13503_v44  ;;  %vm9177_vm12 = vmpackc.low %vm1995_vm8, %vm1989_vm2  ;;  %vm2915_vm13 = vcmp.eq.s32.totalorder %v11976_v55, %v11936_v46  ;;  %vm2914_vm2 = vcmp.eq.s32.totalorder %v12007_v2, %v11936_v46  ;;  %vm2920_vm8 = vcmp.eq.s32.totalorder %v12007_v2, %v11939_v37  ;;  %v13648_v46 = vld [vmem:[#allocation61_spill] sm:$0xff] }
 0x27d   :  { %9174 = vmatprep.subr.msk.bf16.mxu0 %vm9173_vm14, %v13503_v44  ;;  %vm8987_vm7 = vmpackc.low %vm2908_vm5, %vm2902_vm3  ;;  %vm2001_vm14 = vcmp.eq.s32.totalorder %v10811_v36, %v11884_v41  ;;  %vm2000_vm3 = vcmp.eq.s32.totalorder %v10818_v42, %v11884_v41  ;;  %vm2006_vm5 = vcmp.eq.s32.totalorder %v10818_v42, %v13645_v12  ;;  %v13646_v36 = vld [vmem:[#allocation28_spill] sm:$0xff]  ;;  %v13647_v42 = vld [vmem:[#allocation27_spill] sm:$0xff]  ;;  %v12665_v37 = vpack.c.bf16 %v11528_v45, %v11528_v45 }
 0x27e   :  { %vm9179_vm0 = vmpackc.low %vm1994_vm11, %vm1988_vm10  ;;  %vm1729_vm10 = vcmp.eq.s32.totalorder %v10637_v18, %v13646_v36 }
 0x27f   :  { %8984 = vmatpush1.bf16.msk.msra.mxu1 %vm8983_vm1, %v13503_v44  ;;  %vm8989_vm1 = vmpackc.low %vm2921_vm15, %vm2915_vm13  ;;  %vm1722_vm15 = vcmp.eq.s32.totalorder %v13647_v42, %v10629_v7 }
 0x280   :  { %9176 = vmatpush1.bf16.msk.msra.mxu0 %vm9175_vm6, %v13503_v44  ;;  %8986 = vmatprep.subr.msk.bf16.mxu1 %vm8985_vm9, %v13503_v44  ;;  %vm9181_vm6 = vmpackc.low %vm2007_vm4, %vm2001_vm14  ;;  %vm1723_vm9 = vcmp.eq.s32.totalorder %v10637_v18, %v10629_v7  ;;  %vm1728_vm14 = vcmp.eq.s32.totalorder %v13647_v42, %v13646_v36  ;;  %vm1741_vm4 = vcmp.eq.s32.totalorder %v10637_v18, %v10648_v25 }
 0x281   :  { %9178 = vmatprep.subr.msk.bf16.mxu0 %vm9177_vm12, %v13503_v44  ;;  %vm8991_vm11 = vmpackc.low %vm2920_vm8, %vm2914_vm2  ;;  %vm1734_vm2 = vcmp.eq.s32.totalorder %v13647_v42, %v10645_v22  ;;  %vm1740_vm8 = vcmp.eq.s32.totalorder %v13647_v42, %v10648_v25 }
 0x282   :  { %vm9183_vm12 = vmpackc.low %vm2006_vm5, %vm2000_vm3  ;;  %vm1747_vm3 = vcmp.eq.s32.totalorder %v10637_v18, %v10659_v34  ;;  %vm1753_vm5 = vcmp.eq.s32.totalorder %v10637_v18, %v10666_v40 }
 0x283   :  { %8988 = vmatpush1.bf16.msk.msra.mxu1 %vm8987_vm7, %v13503_v44  ;;  %vm8993_vm13 = vmpackc.low %vm1729_vm10, %vm1723_vm9  ;;  %vm1735_vm7 = vcmp.eq.s32.totalorder %v10637_v18, %v10645_v22  ;;  %vm1746_vm10 = vcmp.eq.s32.totalorder %v13647_v42, %v10659_v34 }
 0x284   :  { %9180 = vmatpush1.bf16.msk.msra.mxu0 %vm9179_vm0, %v13503_v44  ;;  %8990 = vmatprep.subr.msk.bf16.mxu1 %vm8989_vm1, %v13503_v44  ;;  %vm8995_vm0 = vmpackc.low %vm1728_vm14, %vm1722_vm15 }
 0x285   :  { %9182 = vmatprep.subr.msk.bf16.mxu0 %vm9181_vm6, %v13503_v44  ;;  %vm8997_vm1 = vmpackc.low %vm1741_vm4, %vm1735_vm7  ;;  %vm1758_vm7 = vcmp.eq.s32.totalorder %v13647_v42, %v10687_v48  ;;  %vm1764_vm4 = vcmp.eq.s32.totalorder %v13647_v42, %v10696_v50 }
 0x286   :  { %vm8999_vm6 = vmpackc.low %vm1740_vm8, %vm1734_vm2  ;;  %vm1777_vm2 = vcmp.eq.s32.totalorder %v10637_v18, %v10726_v61 }
 0x287   :  { %8992 = vmatpush1.bf16.msk.msra.mxu1 %vm8991_vm11, %v13503_v44  ;;  %vm9001_vm9 = vmpackc.low %vm1753_vm5, %vm1747_vm3  ;;  %vm1752_vm11 = vcmp.eq.s32.totalorder %v13647_v42, %v10666_v40  ;;  %vm1770_vm3 = vcmp.eq.s32.totalorder %v13647_v42, %v10715_v57  ;;  %vm1776_vm5 = vcmp.eq.s32.totalorder %v13647_v42, %v10726_v61 }
 0x288   :  { %9184 = vmatpush1.bf16.msk.msra.mxu0 %vm9183_vm12, %v13503_v44  ;;  %8994 = vmatprep.subr.msk.bf16.mxu1 %vm8993_vm13, %v13503_v44  ;;  %vm1759_vm12 = vcmp.eq.s32.totalorder %v10637_v18, %v10687_v48  ;;  %vm1765_vm13 = vcmp.eq.s32.totalorder %v10637_v18, %v10696_v50  ;;  %vm9003_vm15 = vmpackc.low %vm1752_vm11, %vm1746_vm10 }
 0x289   :  { %4941 = vmatprep.subr.bf16.mxu0 %v9525_v23  ;;  %vm9005_vm14 = vmpackc.low %vm1765_vm13, %vm1759_vm12  ;;  %v9532_v23 = vld [vmem:[#allocation10 + $0x48] ss:$12 sps:$4 sm:$0xff]   ;;  %vm1782_vm12 = vcmp.eq.s32.totalorder %v13647_v42, %v10734_v35  ;;  %vm1788_vm13 = vcmp.eq.s32.totalorder %v13647_v42, %v10744_v0 }
 0x28a   :  { %3918 = vmatmul.mubr.f32.vlgmr.msra.gmra.mrb[22].mxu1 %v11604_v52  ;;  %vm9007_vm8 = vmpackc.low %vm1764_vm4, %vm1758_vm7  ;;  %v9582_v52 = vld [vmem:[#allocation10 + $0x1cc] ss:$12 sps:$4 sm:$0xff]  }
 0x28b   :  { %4202 = vmatmul.mubr.f32.vlgmr.msra.gmra.mrb[16].mxu0 %v13648_v46  ;;  %8996 = vmatpush1.bf16.msk.msra.mxu1 %vm8995_vm0, %v13503_v44  ;;  %vm1771_vm0 = vcmp.eq.s32.totalorder %v10637_v18, %v10715_v57  ;;  %vm9011_vm10 = vmpackc.low %vm1776_vm5, %vm1770_vm3 }
 0x28c   :  { %3988 = vmatprep.mubr.f32.mxu1 %v11528_v45  ;;  %4942 = vmatpush1.bf16.msra.mxu0 %v9523_v43  ;;  %v9537_v43 = vld [vmem:[#allocation10 + $0x64] ss:$12 sps:$4 sm:$0xff]   ;;  %vm9015_vm7 = vmpackc.low %vm1788_vm13, %vm1782_vm12 }
 0x28d   :  { %4973 = vmatprep.mubr.bf16.mxu0 %v12665_v37  ;;  %8998 = vmatprep.subr.msk.bf16.mxu1 %vm8997_vm1, %v13503_v44  ;;  %vm9009_vm1 = vmpackc.low %vm1777_vm2, %vm1771_vm0  ;;  %vm1794_vm0 = vcmp.eq.s32.totalorder %v13647_v42, %v10771_v16  ;;  %vm1800_vm2 = vcmp.eq.s32.totalorder %v13647_v42, %v10777_v3 }
 0x28e   :  { %4943 = vmatprep.subr.bf16.mxu0 %v9528_v63  ;;  %v9535_v63 = vld [vmem:[#allocation10 + $0x60] ss:$12 sps:$4 sm:$0xff]   ;;  %vm9019_vm3 = vmpackc.low %vm1800_vm2, %vm1794_vm0 }
 0x28f   :  { %9000 = vmatpush1.bf16.msk.msra.mxu1 %vm8999_vm6, %v13503_v44  ;;  %vm1783_vm6 = vcmp.eq.s32.totalorder %v10637_v18, %v10734_v35 }
 0x290   :  { %4944 = vmatpush1.bf16.msra.mxu0 %v9526_v54  ;;  %9002 = vmatprep.subr.msk.bf16.mxu1 %vm9001_vm9, %v13503_v44  ;;  %vm1789_vm9 = vcmp.eq.s32.totalorder %v10637_v18, %v10744_v0  ;;  %v9540_v54 = vld [vmem:[#allocation10 + $0x7c] ss:$12 sps:$4 sm:$0xff]  }
 0x291   :  { %4945 = vmatprep.subr.bf16.mxu0 %v9531_v30  ;;  %vm9013_vm11 = vmpackc.low %vm1789_vm9, %vm1783_vm6  ;;  %v9538_v30 = vld [vmem:[#allocation10 + $0x78] ss:$12 sps:$4 sm:$0xff]   ;;  %vm1806_vm6 = vcmp.eq.s32.totalorder %v13647_v42, %v10786_v19  ;;  %vm1812_vm9 = vcmp.eq.s32.totalorder %v13647_v42, %v13580_v33 }
 0x292   :  { %vm9023_vm12 = vmpackc.low %vm1812_vm9, %vm1806_vm6 }
 0x293   :  { %9004 = vmatpush1.bf16.msk.msra.mxu1 %vm9003_vm15, %v13503_v44  ;;  %vm1795_vm15 = vcmp.eq.s32.totalorder %v10637_v18, %v10771_v16 }
 0x294   :  { %4946 = vmatpush1.bf16.msra.mxu0 %v9529_v26  ;;  %9006 = vmatprep.subr.msk.bf16.mxu1 %vm9005_vm14, %v13503_v44  ;;  %vm1801_vm14 = vcmp.eq.s32.totalorder %v10637_v18, %v10777_v3  ;;  %v9543_v26 = vld [vmem:[#allocation10 + $0x94] ss:$12 sps:$4 sm:$0xff]  }
 0x295   :  { %4947 = vmatprep.subr.bf16.mxu0 %v9534_v58  ;;  %vm9017_vm4 = vmpackc.low %vm1801_vm14, %vm1795_vm15  ;;  %v9541_v58 = vld [vmem:[#allocation10 + $0x90] ss:$12 sps:$4 sm:$0xff]   ;;  %vm1818_vm15 = vcmp.eq.s32.totalorder %v13647_v42, %v13581_v39  ;;  %vm1824_vm14 = vcmp.eq.s32.totalorder %v13647_v42, %v13582_v47 }
 0x296   :  { %vm9027_vm0 = vmpackc.low %vm1824_vm14, %vm1818_vm15 }
 0x297   :  { %9008 = vmatpush1.bf16.msk.msra.mxu1 %vm9007_vm8, %v13503_v44  ;;  %vm1807_vm8 = vcmp.eq.s32.totalorder %v10637_v18, %v10786_v19 }
 0x298   :  { %4948 = vmatpush1.bf16.msra.mxu0 %v9532_v23  ;;  %9010 = vmatprep.subr.msk.bf16.mxu1 %vm9009_vm1, %v13503_v44  ;;  %vm1813_vm1 = vcmp.eq.s32.totalorder %v10637_v18, %v13580_v33  ;;  %v9546_v23 = vld [vmem:[#allocation10 + $0xac] ss:$12 sps:$4 sm:$0xff]  }
 0x299   :  { %4949 = vmatprep.subr.bf16.mxu0 %v9537_v43  ;;  %vm9021_vm5 = vmpackc.low %vm1813_vm1, %vm1807_vm8  ;;  %v9544_v43 = vld [vmem:[#allocation10 + $0xa8] ss:$12 sps:$4 sm:$0xff]   ;;  %vm1830_vm8 = vcmp.eq.s32.totalorder %v13647_v42, %v13586_v59  ;;  %vm1836_vm1 = vcmp.eq.s32.totalorder %v13647_v42, %v13587_v62 }
 0x29a   :  { %vm9031_vm6 = vmpackc.low %vm1836_vm1, %vm1830_vm8 }
 0x29b   :  { %9012 = vmatpush1.bf16.msk.msra.mxu1 %vm9011_vm10, %v13503_v44  ;;  %vm1819_vm10 = vcmp.eq.s32.totalorder %v10637_v18, %v13581_v39 }
 0x29c   :  { %4950 = vmatpush1.bf16.msra.mxu0 %v9535_v63  ;;  %9014 = vmatprep.subr.msk.bf16.mxu1 %vm9013_vm11, %v13503_v44  ;;  %vm1825_vm11 = vcmp.eq.s32.totalorder %v10637_v18, %v13582_v47  ;;  %v9549_v63 = vld [vmem:[#allocation10 + $0xc4] ss:$12 sps:$4 sm:$0xff]  }
 0x29d   :  { %4951 = vmatprep.subr.bf16.mxu0 %v9540_v54  ;;  %vm9025_vm13 = vmpackc.low %vm1825_vm11, %vm1819_vm10  ;;  %v9547_v54 = vld [vmem:[#allocation10 + $0xc0] ss:$12 sps:$4 sm:$0xff]   ;;  %vm1842_vm10 = vcmp.eq.s32.totalorder %v13647_v42, %v13592_v11  ;;  %vm1848_vm11 = vcmp.eq.s32.totalorder %v13647_v42, %v13593_v13 }
 0x29e   :  { %vm9035_vm15 = vmpackc.low %vm1848_vm11, %vm1842_vm10 }
 0x29f   :  { %9016 = vmatpush1.bf16.msk.msra.mxu1 %vm9015_vm7, %v13503_v44  ;;  %vm1831_vm7 = vcmp.eq.s32.totalorder %v10637_v18, %v13586_v59 }
 0x2a0   :  { %4952 = vmatpush1.bf16.msra.mxu0 %v9538_v30  ;;  %9018 = vmatprep.subr.msk.bf16.mxu1 %vm9017_vm4, %v13503_v44  ;;  %vm1837_vm4 = vcmp.eq.s32.totalorder %v10637_v18, %v13587_v62  ;;  %v9552_v30 = vld [vmem:[#allocation10 + $0xdc] ss:$12 sps:$4 sm:$0xff]  }
 0x2a1   :  { %4953 = vmatprep.subr.bf16.mxu0 %v9543_v26  ;;  %vm9029_vm2 = vmpackc.low %vm1837_vm4, %vm1831_vm7  ;;  %v9550_v26 = vld [vmem:[#allocation10 + $0xd8] ss:$12 sps:$4 sm:$0xff]   ;;  %vm1854_vm7 = vcmp.eq.s32.totalorder %v13647_v42, %v13596_v5  ;;  %vm1860_vm4 = vcmp.eq.s32.totalorder %v13647_v42, %v13597_v17 }
 0x2a2   :  { %vm9039_vm8 = vmpackc.low %vm1860_vm4, %vm1854_vm7 }
 0x2a3   :  { %9020 = vmatpush1.bf16.msk.msra.mxu1 %vm9019_vm3, %v13503_v44  ;;  %vm1843_vm3 = vcmp.eq.s32.totalorder %v10637_v18, %v13592_v11 }
 0x2a4   :  { %4954 = vmatpush1.bf16.msra.mxu0 %v9541_v58  ;;  %9022 = vmatprep.subr.msk.bf16.mxu1 %vm9021_vm5, %v13503_v44  ;;  %vm1849_vm5 = vcmp.eq.s32.totalorder %v10637_v18, %v13593_v13  ;;  %v9555_v58 = vld [vmem:[#allocation10 + $0xf4] ss:$12 sps:$4 sm:$0xff]  }
 0x2a5   :  { %4955 = vmatprep.subr.bf16.mxu0 %v9546_v23  ;;  %vm9033_vm9 = vmpackc.low %vm1849_vm5, %vm1843_vm3  ;;  %v9553_v23 = vld [vmem:[#allocation10 + $0xf0] ss:$12 sps:$4 sm:$0xff]   ;;  %vm1866_vm3 = vcmp.eq.s32.totalorder %v13647_v42, %v13600_v9  ;;  %vm1872_vm5 = vcmp.eq.s32.totalorder %v13647_v42, %v13601_v49 }
 0x2a6   :  { %vm9043_vm10 = vmpackc.low %vm1872_vm5, %vm1866_vm3 }
 0x2a7   :  { %9024 = vmatpush1.bf16.msk.msra.mxu1 %vm9023_vm12, %v13503_v44  ;;  %vm1855_vm12 = vcmp.eq.s32.totalorder %v10637_v18, %v13596_v5 }
 0x2a8   :  { %4956 = vmatpush1.bf16.msra.mxu0 %v9544_v43  ;;  %9026 = vmatprep.subr.msk.bf16.mxu1 %vm9025_vm13, %v13503_v44  ;;  %vm1861_vm13 = vcmp.eq.s32.totalorder %v10637_v18, %v13597_v17  ;;  %v9558_v43 = vld [vmem:[#allocation10 + $0x10c] ss:$12 sps:$4 sm:$0xff]  }
 0x2a9   :  { %4957 = vmatprep.subr.bf16.mxu0 %v9549_v63  ;;  %vm9037_vm14 = vmpackc.low %vm1861_vm13, %vm1855_vm12  ;;  %v9556_v63 = vld [vmem:[#allocation10 + $0x108] ss:$12 sps:$4 sm:$0xff]   ;;  %vm1878_vm12 = vcmp.eq.s32.totalorder %v13647_v42, %v13604_v10  ;;  %vm1884_vm13 = vcmp.eq.s32.totalorder %v13647_v42, %v13605_v14 }
 0x2aa   :  { %vm9047_vm7 = vmpackc.low %vm1884_vm13, %vm1878_vm12 }
 0x2ab   :  { %9028 = vmatpush1.bf16.msk.msra.mxu1 %vm9027_vm0, %v13503_v44  ;;  %vm1867_vm0 = vcmp.eq.s32.totalorder %v10637_v18, %v13600_v9 }
 0x2ac   :  { %4958 = vmatpush1.bf16.msra.mxu0 %v9547_v54  ;;  %9030 = vmatprep.subr.msk.bf16.mxu1 %vm9029_vm2, %v13503_v44  ;;  %vm1873_vm2 = vcmp.eq.s32.totalorder %v10637_v18, %v13601_v49  ;;  %v9561_v54 = vld [vmem:[#allocation10 + $0x124] ss:$12 sps:$4 sm:$0xff]  }
 0x2ad   :  { %4959 = vmatprep.subr.bf16.mxu0 %v9552_v30  ;;  %vm9041_vm1 = vmpackc.low %vm1873_vm2, %vm1867_vm0  ;;  %v9559_v30 = vld [vmem:[#allocation10 + $0x120] ss:$12 sps:$4 sm:$0xff]   ;;  %vm1890_vm0 = vcmp.eq.s32.totalorder %v13647_v42, %v13608_v53  ;;  %vm1896_vm2 = vcmp.eq.s32.totalorder %v13647_v42, %v13609_v1 }
 0x2ae   :  { %vm9051_vm3 = vmpackc.low %vm1896_vm2, %vm1890_vm0 }
 0x2af   :  { %9032 = vmatpush1.bf16.msk.msra.mxu1 %vm9031_vm6, %v13503_v44  ;;  %vm1879_vm6 = vcmp.eq.s32.totalorder %v10637_v18, %v13604_v10 }
 0x2b0   :  { %4960 = vmatpush1.bf16.msra.mxu0 %v9550_v26  ;;  %9034 = vmatprep.subr.msk.bf16.mxu1 %vm9033_vm9, %v13503_v44  ;;  %vm1885_vm9 = vcmp.eq.s32.totalorder %v10637_v18, %v13605_v14  ;;  %v9564_v26 = vld [vmem:[#allocation10 + $0x13c] ss:$12 sps:$4 sm:$0xff]  }
 0x2b1   :  { %4961 = vmatprep.subr.bf16.mxu0 %v9555_v58  ;;  %vm9045_vm11 = vmpackc.low %vm1885_vm9, %vm1879_vm6  ;;  %v9562_v58 = vld [vmem:[#allocation10 + $0x138] ss:$12 sps:$4 sm:$0xff]   ;;  %vm1902_vm6 = vcmp.eq.s32.totalorder %v13647_v42, %v13612_v20 }
 0x2b3   :  { %9036 = vmatpush1.bf16.msk.msra.mxu1 %vm9035_vm15, %v13503_v44  ;;  %vm1891_vm15 = vcmp.eq.s32.totalorder %v10637_v18, %v13608_v53 }
 0x2b4   :  { %4962 = vmatpush1.bf16.msra.mxu0 %v9553_v23  ;;  %9038 = vmatprep.subr.msk.bf16.mxu1 %vm9037_vm14, %v13503_v44  ;;  %vm1897_vm14 = vcmp.eq.s32.totalorder %v10637_v18, %v13609_v1  ;;  %v9567_v23 = vld [vmem:[#allocation10 + $0x154] ss:$12 sps:$4 sm:$0xff]  }
 0x2b5   :  { %4963 = vmatprep.subr.bf16.mxu0 %v9558_v43  ;;  %vm9049_vm4 = vmpackc.low %vm1897_vm14, %vm1891_vm15  ;;  %v13649_v43 = vld [vmem:[#allocation56_spill] sm:$0xff] }
 0x2b6   :  { %vm1908_vm9 = vcmp.eq.s32.totalorder %v13647_v42, %v13649_v43 }
 0x2b7   :  { %9040 = vmatpush1.bf16.msk.msra.mxu1 %vm9039_vm8, %v13503_v44  ;;  %vm1903_vm8 = vcmp.eq.s32.totalorder %v10637_v18, %v13612_v20  ;;  %vm9055_vm12 = vmpackc.low %vm1908_vm9, %vm1902_vm6 }
 0x2b8   :  { %4964 = vmatpush1.bf16.msra.mxu0 %v9556_v63  ;;  %9042 = vmatprep.subr.msk.bf16.mxu1 %vm9041_vm1, %v13503_v44  ;;  %vm1909_vm1 = vcmp.eq.s32.totalorder %v10637_v18, %v13649_v43  ;;  %v9565_v63 = vld [vmem:[#allocation10 + $0x150] ss:$12 sps:$4 sm:$0xff]  }
 0x2b9   :  { %4965 = vmatprep.subr.bf16.mxu0 %v9561_v54  ;;  %vm9053_vm5 = vmpackc.low %vm1909_vm1, %vm1903_vm8  ;;  %v9570_v54 = vld [vmem:[#allocation10 + $0x16c] ss:$12 sps:$4 sm:$0xff]   ;;  %vm1926_vm8 = vcmp.eq.s32.totalorder %v13647_v42, %v13626_v56  ;;  %vm1932_vm1 = vcmp.eq.s32.totalorder %v13647_v42, %v13627_v28 }
 0x2ba   :  { %vm9063_vm6 = vmpackc.low %vm1932_vm1, %vm1926_vm8 }
 0x2bb   :  { %9044 = vmatpush1.bf16.msk.msra.mxu1 %vm9043_vm10, %v13503_v44 }
 0x2bc   :  { %4966 = vmatpush1.bf16.msra.mxu0 %v9559_v30  ;;  %9046 = vmatprep.subr.msk.bf16.mxu1 %vm9045_vm11, %v13503_v44  ;;  %v13650_v30 = vld [vmem:[#allocation59_spill] sm:$0xff] }
 0x2bd   :  { %4967 = vmatprep.subr.bf16.mxu0 %v9564_v26  ;;  %vm1915_vm10 = vcmp.eq.s32.totalorder %v10637_v18, %v13650_v30  ;;  %v13651_v26 = vld [vmem:[#allocation60_spill] sm:$0xff]  ;;  %vm1914_vm15 = vcmp.eq.s32.totalorder %v13647_v42, %v13650_v30 }
 0x2be   :  { %vm1921_vm11 = vcmp.eq.s32.totalorder %v10637_v18, %v13651_v26  ;;  %vm1920_vm14 = vcmp.eq.s32.totalorder %v13647_v42, %v13651_v26 }
 0x2bf   :  { %9048 = vmatpush1.bf16.msk.msra.mxu1 %vm9047_vm7, %v13503_v44  ;;  %vm9057_vm13 = vmpackc.low %vm1921_vm11, %vm1915_vm10  ;;  %vm1927_vm7 = vcmp.eq.s32.totalorder %v10637_v18, %v13626_v56  ;;  %vm1938_vm10 = vcmp.eq.s32.totalorder %v13647_v42, %v13634_v38  ;;  %vm1944_vm11 = vcmp.eq.s32.totalorder %v13647_v42, %v13635_v21 }
 0x2c0   :  { %4968 = vmatpush1.bf16.msra.mxu0 %v9562_v58  ;;  %9050 = vmatprep.subr.msk.bf16.mxu1 %vm9049_vm4, %v13503_v44  ;;  %v9568_v58 = vld [vmem:[#allocation10 + $0x168] ss:$12 sps:$4 sm:$0xff]   ;;  %vm1933_vm4 = vcmp.eq.s32.totalorder %v10637_v18, %v13627_v28  ;;  %vm9059_vm0 = vmpackc.low %vm1920_vm14, %vm1914_vm15 }
 0x2c1   :  { %4969 = vmatprep.subr.bf16.mxu0 %v9567_v23  ;;  %v9573_v23 = vld [vmem:[#allocation10 + $0x184] ss:$12 sps:$4 sm:$0xff]   ;;  %vm9061_vm2 = vmpackc.low %vm1933_vm4, %vm1927_vm7  ;;  %vm1950_vm7 = vcmp.eq.s32.totalorder %v13647_v42, %v13639_v24  ;;  %vm1956_vm4 = vcmp.eq.s32.totalorder %v13647_v42, %v13640_v4 }
 0x2c2   :  { %vm9067_vm15 = vmpackc.low %vm1944_vm11, %vm1938_vm10 }
 0x2c3   :  { %9052 = vmatpush1.bf16.msk.msra.mxu1 %vm9051_vm3, %v13503_v44  ;;  %vm1939_vm3 = vcmp.eq.s32.totalorder %v10637_v18, %v13634_v38  ;;  %vm9071_vm8 = vmpackc.low %vm1956_vm4, %vm1950_vm7 }
 0x2c4   :  { %4970 = vmatpush1.bf16.msra.mxu0 %v9565_v63  ;;  %9054 = vmatprep.subr.msk.bf16.mxu1 %vm9053_vm5, %v13503_v44  ;;  %v9571_v63 = vld [vmem:[#allocation10 + $0x180] ss:$12 sps:$4 sm:$0xff]   ;;  %vm1945_vm5 = vcmp.eq.s32.totalorder %v10637_v18, %v13635_v21 }
 0x2c5   :  { %4971 = vmatprep.subr.bf16.mxu0 %v9570_v54  ;;  %v12822_v54 = vpack.c.bf16 %v13631_v15, %v13631_v15  ;;  %vm9065_vm9 = vmpackc.low %vm1945_vm5, %vm1939_vm3  ;;  %vm1962_vm3 = vcmp.eq.s32.totalorder %v13647_v42, %v13641_v27  ;;  %vm1968_vm5 = vcmp.eq.s32.totalorder %v13647_v42, %v13642_v6 }
 0x2c6   :  { %vm9075_vm10 = vmpackc.low %vm1968_vm5, %vm1962_vm3 }
 0x2c7   :  { %9056 = vmatpush1.bf16.msk.msra.mxu1 %vm9055_vm12, %v13503_v44  ;;  %vm1951_vm12 = vcmp.eq.s32.totalorder %v10637_v18, %v13639_v24 }
 0x2c8   :  { %4972 = vmatpush1.bf16.msra.mxu0 %v9568_v58  ;;  %9058 = vmatprep.subr.msk.bf16.mxu1 %vm9057_vm13, %v13503_v44  ;;  %v9574_v58 = vld [vmem:[#allocation10 + $0x198] ss:$12 sps:$4 sm:$0xff]   ;;  %vm1957_vm13 = vcmp.eq.s32.totalorder %v10637_v18, %v13640_v4 }
 0x2c9   :  { %4982 = vmatprep.subr.bf16.mxu0 %v9573_v23  ;;  %v9579_v23 = vld [vmem:[#allocation10 + $0x1b4] ss:$12 sps:$4 sm:$0xff]   ;;  %vm9069_vm14 = vmpackc.low %vm1957_vm13, %vm1951_vm12  ;;  %vm1974_vm12 = vcmp.eq.s32.totalorder %v13647_v42, %v13643_v29  ;;  %vm1980_vm13 = vcmp.eq.s32.totalorder %v13647_v42, %v13644_v51 }
 0x2ca   :  { %3989 = vmatmul.mubr.f32.vlgmr.msra.gmra.mrb[20].mxu1 %v13631_v15  ;;  %vm9079_vm7 = vmpackc.low %vm1980_vm13, %vm1974_vm12 }
 0x2cb   :  { %4974 = vmatmul.mubr.bf16.vlgmr.msra.gmra.mrb[20].mxu0 %v12822_v54  ;;  %9060 = vmatpush1.bf16.msk.msra.mxu1 %vm9059_vm0, %v13503_v44  ;;  %vm1963_vm0 = vcmp.eq.s32.totalorder %v10637_v18, %v13641_v27 }
 0x2cc   :  { %4983 = vmatpush1.bf16.msra.mxu0 %v9571_v63  ;;  %9062 = vmatprep.subr.msk.bf16.mxu1 %vm9061_vm2, %v13503_v44  ;;  %v13652_v63 = vmov 0   ;;  %vm1969_vm2 = vcmp.eq.s32.totalorder %v10637_v18, %v13642_v6 }
 0x2cd   :  { %4984 = vmatprep.subr.bf16.mxu0 %v9576_v8  ;;  %4059 = vmatprep.mubr.f32.mxu1 %v13638_v32  ;;  %v9577_v8 = vld [vmem:[#allocation10 + $0x1b0] ss:$12 sps:$4 sm:$0xff]   ;;  %vm9073_vm1 = vmpackc.low %vm1969_vm2, %vm1963_vm0  ;;  %vm1986_vm0 = vcmp.eq.s32.totalorder %v13647_v42, %v11816_v60  ;;  %vm1992_vm2 = vcmp.eq.s32.totalorder %v13647_v42, %v11818_v31 }
 0x2ce   :  { %5014 = vmatprep.mubr.bf16.mxu0 %v13652_v63  ;;  %vm9083_vm3 = vmpackc.low %vm1992_vm2, %vm1986_vm0  ;;  %vm1738_vm2 = vcmp.eq.s32.totalorder %v12007_v2, %v10645_v22 }
 0x2cf   :  { %9064 = vmatpush1.bf16.msk.msra.mxu1 %vm9063_vm6, %v13503_v44  ;;  %vm1975_vm6 = vcmp.eq.s32.totalorder %v10637_v18, %v13643_v29 }
 0x2d0   :  { %4985 = vmatpush1.bf16.msra.mxu0 %v9574_v58  ;;  %9066 = vmatprep.subr.msk.bf16.mxu1 %vm9065_vm9, %v13503_v44  ;;  %v9580_v58 = vld [vmem:[#allocation10 + $0x1c8] ss:$12 sps:$4 sm:$0xff]   ;;  %vm1981_vm9 = vcmp.eq.s32.totalorder %v10637_v18, %v13644_v51 }
 0x2d1   :  { %4986 = vmatprep.subr.bf16.mxu0 %v9579_v23  ;;  %v9585_v23 = vld [vmem:[#allocation10 + $0x1e4] ss:$12 sps:$4 sm:$0xff]   ;;  %vm9077_vm11 = vmpackc.low %vm1981_vm9, %vm1975_vm6  ;;  %vm1998_vm6 = vcmp.eq.s32.totalorder %v13647_v42, %v11884_v41  ;;  %vm2004_vm9 = vcmp.eq.s32.totalorder %v13647_v42, %v13645_v12  ;;  %v9596_v42 = vld [vmem:[#allocation10 + $0x8] ss:$12 sps:$4 sm:$0xff]  }
 0x2d2   :  { %vm9087_vm12 = vmpackc.low %vm2004_vm9, %vm1998_vm6 }
 0x2d3   :  { %9068 = vmatpush1.bf16.msk.msra.mxu1 %vm9067_vm15, %v13503_v44  ;;  %vm1987_vm15 = vcmp.eq.s32.totalorder %v10637_v18, %v11816_v60 }
 0x2d4   :  { %4987 = vmatpush1.bf16.msra.mxu0 %v9577_v8  ;;  %9070 = vmatprep.subr.msk.bf16.mxu1 %vm9069_vm14, %v13503_v44  ;;  %v9588_v8 = vld [vmem:[#allocation10 + $0x1fc] ss:$12 sps:$4 sm:$0xff]   ;;  %vm1993_vm14 = vcmp.eq.s32.totalorder %v10637_v18, %v11818_v31 }
 0x2d5   :  { %4988 = vmatprep.subr.bf16.mxu0 %v9582_v52  ;;  %v9583_v52 = vld [vmem:[#allocation10 + $0x1e0] ss:$12 sps:$4 sm:$0xff]   ;;  %vm9081_vm4 = vmpackc.low %vm1993_vm14, %vm1987_vm15  ;;  %vm1726_vm15 = vcmp.eq.s32.totalorder %v12007_v2, %v10629_v7  ;;  %vm1732_vm14 = vcmp.eq.s32.totalorder %v12007_v2, %v13646_v36 }
 0x2d6   :  { %vm9187_vm0 = vmpackc.low %vm1732_vm14, %vm1726_vm15 }
 0x2d7   :  { %9072 = vmatpush1.bf16.msk.msra.mxu1 %vm9071_vm8, %v13503_v44  ;;  %vm1999_vm8 = vcmp.eq.s32.totalorder %v10637_v18, %v11884_v41 }
 0x2d8   :  { %4989 = vmatpush1.bf16.msra.mxu0 %v9580_v58  ;;  %9074 = vmatprep.subr.msk.bf16.mxu1 %vm9073_vm1, %v13503_v44  ;;  %v9586_v58 = vld [vmem:[#allocation10 + $0x1f8] ss:$12 sps:$4 sm:$0xff]   ;;  %vm2005_vm1 = vcmp.eq.s32.totalorder %v10637_v18, %v13645_v12  ;;  %v9592_v18 = vld [vmem:[#allocation10 + $0x228] ss:$12 sps:$4 sm:$0xff]  }
 0x2d9   :  { %4990 = vmatprep.subr.bf16.mxu0 %v9585_v23  ;;  %v9591_v23 = vld [vmem:[#allocation10 + $0x214] ss:$12 sps:$4 sm:$0xff]   ;;  %vm9085_vm5 = vmpackc.low %vm2005_vm1, %vm1999_vm8  ;;  %vm1744_vm8 = vcmp.eq.s32.totalorder %v12007_v2, %v10648_v25 }
 0x2da   :  { %vm9191_vm6 = vmpackc.low %vm1744_vm8, %vm1738_vm2  ;;  %vm1781_vm2 = vcmp.eq.s32.totalorder %v11976_v55, %v10726_v61 }
 0x2db   :  { %9076 = vmatpush1.bf16.msk.msra.mxu1 %vm9075_vm10, %v13503_v44  ;;  %vm1727_vm10 = vcmp.eq.s32.totalorder %v11976_v55, %v10629_v7  ;;  %v9597_v7 = vld [vmem:[#allocation10 + $0xe0] ss:$12 sps:$4 sm:$0xff]  }
 0x2dc   :  { %4991 = vmatpush1.bf16.msra.mxu0 %v9583_v52  ;;  %9078 = vmatprep.subr.msk.bf16.mxu1 %vm9077_vm11, %v13503_v44  ;;  %v9589_v52 = vld [vmem:[#allocation10 + $0x210] ss:$12 sps:$4 sm:$0xff]   ;;  %vm1733_vm11 = vcmp.eq.s32.totalorder %v11976_v55, %v13646_v36  ;;  %v9603_v36 = vld [vmem:[#allocation10 + $0x128] ss:$12 sps:$4 sm:$0xff]  }
 0x2dd   :  { %4992 = vmatprep.subr.bf16.mxu0 %v9588_v8  ;;  %v9594_v8 = vld [vmem:[#allocation10 + $0x22c] ss:$12 sps:$4 sm:$0xff]   ;;  %vm9185_vm13 = vmpackc.low %vm1733_vm11, %vm1727_vm10  ;;  %vm1750_vm10 = vcmp.eq.s32.totalorder %v12007_v2, %v10659_v34  ;;  %vm1756_vm11 = vcmp.eq.s32.totalorder %v12007_v2, %v10666_v40 }
 0x2de   :  { %vm9195_vm15 = vmpackc.low %vm1756_vm11, %vm1750_vm10 }
 0x2df   :  { %9080 = vmatpush1.bf16.msk.msra.mxu1 %vm9079_vm7, %v13503_v44  ;;  %vm1739_vm7 = vcmp.eq.s32.totalorder %v11976_v55, %v10645_v22  ;;  %v9598_v22 = vld [vmem:[#allocation10 + $0x20] ss:$12 sps:$4 sm:$0xff]  }
 0x2e0   :  { %4993 = vmatpush1.bf16.msra.mxu0 %v9586_v58  ;;  %9082 = vmatprep.subr.msk.bf16.mxu1 %vm9081_vm4, %v13503_v44  ;;  %v9595_v58 = vld [vmem:[#allocation10 + $0xc8] ss:$12 sps:$4 sm:$0xff]   ;;  %vm1745_vm4 = vcmp.eq.s32.totalorder %v11976_v55, %v10648_v25  ;;  %v9599_v25 = vld [vmem:[#allocation10 + $0xf8] ss:$12 sps:$4 sm:$0xff]  }
 0x2e1   :  { %4994 = vmatprep.subr.bf16.mxu0 %v9591_v23  ;;  %v12910_v23 = vpack.c.bf16 %v13648_v46, %v13648_v46  ;;  %vm9189_vm1 = vmpackc.low %vm1745_vm4, %vm1739_vm7  ;;  %vm1762_vm7 = vcmp.eq.s32.totalorder %v12007_v2, %v10687_v48  ;;  %vm1768_vm4 = vcmp.eq.s32.totalorder %v12007_v2, %v10696_v50 }
 0x2e2   :  { %vm9199_vm8 = vmpackc.low %vm1768_vm4, %vm1762_vm7 }
 0x2e3   :  { %9084 = vmatpush1.bf16.msk.msra.mxu1 %vm9083_vm3, %v13503_v44  ;;  %vm1751_vm3 = vcmp.eq.s32.totalorder %v11976_v55, %v10659_v34  ;;  %v9601_v34 = vld [vmem:[#allocation10 + $0x110] ss:$12 sps:$4 sm:$0xff]  }
 0x2e4   :  { %4995 = vmatpush1.bf16.msra.mxu0 %v9589_v52  ;;  %9086 = vmatprep.subr.msk.bf16.mxu1 %vm9085_vm5, %v13503_v44  ;;  %vm1757_vm5 = vcmp.eq.s32.totalorder %v11976_v55, %v10666_v40  ;;  %v9602_v40 = vld [vmem:[#allocation10 + $0x50] ss:$12 sps:$4 sm:$0xff]  }
 0x2e5   :  { %4996 = vmatprep.subr.bf16.mxu0 %v9594_v8  ;;  %vm9193_vm9 = vmpackc.low %vm1757_vm5, %vm1751_vm3  ;;  %vm1774_vm3 = vcmp.eq.s32.totalorder %v12007_v2, %v10715_v57  ;;  %vm1780_vm5 = vcmp.eq.s32.totalorder %v12007_v2, %v10726_v61  ;;  %v9607_v61 = vld [vmem:[#allocation10 + $0x158] ss:$12 sps:$4 sm:$0xff]  }
 0x2e6   :  { %vm9203_vm10 = vmpackc.low %vm1780_vm5, %vm1774_vm3  ;;  %v9672_v52 = vld [vmem:[#allocation8 + $0x1e4] ss:$12 sps:$4 sm:$0xff]  }
 0x2e7   :  { %9088 = vmatpush1.bf16.msk.msra.mxu1 %vm9087_vm12, %v13503_v44  ;;  %vm1763_vm12 = vcmp.eq.s32.totalorder %v11976_v55, %v10687_v48  ;;  %v9604_v48 = vld [vmem:[#allocation10 + $0x68] ss:$12 sps:$4 sm:$0xff]   ;;  %v9669_v8 = vld [vmem:[#allocation8 + $0x124] ss:$12 sps:$4 sm:$0xff]  }
 0x2e8   :  { %4997 = vmatpush1.bf16.msra.mxu0 %v9592_v18  ;;  %9186 = vmatprep.subr.msk.bf16.mxu1 %vm9185_vm13, %v13503_v44  ;;  %vm1769_vm13 = vcmp.eq.s32.totalorder %v11976_v55, %v10696_v50  ;;  %v9605_v50 = vld [vmem:[#allocation10 + $0x140] ss:$12 sps:$4 sm:$0xff]  }
 0x2e9   :  { %8412 = vmatprep.subr.bf16.mxu0 %v9595_v58  ;;  %vm9197_vm14 = vmpackc.low %vm1769_vm13, %vm1763_vm12  ;;  %vm1786_vm12 = vcmp.eq.s32.totalorder %v12007_v2, %v10734_v35  ;;  %vm1792_vm13 = vcmp.eq.s32.totalorder %v12007_v2, %v10744_v0  ;;  %v9670_v18 = vld [vmem:[#allocation8 + $0x1e0] ss:$12 sps:$4 sm:$0xff]  }
 0x2ea   :  { %4060 = vmatmul.mubr.f32.vlgmr.msra.gmra.mrb[20].mxu1 %v13648_v46  ;;  %vm9207_vm7 = vmpackc.low %vm1792_vm13, %vm1786_vm12  ;;  %v9667_v58 = vld [vmem:[#allocation8 + $0x120] ss:$12 sps:$4 sm:$0xff]  }
 0x2eb   :  { %5015 = vmatmul.mubr.bf16.vlgmr.msra.gmra.mrb[24].mxu0 %v12910_v23  ;;  %9188 = vmatpush1.bf16.msk.msra.mxu1 %vm9187_vm0, %v13503_v44  ;;  %vm1775_vm0 = vcmp.eq.s32.totalorder %v11976_v55, %v10715_v57  ;;  %v9606_v57 = vld [vmem:[#allocation10 + $0x80] ss:$12 sps:$4 sm:$0xff]  }
 0x2ec   :  { %4272 = vmatprep.mubr.f32.mxu1 %v11528_v45  ;;  %8413 = vmatpush3.bf16.msra.mxu0 %v9596_v42  ;;  %v9600_v45 = vld [vmem:[#allocation10 + $0x38] ss:$12 sps:$4 sm:$0xff]   ;;  %v9678_v42 = vld [vmem:[#allocation8 + $0x1fc] ss:$12 sps:$4 sm:$0xff]  }
 0x2ed   :  { %5055 = vmatprep.mubr.bf16.mxu0 %v12665_v37  ;;  %9190 = vmatprep.subr.msk.bf16.mxu1 %vm9189_vm1, %v13503_v44  ;;  %vm9201_vm1 = vmpackc.low %vm1781_vm2, %vm1775_vm0  ;;  %vm1798_vm0 = vcmp.eq.s32.totalorder %v12007_v2, %v10771_v16  ;;  %vm1804_vm2 = vcmp.eq.s32.totalorder %v12007_v2, %v10777_v3  ;;  %v9657_v37 = vld [vmem:[#allocation8 + $0xf4] ss:$12 sps:$4 sm:$0xff]  }
 0x2ee   :  { %8414 = vmatprep.subr.bf16.mxu0 %v9597_v7  ;;  %vm9211_vm3 = vmpackc.low %vm1804_vm2, %vm1798_vm0  ;;  %v9676_v7 = vld [vmem:[#allocation8 + $0x1f8] ss:$12 sps:$4 sm:$0xff]  }
 0x2ef   :  { %9192 = vmatpush1.bf16.msk.msra.mxu1 %vm9191_vm6, %v13503_v44  ;;  %vm1787_vm6 = vcmp.eq.s32.totalorder %v11976_v55, %v10734_v35  ;;  %v9608_v35 = vld [vmem:[#allocation10 + $0x98] ss:$12 sps:$4 sm:$0xff]  }
 0x2f0   :  { %8415 = vmatpush3.bf16.msra.mxu0 %v9598_v22  ;;  %9194 = vmatprep.subr.msk.bf16.mxu1 %vm9193_vm9, %v13503_v44  ;;  %vm1793_vm9 = vcmp.eq.s32.totalorder %v11976_v55, %v10744_v0  ;;  %v9609_v0 = vld [vmem:[#allocation10 + $0x170] ss:$12 sps:$4 sm:$0xff]   ;;  %v9673_v22 = vld [vmem:[#allocation8 + $0x138] ss:$12 sps:$4 sm:$0xff]  }
 0x2f1   :  { %8416 = vmatprep.subr.bf16.mxu0 %v9599_v25  ;;  %vm9205_vm11 = vmpackc.low %vm1793_vm9, %vm1787_vm6  ;;  %vm1810_vm6 = vcmp.eq.s32.totalorder %v12007_v2, %v10786_v19  ;;  %vm1816_vm9 = vcmp.eq.s32.totalorder %v12007_v2, %v13580_v33  ;;  %v9684_v25 = vld [vmem:[#allocation8 + $0x214] ss:$12 sps:$4 sm:$0xff]  }
 0x2f2   :  { %vm9215_vm12 = vmpackc.low %vm1816_vm9, %vm1810_vm6 }
 0x2f3   :  { %9196 = vmatpush1.bf16.msk.msra.mxu1 %vm9195_vm15, %v13503_v44  ;;  %vm1799_vm15 = vcmp.eq.s32.totalorder %v11976_v55, %v10771_v16  ;;  %v9610_v16 = vld [vmem:[#allocation10 + $0xb0] ss:$12 sps:$4 sm:$0xff]  }
 0x2f4   :  { %8417 = vmatpush3.bf16.msra.mxu0 %v9600_v45  ;;  %9198 = vmatprep.subr.msk.bf16.mxu1 %vm9197_vm14, %v13503_v44  ;;  %vm1805_vm14 = vcmp.eq.s32.totalorder %v11976_v55, %v10777_v3  ;;  %v9611_v3 = vld [vmem:[#allocation10 + $0x188] ss:$12 sps:$4 sm:$0xff]  }
 0x2f5   :  { %8418 = vmatprep.subr.bf16.mxu0 %v9601_v34  ;;  %vm9209_vm4 = vmpackc.low %vm1805_vm14, %vm1799_vm15  ;;  %vm1822_vm15 = vcmp.eq.s32.totalorder %v12007_v2, %v13581_v39  ;;  %vm1828_vm14 = vcmp.eq.s32.totalorder %v12007_v2, %v13582_v47  ;;  %v9681_v45 = vld [vmem:[#allocation8 + $0x154] ss:$12 sps:$4 sm:$0xff]  }
 0x2f6   :  { %vm9219_vm0 = vmpackc.low %vm1828_vm14, %vm1822_vm15  ;;  %vm1865_vm15 = vcmp.eq.s32.totalorder %v11976_v55, %v13597_v17 }
 0x2f7   :  { %9200 = vmatpush1.bf16.msk.msra.mxu1 %vm9199_vm8, %v13503_v44  ;;  %vm1811_vm8 = vcmp.eq.s32.totalorder %v11976_v55, %v10786_v19  ;;  %v9612_v19 = vld [vmem:[#allocation10 + $0x1a0] ss:$12 sps:$4 sm:$0xff]  }
 0x2f8   :  { %8419 = vmatpush3.bf16.msra.mxu0 %v9602_v40  ;;  %9202 = vmatprep.subr.msk.bf16.mxu1 %vm9201_vm1, %v13503_v44  ;;  %vm1817_vm1 = vcmp.eq.s32.totalorder %v11976_v55, %v13580_v33  ;;  %v9613_v33 = vld [vmem:[#allocation10 + $0x1b8] ss:$12 sps:$4 sm:$0xff]  }
 0x2f9   :  { %8420 = vmatprep.subr.bf16.mxu0 %v9603_v36  ;;  %vm9213_vm5 = vmpackc.low %vm1817_vm1, %vm1811_vm8  ;;  %vm1834_vm8 = vcmp.eq.s32.totalorder %v12007_v2, %v13586_v59  ;;  %vm1840_vm1 = vcmp.eq.s32.totalorder %v12007_v2, %v13587_v62  ;;  %v9682_v36 = vld [vmem:[#allocation8 + $0x210] ss:$12 sps:$4 sm:$0xff]  }
 0x2fa   :  { %vm9223_vm6 = vmpackc.low %vm1840_vm1, %vm1834_vm8  ;;  %vm1877_vm8 = vcmp.eq.s32.totalorder %v11976_v55, %v13601_v49 }
 0x2fb   :  { %9204 = vmatpush1.bf16.msk.msra.mxu1 %vm9203_vm10, %v13503_v44  ;;  %vm1823_vm10 = vcmp.eq.s32.totalorder %v11976_v55, %v13581_v39  ;;  %v9614_v39 = vld [vmem:[#allocation10 + $0x1d0] ss:$12 sps:$4 sm:$0xff]  }
 0x2fc   :  { %8421 = vmatpush3.bf16.msra.mxu0 %v9604_v48  ;;  %9206 = vmatprep.subr.msk.bf16.mxu1 %vm9205_vm11, %v13503_v44  ;;  %vm1829_vm11 = vcmp.eq.s32.totalorder %v11976_v55, %v13582_v47  ;;  %v9615_v47 = vld [vmem:[#allocation10 + $0x1e8] ss:$12 sps:$4 sm:$0xff]   ;;  %v9679_v48 = vld [vmem:[#allocation8 + $0x150] ss:$12 sps:$4 sm:$0xff]  }
 0x2fd   :  { %8422 = vmatprep.subr.bf16.mxu0 %v9605_v50  ;;  %vm9217_vm13 = vmpackc.low %vm1829_vm11, %vm1823_vm10  ;;  %vm1846_vm10 = vcmp.eq.s32.totalorder %v12007_v2, %v13592_v11  ;;  %vm1852_vm11 = vcmp.eq.s32.totalorder %v12007_v2, %v13593_v13  ;;  %v9690_v50 = vld [vmem:[#allocation8 + $0x22c] ss:$12 sps:$4 sm:$0xff]  }
 0x2fe   :  { %vm9227_vm14 = vmpackc.low %vm1852_vm11, %vm1846_vm10  ;;  %vm1889_vm10 = vcmp.eq.s32.totalorder %v11976_v55, %v13605_v14 }
 0x2ff   :  { %9208 = vmatpush1.bf16.msk.msra.mxu1 %vm9207_vm7, %v13503_v44  ;;  %vm1835_vm7 = vcmp.eq.s32.totalorder %v11976_v55, %v13586_v59  ;;  %v9616_v59 = vld [vmem:[#allocation10 + $0x200] ss:$12 sps:$4 sm:$0xff]  }
 0x300   :  { %8423 = vmatpush3.bf16.msra.mxu0 %v9606_v57  ;;  %9210 = vmatprep.subr.msk.bf16.mxu1 %vm9209_vm4, %v13503_v44  ;;  %vm1841_vm4 = vcmp.eq.s32.totalorder %v11976_v55, %v13587_v62  ;;  %v9617_v62 = vld [vmem:[#allocation10 + $0x218] ss:$12 sps:$4 sm:$0xff]  }
 0x301   :  { %8424 = vmatprep.subr.bf16.mxu0 %v9607_v61  ;;  %vm9221_vm2 = vmpackc.low %vm1841_vm4, %vm1835_vm7  ;;  %vm1858_vm4 = vcmp.eq.s32.totalorder %v12007_v2, %v13596_v5  ;;  %v9687_v57 = vld [vmem:[#allocation8 + $0x16c] ss:$12 sps:$4 sm:$0xff]   ;;  %v9688_v61 = vld [vmem:[#allocation8 + $0x228] ss:$12 sps:$4 sm:$0xff]  }
 0x303   :  { %9212 = vmatpush1.bf16.msk.msra.mxu1 %vm9211_vm3, %v13503_v44  ;;  %vm1847_vm3 = vcmp.eq.s32.totalorder %v11976_v55, %v13592_v11  ;;  %v9618_v11 = vld [vmem:[#allocation10 + $0x230] ss:$12 sps:$4 sm:$0xff]  }
 0x304   :  { %8425 = vmatpush3.bf16.msra.mxu0 %v9608_v35  ;;  %9214 = vmatprep.subr.msk.bf16.mxu1 %vm9213_vm5, %v13503_v44  ;;  %vm1853_vm5 = vcmp.eq.s32.totalorder %v11976_v55, %v13593_v13  ;;  %v9621_v13 = vld [vmem:[#allocation8 + $0x4] ss:$12 sps:$4 sm:$0xff]   ;;  %v9685_v35 = vld [vmem:[#allocation8 + $0x168] ss:$12 sps:$4 sm:$0xff]  }
 0x305   :  { %8426 = vmatprep.subr.bf16.mxu0 %v9609_v0  ;;  %vm9225_vm9 = vmpackc.low %vm1853_vm5, %vm1847_vm3  ;;  %vm1870_vm5 = vcmp.eq.s32.totalorder %v12007_v2, %v13600_v9  ;;  %v9691_v0 = vld [vmem:[#allocation8 + $0xc8] ss:$12 sps:$4 sm:$0xff]  }
 0x307   :  { %9216 = vmatpush1.bf16.msk.msra.mxu1 %vm9215_vm12, %v13503_v44  ;;  %vm13653_vm12 = vmmov 0  }
 0x308   :  { %8427 = vmatpush3.bf16.msra.mxu0 %v9610_v16  ;;  %9218 = vmatprep.subr.msk.bf16.mxu1 %vm9217_vm13, %v13503_v44  ;;  %vm1859_vm13 = vcmp.eq.s32.totalorder %v11976_v55, %v13596_v5  ;;  %v9619_v5 = vld [vmem:[#allocation8] ss:$12 sps:$4 sm:$0xff]   ;;  %v9692_v16 = vld [vmem:[#allocation8 + $0x8] ss:$12 sps:$4 sm:$0xff]  }
 0x309   :  { %8605 = vmatprep.subr.bf16.mxu0 %v13638_v32  ;;  %vm9229_vm7 = vmpackc.low %vm1865_vm15, %vm1859_vm13  ;;  %vm1882_vm15 = vcmp.eq.s32.totalorder %v12007_v2, %v13604_v10 }
 0x30b   :  { %5056 = vmatmul.mubr.bf16.vlgmr.msra.gmra.mrb[28].mxu0 %v12822_v54  ;;  %9220 = vmatpush1.bf16.msk.msra.mxu1 %vm9219_vm0, %v13503_v44  ;;  %vm1864_vm0 = vcmp.eq.s32.totalorder %v12007_v2, %v13597_v17  ;;  %v9624_v17 = vld [vmem:[#allocation8 + $0x1c] ss:$12 sps:$4 sm:$0xff]  }
 0x30c   :  { %8606 = vmatpush3.bf16.msra.mxu0 %v9611_v3  ;;  %9222 = vmatprep.subr.msk.bf16.mxu1 %vm9221_vm2, %v13503_v44  ;;  %vm1871_vm2 = vcmp.eq.s32.totalorder %v11976_v55, %v13600_v9  ;;  %vm9231_vm1 = vmpackc.low %vm1864_vm0, %vm1858_vm4  ;;  %vm1901_vm4 = vcmp.eq.s32.totalorder %v11976_v55, %v13609_v1  ;;  %v9859_v9 = vld [vmem:[#allocation16 + $0x8] sm:$0xff]  ;;  %v9860_v3 = vld [vmem:[#allocation16 + $0x10] sm:$0xff] }
 0x30d   :  { %8607 = vmatprep.subr.bf16.mxu0 %v13638_v32  ;;  %8621 = vmatprep.mubr.msk.bf16.mxu0 %vm13653_vm12, %v13638_v32  ;;  %vm9233_vm3 = vmpackc.low %vm1877_vm8, %vm1871_vm2  ;;  %vm1894_vm8 = vcmp.eq.s32.totalorder %v12007_v2, %v13608_v53  ;;  %v9661_v54 = vld [vmem:[#allocation8 + $0x108] ss:$12 sps:$4 sm:$0xff]  }
 0x30f   :  { %9224 = vmatpush1.bf16.msk.msra.mxu1 %vm9223_vm6, %v13503_v44  ;;  %vm1876_vm6 = vcmp.eq.s32.totalorder %v12007_v2, %v13601_v49  ;;  %v13091_v49 = vpack.c.bf16 %v9859_v9, %v9859_v9  ;;  %v9700_v9 = vld [vmem:[#allocation8 + $0x110] ss:$12 sps:$4 sm:$0xff]  }
 0x310   :  { %8608 = vmatpush3.bf16.msra.mxu0 %v9612_v19  ;;  %9226 = vmatprep.subr.msk.bf16.mxu1 %vm9225_vm9, %v13503_v44  ;;  %vm1883_vm9 = vcmp.eq.s32.totalorder %v11976_v55, %v13604_v10  ;;  %vm9235_vm11 = vmpackc.low %vm1876_vm6, %vm1870_vm5  ;;  %vm1913_vm5 = vcmp.eq.s32.totalorder %v11976_v55, %v13649_v43  ;;  %v9627_v10 = vld [vmem:[#allocation8 + $0x34] ss:$12 sps:$4 sm:$0xff]   ;;  %v13162_v19 = vpack.c.bf16 %v9860_v3, %v9860_v3 }
 0x311   :  { %8609 = vmatprep.subr.bf16.mxu0 %v13638_v32  ;;  %vm9237_vm13 = vmpackc.low %vm1889_vm10, %vm1883_vm9  ;;  %vm1906_vm10 = vcmp.eq.s32.totalorder %v12007_v2, %v13612_v20  ;;  %v9760_v3 = vld [vmem:[#allocation11 + $0x228] ss:$12 sps:$4 sm:$0xff]  }
 0x313   :  { %9228 = vmatpush1.bf16.msk.msra.mxu1 %vm9227_vm14, %v13503_v44  ;;  %vm1888_vm14 = vcmp.eq.s32.totalorder %v12007_v2, %v13605_v14  ;;  %v9625_v14 = vld [vmem:[#allocation8 + $0x30] ss:$12 sps:$4 sm:$0xff]  }
 0x314   :  { %8610 = vmatpush3.bf16.msra.mxu0 %v9613_v33  ;;  %9230 = vmatprep.subr.msk.bf16.mxu1 %vm9229_vm7, %v13503_v44  ;;  %vm1895_vm7 = vcmp.eq.s32.totalorder %v11976_v55, %v13608_v53  ;;  %vm9239_vm0 = vmpackc.low %vm1888_vm14, %vm1882_vm15  ;;  %vm1925_vm15 = vcmp.eq.s32.totalorder %v11976_v55, %v13651_v26  ;;  %v9630_v53 = vld [vmem:[#allocation8 + $0x4c] ss:$12 sps:$4 sm:$0xff]   ;;  %v9693_v33 = vld [vmem:[#allocation8 + $0x188] ss:$12 sps:$4 sm:$0xff]  }
 0x315   :  { %8611 = vmatprep.subr.bf16.mxu0 %v13638_v32  ;;  %vm9241_vm2 = vmpackc.low %vm1901_vm4, %vm1895_vm7  ;;  %vm1918_vm4 = vcmp.eq.s32.totalorder %v12007_v2, %v13650_v30 }
 0x317   :  { %9232 = vmatpush1.bf16.msk.msra.mxu1 %vm9231_vm1, %v13503_v44  ;;  %vm1900_vm1 = vcmp.eq.s32.totalorder %v12007_v2, %v13609_v1  ;;  %v9628_v1 = vld [vmem:[#allocation8 + $0x48] ss:$12 sps:$4 sm:$0xff]  }
 0x318   :  { %8612 = vmatpush3.bf16.msra.mxu0 %v9614_v39  ;;  %9234 = vmatprep.subr.msk.bf16.mxu1 %vm9233_vm3, %v13503_v44  ;;  %vm1907_vm3 = vcmp.eq.s32.totalorder %v11976_v55, %v13612_v20  ;;  %vm9243_vm6 = vmpackc.low %vm1900_vm1, %vm1894_vm8  ;;  %vm1937_vm8 = vcmp.eq.s32.totalorder %v11976_v55, %v13627_v28  ;;  %v9633_v20 = vld [vmem:[#allocation8 + $0x64] ss:$12 sps:$4 sm:$0xff]  }
 0x319   :  { %8613 = vmatprep.subr.bf16.mxu0 %v13638_v32  ;;  %vm9245_vm9 = vmpackc.low %vm1913_vm5, %vm1907_vm3  ;;  %vm1930_vm3 = vcmp.eq.s32.totalorder %v12007_v2, %v13626_v56  ;;  %vm1936_vm5 = vcmp.eq.s32.totalorder %v12007_v2, %v13627_v28  ;;  %v9631_v28 = vld [vmem:[#allocation8 + $0x60] ss:$12 sps:$4 sm:$0xff]  }
 0x31a   :  { %v9861_v39 = vld [vmem:[#allocation16] sm:$0xff] }
 0x31b   :  { %9236 = vmatpush1.bf16.msk.msra.mxu1 %vm9235_vm11, %v13503_v44  ;;  %vm1912_vm11 = vcmp.eq.s32.totalorder %v12007_v2, %v13649_v43  ;;  %v9655_v43 = vld [vmem:[#allocation8 + $0xf0] ss:$12 sps:$4 sm:$0xff]  }
 0x31c   :  { %8614 = vmatpush3.bf16.msra.mxu0 %v9615_v47  ;;  %9238 = vmatprep.subr.msk.bf16.mxu1 %vm9237_vm13, %v13503_v44  ;;  %vm1919_vm13 = vcmp.eq.s32.totalorder %v11976_v55, %v13650_v30  ;;  %vm9247_vm14 = vmpackc.low %vm1912_vm11, %vm1906_vm10  ;;  %vm1949_vm10 = vcmp.eq.s32.totalorder %v11976_v55, %v13635_v21  ;;  %v9666_v30 = vld [vmem:[#allocation8 + $0x1cc] ss:$12 sps:$4 sm:$0xff]   ;;  %v13164_v47 = vpack.c.bf16 %v9861_v39, %v9861_v39 }
 0x31d   :  { %8615 = vmatprep.subr.bf16.mxu0 %v13638_v32  ;;  %vm9249_vm7 = vmpackc.low %vm1925_vm15, %vm1919_vm13  ;;  %vm1942_vm15 = vcmp.eq.s32.totalorder %v12007_v2, %v13634_v38  ;;  %v9763_v39 = vld [vmem:[#allocation11 + $0xc0] ss:$12 sps:$4 sm:$0xff]  }
 0x31e   :  { %vm9255_vm11 = vmpackc.low %vm1936_vm5, %vm1930_vm3  ;;  %vm1967_vm3 = vcmp.eq.s32.totalorder %v11976_v55, %v13641_v27  ;;  %vm1973_vm5 = vcmp.eq.s32.totalorder %v11976_v55, %v13642_v6 }
 0x31f   :  { %9240 = vmatpush1.bf16.msk.msra.mxu1 %vm9239_vm0, %v13503_v44  ;;  %vm1924_vm0 = vcmp.eq.s32.totalorder %v12007_v2, %v13651_v26  ;;  %v9663_v26 = vld [vmem:[#allocation8 + $0x10c] ss:$12 sps:$4 sm:$0xff]  }
 0x320   :  { %8616 = vmatpush3.bf16.msra.mxu0 %v9616_v59  ;;  %9242 = vmatprep.subr.msk.bf16.mxu1 %vm9241_vm2, %v13503_v44  ;;  %vm1931_vm2 = vcmp.eq.s32.totalorder %v11976_v55, %v13626_v56  ;;  %vm9251_vm1 = vmpackc.low %vm1924_vm0, %vm1918_vm4  ;;  %v9622_v56 = vld [vmem:[#allocation8 + $0x18] ss:$12 sps:$4 sm:$0xff]   ;;  %vm1961_vm4 = vcmp.eq.s32.totalorder %v11976_v55, %v13640_v4  ;;  %v9694_v59 = vld [vmem:[#allocation8 + $0xe0] ss:$12 sps:$4 sm:$0xff]  }
 0x321   :  { %8617 = vmatprep.subr.bf16.mxu0 %v13638_v32 }
 0x323   :  { %9244 = vmatpush1.bf16.msk.msra.mxu1 %vm9243_vm6, %v13503_v44  ;;  %vm9253_vm6 = vmpackc.low %vm1937_vm8, %vm1931_vm2  ;;  %vm1954_vm8 = vcmp.eq.s32.totalorder %v12007_v2, %v13639_v24 }
 0x324   :  { %8618 = vmatpush3.bf16.msra.mxu0 %v9617_v62  ;;  %9246 = vmatprep.subr.msk.bf16.mxu1 %vm9245_vm9, %v13503_v44  ;;  %vm1943_vm9 = vcmp.eq.s32.totalorder %v11976_v55, %v13634_v38  ;;  %v9634_v38 = vld [vmem:[#allocation8 + $0x78] ss:$12 sps:$4 sm:$0xff]   ;;  %v9695_v62 = vld [vmem:[#allocation8 + $0x20] ss:$12 sps:$4 sm:$0xff]  }
 0x325   :  { %8619 = vmatprep.subr.bf16.mxu0 %v13638_v32  ;;  %vm9257_vm13 = vmpackc.low %vm1949_vm10, %vm1943_vm9  ;;  %vm1966_vm10 = vcmp.eq.s32.totalorder %v12007_v2, %v13641_v27  ;;  %v9646_v27 = vld [vmem:[#allocation8 + $0x180] ss:$12 sps:$4 sm:$0xff]  }
 0x326   :  { %vm9265_vm9 = vmpackc.low %vm1973_vm5, %vm1967_vm3  ;;  %vm1990_vm5 = vcmp.eq.s32.totalorder %v12007_v2, %v11816_v60 }
 0x327   :  { %9248 = vmatpush1.bf16.msk.msra.mxu1 %vm9247_vm14, %v13503_v44  ;;  %vm1948_vm14 = vcmp.eq.s32.totalorder %v12007_v2, %v13635_v21  ;;  %v9639_v21 = vld [vmem:[#allocation8 + $0x94] ss:$12 sps:$4 sm:$0xff]  }
 0x328   :  { %8620 = vmatpush3.bf16.msra.mxu0 %v9618_v11  ;;  %9250 = vmatprep.subr.msk.bf16.mxu1 %vm9249_vm7, %v13503_v44  ;;  %vm1955_vm7 = vcmp.eq.s32.totalorder %v11976_v55, %v13639_v24  ;;  %vm9259_vm0 = vmpackc.low %vm1948_vm14, %vm1942_vm15  ;;  %vm1985_vm15 = vcmp.eq.s32.totalorder %v11976_v55, %v13644_v51  ;;  %v9637_v24 = vld [vmem:[#allocation8 + $0x90] ss:$12 sps:$4 sm:$0xff]   ;;  %v9696_v11 = vld [vmem:[#allocation8 + $0x1a0] ss:$12 sps:$4 sm:$0xff]  }
 0x329   :  { %5487 = vmatprep.subr.bf16.mxu0 %v9621_v13  ;;  %vm9261_vm2 = vmpackc.low %vm1961_vm4, %vm1955_vm7  ;;  %vm1978_vm4 = vcmp.eq.s32.totalorder %v12007_v2, %v13643_v29  ;;  %v9697_v13 = vld [vmem:[#allocation8 + $0xf8] ss:$12 sps:$4 sm:$0xff]  }
 0x32a   :  { %4273 = vmatmul.mubr.f32.vlgmr.msra.gmra.mrb[22].mxu1 %v13631_v15  ;;  %v9636_v15 = vld [vmem:[#allocation8 + $0x7c] ss:$12 sps:$4 sm:$0xff]  }
 0x32b   :  { %8622 = vmatmul.mubr.bf16.vlgmr.msra.gmra.mrb[32].mxu0 %v12910_v23  ;;  %9252 = vmatpush1.bf16.msk.msra.mxu1 %vm9251_vm1, %v13503_v44  ;;  %vm1960_vm1 = vcmp.eq.s32.totalorder %v12007_v2, %v13640_v4  ;;  %v9642_v4 = vld [vmem:[#allocation8 + $0xac] ss:$12 sps:$4 sm:$0xff]   ;;  %v9675_v23 = vld [vmem:[#allocation8 + $0x13c] ss:$12 sps:$4 sm:$0xff]  }
 0x32c   :  { %5488 = vmatpush1.bf16.msra.mxu0 %v9619_v5  ;;  %5519 = vmatprep.mubr.bf16.mxu0 %v13091_v49  ;;  %v9698_v5 = vld [vmem:[#allocation8 + $0x38] ss:$12 sps:$4 sm:$0xff]  }
 0x32d   :  { %9254 = vmatprep.subr.msk.bf16.mxu1 %vm9253_vm6, %v13503_v44  ;;  %5489 = vmatprep.subr.bf16.mxu0 %v9624_v17  ;;  %vm9263_vm6 = vmpackc.low %vm1960_vm1, %vm1954_vm8  ;;  %vm1997_vm8 = vcmp.eq.s32.totalorder %v11976_v55, %v11818_v31  ;;  %v9699_v17 = vld [vmem:[#allocation8 + $0x1b8] ss:$12 sps:$4 sm:$0xff]  }
 0x32e   :  { %4343 = vmatprep.mubr.f32.mxu1 %v13638_v32 }
 0x32f   :  { %9256 = vmatpush1.bf16.msk.msra.mxu1 %vm9255_vm11, %v13503_v44  ;;  %vm1972_vm11 = vcmp.eq.s32.totalorder %v12007_v2, %v13642_v6  ;;  %v9643_v6 = vld [vmem:[#allocation8 + $0xc0] ss:$12 sps:$4 sm:$0xff]  }
 0x330   :  { %5490 = vmatpush1.bf16.msra.mxu0 %v9622_v56  ;;  %9258 = vmatprep.subr.msk.bf16.mxu1 %vm9257_vm13, %v13503_v44  ;;  %vm1979_vm13 = vcmp.eq.s32.totalorder %v11976_v55, %v13643_v29  ;;  %vm9267_vm14 = vmpackc.low %vm1972_vm11, %vm1966_vm10  ;;  %vm2009_vm10 = vcmp.eq.s32.totalorder %v11976_v55, %v13645_v12  ;;  %v9651_v29 = vld [vmem:[#allocation8 + $0xdc] ss:$12 sps:$4 sm:$0xff]  }
 0x331   :  { %5491 = vmatprep.subr.bf16.mxu0 %v9627_v10  ;;  %vm9269_vm7 = vmpackc.low %vm1985_vm15, %vm1979_vm13  ;;  %vm2002_vm15 = vcmp.eq.s32.totalorder %v12007_v2, %v11884_v41  ;;  %v9701_v56 = vld [vmem:[#allocation8 + $0x50] ss:$12 sps:$4 sm:$0xff]   ;;  %v9703_v10 = vld [vmem:[#allocation8 + $0x128] ss:$12 sps:$4 sm:$0xff]  }
 0x333   :  { %9260 = vmatpush1.bf16.msk.msra.mxu1 %vm9259_vm0, %v13503_v44  ;;  %vm1984_vm0 = vcmp.eq.s32.totalorder %v12007_v2, %v13644_v51  ;;  %v9649_v51 = vld [vmem:[#allocation8 + $0xd8] ss:$12 sps:$4 sm:$0xff]  }
 0x334   :  { %5492 = vmatpush1.bf16.msra.mxu0 %v9625_v14  ;;  %9262 = vmatprep.subr.msk.bf16.mxu1 %vm9261_vm2, %v13503_v44  ;;  %vm1991_vm2 = vcmp.eq.s32.totalorder %v11976_v55, %v11816_v60  ;;  %vm9271_vm1 = vmpackc.low %vm1984_vm0, %vm1978_vm4  ;;  %v9648_v60 = vld [vmem:[#allocation8 + $0x184] ss:$12 sps:$4 sm:$0xff]   ;;  %v9704_v14 = vld [vmem:[#allocation8 + $0x68] ss:$12 sps:$4 sm:$0xff]  }
 0x335   :  { %5493 = vmatprep.subr.bf16.mxu0 %v9630_v53  ;;  %vm9273_vm3 = vmpackc.low %vm1997_vm8, %vm1991_vm2  ;;  %v9705_v53 = vld [vmem:[#allocation8 + $0x1e8] ss:$12 sps:$4 sm:$0xff]  }
 0x337   :  { %9264 = vmatpush1.bf16.msk.msra.mxu1 %vm9263_vm6, %v13503_v44  ;;  %vm1996_vm6 = vcmp.eq.s32.totalorder %v12007_v2, %v11818_v31  ;;  %v9640_v31 = vld [vmem:[#allocation8 + $0xa8] ss:$12 sps:$4 sm:$0xff]  }
 0x338   :  { %5494 = vmatpush1.bf16.msra.mxu0 %v9628_v1  ;;  %9266 = vmatprep.subr.msk.bf16.mxu1 %vm9265_vm9, %v13503_v44  ;;  %vm2003_vm9 = vcmp.eq.s32.totalorder %v11976_v55, %v11884_v41  ;;  %vm9275_vm11 = vmpackc.low %vm1996_vm6, %vm1990_vm5  ;;  %v9645_v55 = vld [vmem:[#allocation8 + $0xc4] ss:$12 sps:$4 sm:$0xff]   ;;  %v9654_v41 = vld [vmem:[#allocation8 + $0x19c] ss:$12 sps:$4 sm:$0xff]  }
 0x339   :  { %5495 = vmatprep.subr.bf16.mxu0 %v9633_v20  ;;  %vm9277_vm13 = vmpackc.low %vm2009_vm10, %vm2003_vm9  ;;  %v9706_v1 = vld [vmem:[#allocation8 + $0x140] ss:$12 sps:$4 sm:$0xff]  }
 0x33a   :  { %v9707_v20 = vld [vmem:[#allocation8 + $0x80] ss:$12 sps:$4 sm:$0xff]  }
 0x33b   :  { %9268 = vmatpush1.bf16.msk.msra.mxu1 %vm9267_vm14, %v13503_v44  ;;  %vm2008_vm14 = vcmp.eq.s32.totalorder %v12007_v2, %v13645_v12  ;;  %v9652_v2 = vld [vmem:[#allocation8 + $0x198] ss:$12 sps:$4 sm:$0xff]   ;;  %v9660_v12 = vld [vmem:[#allocation8 + $0x1b4] ss:$12 sps:$4 sm:$0xff]  }
 0x33c   :  { %5496 = vmatpush1.bf16.msra.mxu0 %v9631_v28  ;;  %9270 = vmatprep.subr.msk.bf16.mxu1 %vm9269_vm7, %v13503_v44  ;;  %vm9279_vm7 = vmpackc.low %vm2008_vm14, %vm2002_vm15  ;;  %v9708_v28 = vld [vmem:[#allocation8 + $0x200] ss:$12 sps:$4 sm:$0xff]  }
 0x33d   :  { %5497 = vmatprep.subr.bf16.mxu0 %v9636_v15  ;;  %v9709_v15 = vld [vmem:[#allocation8 + $0x158] ss:$12 sps:$4 sm:$0xff]  }
 0x33f   :  { %9272 = vmatpush1.bf16.msk.msra.mxu1 %vm9271_vm1, %v13503_v44 }
 0x340   :  { %5498 = vmatpush1.bf16.msra.mxu0 %v9634_v38  ;;  %9274 = vmatprep.subr.msk.bf16.mxu1 %vm9273_vm3, %v13503_v44  ;;  %v9710_v38 = vld [vmem:[#allocation8 + $0x98] ss:$12 sps:$4 sm:$0xff]  }
 0x341   :  { %5499 = vmatprep.subr.bf16.mxu0 %v9639_v21  ;;  %v9711_v21 = vld [vmem:[#allocation8 + $0x218] ss:$12 sps:$4 sm:$0xff]  }
 0x343   :  { %9276 = vmatpush1.bf16.msk.msra.mxu1 %vm9275_vm11, %v13503_v44 }
 0x344   :  { %5500 = vmatpush1.bf16.msra.mxu0 %v9637_v24  ;;  %9278 = vmatprep.subr.msk.bf16.mxu1 %vm9277_vm13, %v13503_v44  ;;  %v9712_v24 = vld [vmem:[#allocation8 + $0x170] ss:$12 sps:$4 sm:$0xff]  }
 0x345   :  { %5501 = vmatprep.subr.bf16.mxu0 %v9642_v4  ;;  %v9713_v4 = vld [vmem:[#allocation8 + $0xb0] ss:$12 sps:$4 sm:$0xff]  }
 0x347   :  { %9280 = vmatpush1.bf16.msk.msra.mxu1 %vm9279_vm7, %v13503_v44  ;;  %v9658_v44 = vld [vmem:[#allocation8 + $0x1b0] ss:$12 sps:$4 sm:$0xff]  }
 0x348   :  { %5502 = vmatpush1.bf16.msra.mxu0 %v9640_v31  ;;  %5528 = vmatprep.subr.bf16.mxu1 %v9648_v60  ;;  %v9714_v31 = vld [vmem:[#allocation8 + $0x230] ss:$12 sps:$4 sm:$0xff]  }
 0x349   :  { %5503 = vmatprep.subr.bf16.mxu0 %v9645_v55  ;;  %v9717_v60 = vld [vmem:[#allocation11 + $0x4] ss:$12 sps:$4 sm:$0xff]  }
 0x34a   :  { %4344 = vmatmul.mubr.f32.vlgmr.msra.gmra.mrb[22].mxu1 %v13648_v46  ;;  %v9664_v46 = vld [vmem:[#allocation8 + $0x1c8] ss:$12 sps:$4 sm:$0xff]   ;;  %v9720_v55 = vld [vmem:[#allocation11 + $0x184] ss:$12 sps:$4 sm:$0xff]  }
 0x34b   :  { %5529 = vmatpush1.bf16.msra.mxu1 %v9646_v27  ;;  %5560 = vmatprep.mubr.bf16.mxu1 %v13652_v63  ;;  %v9715_v27 = vld [vmem:[#allocation11] ss:$12 sps:$4 sm:$0xff]  }
 0x34c   :  { %5504 = vmatpush1.bf16.msra.mxu0 %v9643_v6  ;;  %5530 = vmatprep.subr.bf16.mxu1 %v9654_v41  ;;  %v9718_v6 = vld [vmem:[#allocation11 + $0x180] ss:$12 sps:$4 sm:$0xff]   ;;  %v9723_v41 = vld [vmem:[#allocation11 + $0x1c] ss:$12 sps:$4 sm:$0xff]  }
 0x34d   :  { %5505 = vmatprep.subr.bf16.mxu0 %v9651_v29  ;;  %v9726_v29 = vld [vmem:[#allocation11 + $0x19c] ss:$12 sps:$4 sm:$0xff]  }
 0x34f   :  { %5531 = vmatpush1.bf16.msra.mxu1 %v9652_v2  ;;  %v13654_v2 = vld [vmem:[#allocation74_spill] sm:$0xff] }
 0x350   :  { %5506 = vmatpush1.bf16.msra.mxu0 %v9649_v51  ;;  %5532 = vmatprep.subr.bf16.mxu1 %v9660_v12  ;;  %v13182_v51 = vpack.c.bf16 %v13654_v2, %v13654_v2  ;;  %v9721_v12 = vld [vmem:[#allocation11 + $0x18] ss:$12 sps:$4 sm:$0xff]  }
 0x351   :  { %5507 = vmatprep.subr.bf16.mxu0 %v9657_v37  ;;  %v9724_v37 = vld [vmem:[#allocation11 + $0x198] ss:$12 sps:$4 sm:$0xff]  }
 0x353   :  { %5533 = vmatpush1.bf16.msra.mxu1 %v9658_v44  ;;  %v9729_v44 = vld [vmem:[#allocation11 + $0x34] ss:$12 sps:$4 sm:$0xff]  }
 0x354   :  { %5508 = vmatpush1.bf16.msra.mxu0 %v9655_v43  ;;  %5534 = vmatprep.subr.bf16.mxu1 %v9666_v30  ;;  %v9732_v43 = vld [vmem:[#allocation11 + $0x1b4] ss:$12 sps:$4 sm:$0xff]   ;;  %v9727_v30 = vld [vmem:[#allocation11 + $0x30] ss:$12 sps:$4 sm:$0xff]  }
 0x355   :  { %5509 = vmatprep.subr.bf16.mxu0 %v9663_v26  ;;  %v9730_v26 = vld [vmem:[#allocation11 + $0x1b0] ss:$12 sps:$4 sm:$0xff]  }
 0x357   :  { %5535 = vmatpush1.bf16.msra.mxu1 %v9664_v46  ;;  %v9735_v46 = vld [vmem:[#allocation11 + $0x4c] ss:$12 sps:$4 sm:$0xff]  }
 0x358   :  { %5510 = vmatpush1.bf16.msra.mxu0 %v9661_v54  ;;  %5536 = vmatprep.subr.bf16.mxu1 %v9672_v52  ;;  %v9738_v54 = vld [vmem:[#allocation11 + $0x1cc] ss:$12 sps:$4 sm:$0xff]   ;;  %v9733_v52 = vld [vmem:[#allocation11 + $0x48] ss:$12 sps:$4 sm:$0xff]  }
 0x359   :  { %5511 = vmatprep.subr.bf16.mxu0 %v9669_v8  ;;  %v9736_v8 = vld [vmem:[#allocation11 + $0x1c8] ss:$12 sps:$4 sm:$0xff]  }
 0x35b   :  { %5537 = vmatpush1.bf16.msra.mxu1 %v9670_v18  ;;  %v9741_v18 = vld [vmem:[#allocation11 + $0x64] ss:$12 sps:$4 sm:$0xff]  }
 0x35c   :  { %5512 = vmatpush1.bf16.msra.mxu0 %v9667_v58  ;;  %5538 = vmatprep.subr.bf16.mxu1 %v9678_v42  ;;  %v9744_v58 = vld [vmem:[#allocation11 + $0x1e4] ss:$12 sps:$4 sm:$0xff]   ;;  %v9739_v42 = vld [vmem:[#allocation11 + $0x60] ss:$12 sps:$4 sm:$0xff]  }
 0x35d   :  { %5513 = vmatprep.subr.bf16.mxu0 %v9675_v23  ;;  %v9747_v23 = vld [vmem:[#allocation11 + $0x7c] ss:$12 sps:$4 sm:$0xff]  }
 0x35e   :  { %v4203_v34 = vpop.f32.mrb[16].mxu0 }
 0x35f   :  { %4355 = vst [vmem:[#allocation16 + $0x28] sm:$0xff] %v4203_v34  ;;  %v4205_v40 = vpop.f32.mrb[17].mxu0  ;;  %5539 = vmatpush1.bf16.msra.mxu1 %v9676_v7  ;;  %v9750_v7 = vld [vmem:[#allocation11 + $0x1fc] ss:$12 sps:$4 sm:$0xff]   ;;  %v9756_v34 = vld [vmem:[#allocation11 + $0x214] ss:$12 sps:$4 sm:$0xff]  }
 0x360   :  { %4356 = vst [vmem:[#allocation16 + $0x30] sm:$0xff] %v4205_v40  ;;  %5514 = vmatpush1.bf16.msra.mxu0 %v9673_v22  ;;  %5540 = vmatprep.subr.bf16.mxu1 %v9684_v25  ;;  %v9745_v22 = vld [vmem:[#allocation11 + $0x78] ss:$12 sps:$4 sm:$0xff]  }
 0x361   :  { %5515 = vmatprep.subr.bf16.mxu0 %v9681_v45  ;;  %v9748_v25 = vld [vmem:[#allocation11 + $0x1f8] ss:$12 sps:$4 sm:$0xff]   ;;  %v9753_v45 = vld [vmem:[#allocation11 + $0x94] ss:$12 sps:$4 sm:$0xff]  }
 0x363   :  { %5541 = vmatpush1.bf16.msra.mxu1 %v9682_v36 }
 0x364   :  { %5516 = vmatpush1.bf16.msra.mxu0 %v9679_v48  ;;  %5542 = vmatprep.subr.bf16.mxu1 %v9690_v50  ;;  %v9751_v48 = vld [vmem:[#allocation11 + $0x90] ss:$12 sps:$4 sm:$0xff]  }
 0x365   :  { %5517 = vmatprep.subr.bf16.mxu0 %v9687_v57  ;;  %v9754_v57 = vld [vmem:[#allocation11 + $0x210] ss:$12 sps:$4 sm:$0xff]  }
 0x367   :  { %5543 = vmatpush1.bf16.msra.mxu1 %v9688_v61  ;;  %v9759_v61 = vld [vmem:[#allocation11 + $0xac] ss:$12 sps:$4 sm:$0xff]  }
 0x368   :  { %5518 = vmatpush1.bf16.msra.mxu0 %v9685_v35  ;;  %8443 = vmatprep.subr.bf16.mxu1 %v9691_v0  ;;  %v9762_v0 = vld [vmem:[#allocation11 + $0x22c] ss:$12 sps:$4 sm:$0xff]  }
 0x369   :  { %8625 = vmatprep.subr.bf16.mxu0 %v13638_v32 }
 0x36a   :  { %5561 = vmatmul.mubr.bf16.vlgmr.msra.gmra.mrb[24].mxu1 %v13162_v19 }
 0x36b   :  { %5520 = vmatmul.mubr.bf16.vlgmr.msra.gmra.mrb[36].mxu0 %v13164_v47  ;;  %8444 = vmatpush3.bf16.msra.mxu1 %v9692_v16  ;;  %v9757_v16 = vld [vmem:[#allocation11 + $0xa8] ss:$12 sps:$4 sm:$0xff]  }
 0x36c   :  { %5601 = vmatprep.mubr.bf16.mxu1 %v13091_v49  ;;  %8626 = vmatpush3.bf16.msra.mxu0 %v9693_v33  ;;  %v9702_v49 = vld [vmem:[#allocation8 + $0x1d0] ss:$12 sps:$4 sm:$0xff]   ;;  %v9766_v33 = vld [vmem:[#allocation11 + $0xc8] ss:$12 sps:$4 sm:$0xff]  }
 0x36d   :  { %8445 = vmatprep.subr.bf16.mxu1 %v9694_v59  ;;  %8627 = vmatprep.subr.bf16.mxu0 %v13638_v32  ;;  %v13655_v59 = vld [vmem:[#allocation73_spill] sm:$0xff] }
 0x36e   :  { %8641 = vmatprep.mubr.msk.bf16.mxu0 %vm13653_vm12, %v13638_v32 }
 0x36f   :  { %8446 = vmatpush3.bf16.msra.mxu1 %v9695_v62  ;;  %v13193_v62 = vpack.c.bf16 %v13655_v59, %v13655_v59  ;;  %v9814_v59 = vld [vmem:[#allocation13 + $0x8] sm:$0xff]  }
 0x370   :  { %8628 = vmatpush3.bf16.msra.mxu0 %v9696_v11  ;;  %8447 = vmatprep.subr.bf16.mxu1 %v9697_v13  ;;  %v9770_v11 = vld [vmem:[#allocation11 + $0xdc] ss:$12 sps:$4 sm:$0xff]   ;;  %v9771_v13 = vld [vmem:[#allocation11 + $0xe0] ss:$12 sps:$4 sm:$0xff]  }
 0x371   :  { %8629 = vmatprep.subr.bf16.mxu0 %v13638_v32 }
 0x373   :  { %8448 = vmatpush3.bf16.msra.mxu1 %v9698_v5  ;;  %v9768_v5 = vld [vmem:[#allocation11 + $0xd8] ss:$12 sps:$4 sm:$0xff]  }
 0x374   :  { %8630 = vmatpush3.bf16.msra.mxu0 %v9699_v17  ;;  %8449 = vmatprep.subr.bf16.mxu1 %v9700_v9  ;;  %v9772_v17 = vld [vmem:[#allocation11 + $0x20] ss:$12 sps:$4 sm:$0xff]  }
 0x375   :  { %8631 = vmatprep.subr.bf16.mxu0 %v13638_v32  ;;  %v9775_v9 = vld [vmem:[#allocation11 + $0xf4] ss:$12 sps:$4 sm:$0xff]  }
 0x377   :  { %8450 = vmatpush3.bf16.msra.mxu1 %v9701_v56  ;;  %v9776_v56 = vld [vmem:[#allocation11 + $0xf8] ss:$12 sps:$4 sm:$0xff]  }
 0x378   :  { %8632 = vmatpush3.bf16.msra.mxu0 %v9702_v49  ;;  %8451 = vmatprep.subr.bf16.mxu1 %v9703_v10  ;;  %v9773_v49 = vld [vmem:[#allocation11 + $0xf0] ss:$12 sps:$4 sm:$0xff]   ;;  %v9777_v10 = vld [vmem:[#allocation11 + $0x38] ss:$12 sps:$4 sm:$0xff]  }
 0x379   :  { %8633 = vmatprep.subr.bf16.mxu0 %v13638_v32 }
 0x37b   :  { %8452 = vmatpush3.bf16.msra.mxu1 %v9704_v14  ;;  %v9780_v14 = vld [vmem:[#allocation11 + $0x10c] ss:$12 sps:$4 sm:$0xff]  }
 0x37c   :  { %8634 = vmatpush3.bf16.msra.mxu0 %v9705_v53  ;;  %8453 = vmatprep.subr.bf16.mxu1 %v9706_v1  ;;  %v9781_v53 = vld [vmem:[#allocation11 + $0x110] ss:$12 sps:$4 sm:$0xff]   ;;  %v9778_v1 = vld [vmem:[#allocation11 + $0x108] ss:$12 sps:$4 sm:$0xff]  }
 0x37d   :  { %8635 = vmatprep.subr.bf16.mxu0 %v13638_v32 }
 0x37f   :  { %8454 = vmatpush3.bf16.msra.mxu1 %v9707_v20  ;;  %v9782_v20 = vld [vmem:[#allocation11 + $0x50] ss:$12 sps:$4 sm:$0xff]  }
 0x380   :  { %8636 = vmatpush3.bf16.msra.mxu0 %v9708_v28  ;;  %8455 = vmatprep.subr.bf16.mxu1 %v9709_v15  ;;  %v9785_v28 = vld [vmem:[#allocation11 + $0x124] ss:$12 sps:$4 sm:$0xff]   ;;  %v9786_v15 = vld [vmem:[#allocation11 + $0x128] ss:$12 sps:$4 sm:$0xff]  }
 0x381   :  { %8637 = vmatprep.subr.bf16.mxu0 %v13638_v32 }
 0x383   :  { %8456 = vmatpush3.bf16.msra.mxu1 %v9710_v38  ;;  %v9783_v38 = vld [vmem:[#allocation11 + $0x120] ss:$12 sps:$4 sm:$0xff]  }
 0x384   :  { %8638 = vmatpush3.bf16.msra.mxu0 %v9711_v21  ;;  %8457 = vmatprep.subr.bf16.mxu1 %v9712_v24  ;;  %v9787_v21 = vld [vmem:[#allocation11 + $0x68] ss:$12 sps:$4 sm:$0xff]  }
 0x385   :  { %8639 = vmatprep.subr.bf16.mxu0 %v13638_v32  ;;  %v9790_v24 = vld [vmem:[#allocation11 + $0x13c] ss:$12 sps:$4 sm:$0xff]  }
 0x387   :  { %8458 = vmatpush3.bf16.msra.mxu1 %v9713_v4  ;;  %v9791_v4 = vld [vmem:[#allocation11 + $0x140] ss:$12 sps:$4 sm:$0xff]  }
 0x388   :  { %8640 = vmatpush3.bf16.msra.mxu0 %v9714_v31  ;;  %6132 = vmatprep.subr.bf16.mxu1 %v9717_v60  ;;  %v9788_v31 = vld [vmem:[#allocation11 + $0x138] ss:$12 sps:$4 sm:$0xff]   ;;  %v9792_v60 = vld [vmem:[#allocation11 + $0x80] ss:$12 sps:$4 sm:$0xff]  }
 0x389   :  { %6173 = vmatprep.subr.bf16.mxu0 %v9720_v55  ;;  %v9795_v55 = vld [vmem:[#allocation11 + $0x154] ss:$12 sps:$4 sm:$0xff]  }
 0x38a   :  { %5602 = vmatmul.mubr.bf16.vlgmr.msra.gmra.mrb[28].mxu1 %v13164_v47  ;;  %v9767_v47 = vld [vmem:[#allocation11 + $0x8] ss:$12 sps:$4 sm:$0xff]  }
 0x38b   :  { %8642 = vmatmul.mubr.bf16.vlgmr.msra.gmra.mrb[40].mxu0 %v13162_v19  ;;  %6133 = vmatpush1.bf16.msra.mxu1 %v9715_v27  ;;  %v9765_v19 = vld [vmem:[#allocation11 + $0xc4] ss:$12 sps:$4 sm:$0xff]  }
 0x38c   :  { %6164 = vmatprep.mubr.bf16.mxu1 %v13182_v51  ;;  %6174 = vmatpush1.bf16.msra.mxu0 %v9718_v6  ;;  %v9796_v6 = vld [vmem:[#allocation11 + $0x158] ss:$12 sps:$4 sm:$0xff]  }
 0x38d   :  { %6134 = vmatprep.subr.bf16.mxu1 %v9723_v41  ;;  %6175 = vmatprep.subr.bf16.mxu0 %v9726_v29 }
 0x38e   :  { %6205 = vmatprep.mubr.bf16.mxu0 %v13652_v63  ;;  %v9742_v63 = vld [vmem:[#allocation11 + $0x1e0] ss:$12 sps:$4 sm:$0xff]  }
 0x38f   :  { %6135 = vmatpush1.bf16.msra.mxu1 %v9721_v12  ;;  %v9793_v12 = vld [vmem:[#allocation11 + $0x150] ss:$12 sps:$4 sm:$0xff]  }
 0x390   :  { %6176 = vmatpush1.bf16.msra.mxu0 %v9724_v37  ;;  %6136 = vmatprep.subr.bf16.mxu1 %v9729_v44 }
 0x391   :  { %6177 = vmatprep.subr.bf16.mxu0 %v9732_v43  ;;  %v9797_v43 = vld [vmem:[#allocation11 + $0x98] ss:$12 sps:$4 sm:$0xff]  }
 0x393   :  { %6137 = vmatpush1.bf16.msra.mxu1 %v9727_v30  ;;  %v9800_v30 = vld [vmem:[#allocation11 + $0x16c] ss:$12 sps:$4 sm:$0xff]  }
 0x394   :  { %6178 = vmatpush1.bf16.msra.mxu0 %v9730_v26  ;;  %6138 = vmatprep.subr.bf16.mxu1 %v9735_v46  ;;  %v9801_v46 = vld [vmem:[#allocation11 + $0x170] ss:$12 sps:$4 sm:$0xff]  }
 0x395   :  { %6179 = vmatprep.subr.bf16.mxu0 %v9738_v54  ;;  %v9798_v54 = vld [vmem:[#allocation11 + $0x168] ss:$12 sps:$4 sm:$0xff]  }
 0x397   :  { %6139 = vmatpush1.bf16.msra.mxu1 %v9733_v52  ;;  %v9802_v52 = vld [vmem:[#allocation11 + $0xb0] ss:$12 sps:$4 sm:$0xff]  }
 0x398   :  { %6180 = vmatpush1.bf16.msra.mxu0 %v9736_v8  ;;  %6140 = vmatprep.subr.bf16.mxu1 %v9741_v18  ;;  %v9803_v8 = vld [vmem:[#allocation11 + $0x188] ss:$12 sps:$4 sm:$0xff]   ;;  %v13656_v18 = vld [vmem:[#allocation72_spill] sm:$0xff] }
 0x399   :  { %6181 = vmatprep.subr.bf16.mxu0 %v9744_v58  ;;  %v5649_v58 = vpack.c.bf16 %v13656_v18, %v13656_v18 }
 0x39b   :  { %6141 = vmatpush1.bf16.msra.mxu1 %v9739_v42  ;;  %v9804_v42 = vld [vmem:[#allocation11 + $0x1a0] ss:$12 sps:$4 sm:$0xff]  }
 0x39c   :  { %6182 = vmatpush1.bf16.msra.mxu0 %v9742_v63  ;;  %6142 = vmatprep.subr.bf16.mxu1 %v9747_v23  ;;  %v9805_v63 = vld [vmem:[#allocation11 + $0x1b8] ss:$12 sps:$4 sm:$0xff]   ;;  %v9806_v23 = vld [vmem:[#allocation11 + $0x1d0] ss:$12 sps:$4 sm:$0xff]  }
 0x39d   :  { %6183 = vmatprep.subr.bf16.mxu0 %v9750_v7  ;;  %v9807_v7 = vld [vmem:[#allocation11 + $0x1e8] ss:$12 sps:$4 sm:$0xff]  }
 0x39e   :  { %v13187_v40 = vpop.f32.mrb[20].mxu0 }
 0x39f   :  { %v13189_v36 = vpop.f32.mrb[21].mxu0  ;;  %6143 = vmatpush1.bf16.msra.mxu1 %v9745_v22  ;;  %v9808_v22 = vld [vmem:[#allocation11 + $0x200] ss:$12 sps:$4 sm:$0xff]  }
 0x3a0   :  { %v4979_v50 = vpop.f32.mrb[22].mxu0  ;;  %6184 = vmatpush1.bf16.msra.mxu0 %v9748_v25  ;;  %6144 = vmatprep.subr.bf16.mxu1 %v9753_v45 }
 0x3a1   :  { %v4980_v35 = vpop.f32.mrb[23].mxu0  ;;  %6185 = vmatprep.subr.bf16.mxu0 %v9756_v34  ;;  %v9809_v34 = vld [vmem:[#allocation11 + $0x218] ss:$12 sps:$4 sm:$0xff]   ;;  %v9810_v50 = vld [vmem:[#allocation11 + $0x230] ss:$12 sps:$4 sm:$0xff]  }
 0x3a3   :  { %6145 = vmatpush1.bf16.msra.mxu1 %v9751_v48 }
 0x3a4   :  { %6186 = vmatpush1.bf16.msra.mxu0 %v9754_v57  ;;  %6146 = vmatprep.subr.bf16.mxu1 %v9759_v61 }
 0x3a5   :  { %6187 = vmatprep.subr.bf16.mxu0 %v9762_v0 }
 0x3a7   :  { %6147 = vmatpush1.bf16.msra.mxu1 %v9757_v16 }
 0x3a8   :  { %6188 = vmatpush1.bf16.msra.mxu0 %v9760_v3  ;;  %6148 = vmatprep.subr.bf16.mxu1 %v9765_v19 }
 0x3a9   :  { %8474 = vmatprep.subr.bf16.mxu0 %v9766_v33  ;;  %v9811_v33 = vld [vmem:[#allocation13 + $0x40] sm:$0xff]  }
 0x3ab   :  { %6206 = vmatmul.mubr.bf16.vlgmr.msra.gmra.mrb[44].mxu0 %v13193_v62  ;;  %6149 = vmatpush1.bf16.msra.mxu1 %v9763_v39  ;;  %v9812_v39 = vld [vmem:[#allocation13] sm:$0xff]  }
 0x3ac   :  { %8475 = vmatpush3.bf16.msra.mxu0 %v9767_v47  ;;  %6246 = vmatprep.mubr.bf16.mxu0 %v13182_v51  ;;  %v9813_v47 = vld [vmem:[#allocation13 + $0x48] sm:$0xff]  }
 0x3ad   :  { %6150 = vmatprep.subr.bf16.mxu1 %v9770_v11  ;;  %8476 = vmatprep.subr.bf16.mxu0 %v9771_v13  ;;  %v9816_v11 = vld [vmem:[#allocation13 + $0x10] sm:$0xff]   ;;  %v9817_v13 = vld [vmem:[#allocation13 + $0x58] sm:$0xff]  }
 0x3af   :  { %6151 = vmatpush1.bf16.msra.mxu1 %v9768_v5  ;;  %v9818_v5 = vld [vmem:[#allocation13 + $0x18] sm:$0xff]  }
 0x3b0   :  { %8477 = vmatpush3.bf16.msra.mxu0 %v9772_v17  ;;  %6152 = vmatprep.subr.bf16.mxu1 %v9775_v9  ;;  %v9819_v17 = vld [vmem:[#allocation13 + $0x60] sm:$0xff]  }
 0x3b1   :  { %8478 = vmatprep.subr.bf16.mxu0 %v9776_v56  ;;  %v9820_v9 = vld [vmem:[#allocation13 + $0x20] sm:$0xff]   ;;  %v9821_v56 = vld [vmem:[#allocation13 + $0x68] sm:$0xff]  }
 0x3b3   :  { %6153 = vmatpush1.bf16.msra.mxu1 %v9773_v49  ;;  %v9822_v49 = vld [vmem:[#allocation13 + $0x28] sm:$0xff]  }
 0x3b4   :  { %8479 = vmatpush3.bf16.msra.mxu0 %v9777_v10  ;;  %6154 = vmatprep.subr.bf16.mxu1 %v9780_v14  ;;  %v9823_v10 = vld [vmem:[#allocation13 + $0x70] sm:$0xff]  }
 0x3b5   :  { %8480 = vmatprep.subr.bf16.mxu0 %v9781_v53  ;;  %v9824_v14 = vld [vmem:[#allocation13 + $0x30] sm:$0xff]  }
 0x3b7   :  { %6155 = vmatpush1.bf16.msra.mxu1 %v9778_v1 }
 0x3b8   :  { %8481 = vmatpush3.bf16.msra.mxu0 %v9782_v20  ;;  %6156 = vmatprep.subr.bf16.mxu1 %v9785_v28  ;;  %v9825_v28 = vld [vmem:[#allocation13 + $0x78] sm:$0xff]  }
 0x3b9   :  { %8482 = vmatprep.subr.bf16.mxu0 %v9786_v15 }
 0x3bb   :  { %6157 = vmatpush1.bf16.msra.mxu1 %v9783_v38 }
 0x3bc   :  { %8483 = vmatpush3.bf16.msra.mxu0 %v9787_v21  ;;  %6158 = vmatprep.subr.bf16.mxu1 %v9790_v24  ;;  %v9826_v24 = vld [vmem:[#allocation13 + $0x38] sm:$0xff]  }
 0x3bd   :  { %v4061_v27 = vpop.f32.mrb[20].mxu1  ;;  %8484 = vmatprep.subr.bf16.mxu0 %v9791_v4 }
 0x3be   :  { %4353 = vst [vmem:[#allocation16 + $0x18] sm:$0xff] %v4061_v27  ;;  %v5016_v41 = vpop.f32.mrb[24].mxu0  ;;  %v4063_v29 = vpop.f32.mrb[21].mxu1 }
 0x3bf   :  { %v13198_v2 = vadd.f32 %v5016_v41, %v13187_v40  ;;  %4354 = vst [vmem:[#allocation16 + $0x20] sm:$0xff] %v4063_v29  ;;  %v5018_v51 = vpop.f32.mrb[25].mxu0  ;;  %6159 = vmatpush1.bf16.msra.mxu1 %v9788_v31  ;;  %v9828_v29 = vld [vmem:[#allocation13 + $0x88] sm:$0xff]  }
 0x3c0   :  { %v13201_v37 = vadd.f32 %v5018_v51, %v13189_v36  ;;  %v5020_v44 = vpop.f32.mrb[26].mxu0  ;;  %8485 = vmatpush3.bf16.msra.mxu0 %v9792_v60  ;;  %6160 = vmatprep.subr.bf16.mxu1 %v9795_v55  ;;  %v9830_v51 = vld [vmem:[#allocation13 + $0x98] sm:$0xff]  }
 0x3c1   :  { %v5021_v26 = vpop.f32.mrb[27].mxu0  ;;  %8486 = vmatprep.subr.bf16.mxu0 %v9796_v6  ;;  %v9827_v6 = vld [vmem:[#allocation13 + $0x80] sm:$0xff]   ;;  %v9833_v44 = vld [vmem:[#allocation13 + $0xb0] sm:$0xff]  }
 0x3c3   :  { %6161 = vmatpush1.bf16.msra.mxu1 %v9793_v12  ;;  %v9831_v12 = vld [vmem:[#allocation13 + $0xa0] sm:$0xff]  }
 0x3c4   :  { %8487 = vmatpush3.bf16.msra.mxu0 %v9797_v43  ;;  %6162 = vmatprep.subr.bf16.mxu1 %v9800_v30  ;;  %v9834_v43 = vld [vmem:[#allocation13 + $0xb8] sm:$0xff]  }
 0x3c5   :  { %8488 = vmatprep.subr.bf16.mxu0 %v9801_v46 }
 0x3c7   :  { %6163 = vmatpush1.bf16.msra.mxu1 %v9798_v54 }
 0x3c8   :  { %8489 = vmatpush3.bf16.msra.mxu0 %v9802_v52  ;;  %8645 = vmatprep.subr.bf16.mxu1 %v13638_v32 }
 0x3c9   :  { %8505 = vmatprep.subr.bf16.mxu0 %v9811_v33 }
 0x3ca   :  { %6165 = vmatmul.mubr.bf16.vlgmr.msra.gmra.mrb[32].mxu1 %v5649_v58 }
 0x3cb   :  { %6247 = vmatmul.mubr.bf16.vlgmr.msra.gmra.mrb[48].mxu0 %v5649_v58  ;;  %8646 = vmatpush3.bf16.msra.mxu1 %v9803_v8 }
 0x3cc   :  { %8647 = vmatprep.subr.bf16.mxu1 %v13638_v32  ;;  %8661 = vmatprep.mubr.msk.bf16.mxu1 %vm13653_vm12, %v13638_v32 }
 0x3cd   :  { %8506 = vmatpush3.bf16.msra.mxu0 %v9812_v39 }
 0x3ce   :  { %8507 = vmatprep.subr.bf16.mxu0 %v9813_v47 }
 0x3cf   :  { %8648 = vmatpush3.bf16.msra.mxu1 %v9804_v42 }
 0x3d0   :  { %8649 = vmatprep.subr.bf16.mxu1 %v13638_v32 }
 0x3d1   :  { %8508 = vmatpush3.bf16.msra.mxu0 %v9814_v59 }
 0x3d3   :  { %8650 = vmatpush3.bf16.msra.mxu1 %v9805_v63 }
 0x3d4   :  { %8651 = vmatprep.subr.bf16.mxu1 %v13638_v32 }
 0x3d7   :  { %8652 = vmatpush3.bf16.msra.mxu1 %v9806_v23 }
 0x3d8   :  { %8653 = vmatprep.subr.bf16.mxu1 %v13638_v32 }
 0x3db   :  { %8654 = vmatpush3.bf16.msra.mxu1 %v9807_v7 }
 0x3dc   :  { %8655 = vmatprep.subr.bf16.mxu1 %v13638_v32 }
 0x3de   :  { %v8428_v25 = vpop.f32.mrb[28].mxu0 }
 0x3df   :  { %v8429_v45 = vpop.f32.mrb[29].mxu0  ;;  %8656 = vmatpush3.bf16.msra.mxu1 %v9808_v22 }
 0x3e0   :  { %v8430_v40 = vadd.f32 %v8429_v45, %v8428_v25  ;;  %v8431_v36 = vpop.f32.mrb[30].mxu0  ;;  %8657 = vmatprep.subr.bf16.mxu1 %v13638_v32 }
 0x3e1   :  { %v8432_v48 = vpop.f32.mrb[31].mxu0  ;;  %v6297_v36 = vld [vmem:[%s13283_s6] sm:$0x7] }
 0x3e3   :  { %8658 = vmatpush3.bf16.msra.mxu1 %v9809_v34  ;;  %v13657_v34 = vld [vmem:[#allocation26_spill] sm:$0xff] }
 0x3e4   :  { %8659 = vmatprep.subr.bf16.mxu1 %v13638_v32  ;;  %v6305_v48 = vsub.s32 1, %v13657_v34 }
 0x3e7   :  { %8660 = vmatpush3.bf16.msra.mxu1 %v9810_v50 }
 0x3e8   :  { %8665 = vmatprep.subr.bf16.mxu1 %v13638_v32 }
 0x3ea   :  { %8662 = vmatmul.mubr.bf16.vlgmr.msra.gmra.mrb[36].mxu1 %v13193_v62  ;;  %v9815_v62 = vld [vmem:[#allocation13 + $0x50] sm:$0xff]  }
 0x3eb   :  { %8681 = vmatprep.mubr.msk.bf16.mxu1 %vm13653_vm12, %v13638_v32  ;;  %8509 = vmatprep.subr.bf16.mxu0 %v9815_v62 }
 0x3ec   :  { %8510 = vmatpush3.bf16.msra.mxu0 %v9816_v11  ;;  %8666 = vmatpush3.bf16.msra.mxu1 %v9827_v6 }
 0x3ed   :  { %8511 = vmatprep.subr.bf16.mxu0 %v9817_v13  ;;  %8667 = vmatprep.subr.bf16.mxu1 %v13638_v32 }
 0x3f0   :  { %8512 = vmatpush3.bf16.msra.mxu0 %v9818_v5  ;;  %8668 = vmatpush3.bf16.msra.mxu1 %v9828_v29 }
 0x3f1   :  { %8513 = vmatprep.subr.bf16.mxu0 %v9819_v17  ;;  %8669 = vmatprep.subr.bf16.mxu1 %v13638_v32 }
 0x3f4   :  { %8514 = vmatpush3.bf16.msra.mxu0 %v9820_v9 }
 0x3f5   :  { %8515 = vmatprep.subr.bf16.mxu0 %v9821_v56 }
 0x3f8   :  { %8516 = vmatpush3.bf16.msra.mxu0 %v9822_v49 }
 0x3f9   :  { %8517 = vmatprep.subr.bf16.mxu0 %v9823_v10 }
 0x3fc   :  { %8518 = vmatpush3.bf16.msra.mxu0 %v9824_v14 }
 0x3fd   :  { %8519 = vmatprep.subr.bf16.mxu0 %v9825_v28 }
 0x3fe   :  { %v5097_v57 = vpop.f32.mrb[32].mxu0 }
 0x3ff   :  { %v13219_v61 = vadd.f32 %v8430_v40, %v5097_v57  ;;  %v8623_v35 = vpop.f32.mrb[33].mxu0  ;;  %v6301_v40 = vsub.s32 0, %v13657_v34 }
 0x400   :  { %v5100_v0 = vpop.f32.mrb[34].mxu0  ;;  %8520 = vmatpush3.bf16.msra.mxu0 %v9826_v24 }
 0x401   :  { %v8624_v16 = vpop.f32.mrb[35].mxu0  ;;  %8685 = vmatprep.subr.bf16.mxu0 %v13638_v32  ;;  %v6302_v35 = vrot.slane %v6297_v36, %v6301_v40 }
 0x41d   :  { %v4345_v3 = vpop.f32.mrb[22].mxu1 }
 0x41e   :  { %4357 = vst [vmem:[#allocation16 + $0x38] sm:$0xff] %v4345_v3  ;;  %v4347_v19 = vpop.f32.mrb[23].mxu1  ;;  %v6306_v3 = vrot.slane %v6297_v36, %v6305_v48 }
 0x41f   :  { %4358 = vst [vmem:[#allocation16 + $0x40] sm:$0xff] %v4347_v19 }
 0x43d   :  { %v5562_v53 = vpop.f32.mrb[24].mxu1 }
 0x43e   :  { %v5521_v1 = vpop.f32.mrb[36].mxu0  ;;  %v5564_v20 = vpop.f32.mrb[25].mxu1 }
 0x43f   :  { %v5522_v15 = vadd.f32 %v5521_v1, %v13198_v2  ;;  %v5523_v38 = vpop.f32.mrb[37].mxu0  ;;  %v5566_v21 = vpop.f32.mrb[26].mxu1  ;;  %v9829_v2 = vld [vmem:[#allocation13 + $0x90] sm:$0xff]   ;;  %v6309_v1 = vsub.s32 2, %v13657_v34 }
 0x440   :  { %v5524_v4 = vadd.f32 %v5523_v38, %v13201_v37  ;;  %v5525_v31 = vpop.f32.mrb[38].mxu0  ;;  %v5567_v60 = vpop.f32.mrb[27].mxu1  ;;  %8670 = vmatpush3.bf16.msra.mxu1 %v9829_v2  ;;  %v9832_v37 = vld [vmem:[#allocation13 + $0xa8] sm:$0xff]  }
 0x441   :  { %v5563_v55 = vadd.f32 %v5562_v53, %v5522_v15  ;;  %v5526_v27 = vpop.f32.mrb[39].mxu0  ;;  %8671 = vmatprep.subr.bf16.mxu1 %v13638_v32  ;;  %v6310_v21 = vrot.slane %v6297_v36, %v6309_v1 }
 0x442   :  { %v5565_v41 = vadd.f32 %v5564_v20, %v5524_v4 }
 0x444   :  { %8672 = vmatpush3.bf16.msra.mxu1 %v9830_v51 }
 0x445   :  { %8673 = vmatprep.subr.bf16.mxu1 %v13638_v32 }
 0x448   :  { %8674 = vmatpush3.bf16.msra.mxu1 %v9831_v12 }
 0x449   :  { %8675 = vmatprep.subr.bf16.mxu1 %v13638_v32 }
 0x44c   :  { %8676 = vmatpush3.bf16.msra.mxu1 %v9832_v37  ;;  %v9835_v37 = vld [vmem:[#allocation14] sm:$0xff]  }
 0x44d   :  { %8677 = vmatprep.subr.bf16.mxu1 %v13638_v32 }
 0x450   :  { %8678 = vmatpush3.bf16.msra.mxu1 %v9833_v44  ;;  %v9836_v44 = vld [vmem:[#allocation14 + $0x8] sm:$0xff]  }
 0x451   :  { %8679 = vmatprep.subr.bf16.mxu1 %v13638_v32 }
 0x454   :  { %8680 = vmatpush3.bf16.msra.mxu1 %v9834_v43  ;;  %v9837_v43 = vld [vmem:[#allocation14 + $0x10] sm:$0xff]  }
 0x45d   :  { %v8459_v30 = vpop.f32.mrb[28].mxu1 }
 0x45e   :  { %v5643_v26 = vpop.f32.mrb[40].mxu0  ;;  %v8460_v46 = vpop.f32.mrb[29].mxu1 }
 0x45f   :  { %v8461_v54 = vadd.f32 %v8460_v46, %v8459_v30  ;;  %v8643_v52 = vpop.f32.mrb[41].mxu0  ;;  %v8462_v8 = vpop.f32.mrb[30].mxu1  ;;  %v9838_v30 = vld [vmem:[#allocation14 + $0x18] sm:$0xff]   ;;  %v9840_v46 = vld [vmem:[#allocation14 + $0x28] sm:$0xff]  }
 0x460   :  { %v5646_v18 = vpop.f32.mrb[42].mxu0  ;;  %v8463_v58 = vpop.f32.mrb[31].mxu1  ;;  %v9842_v52 = vld [vmem:[#allocation14 + $0x38] sm:$0xff]  }
 0x461   :  { %v5604_v42 = vadd.f32 %v8461_v54, %v13219_v61  ;;  %v8644_v63 = vpop.f32.mrb[43].mxu0  ;;  %v9841_v54 = vld [vmem:[#allocation14 + $0x30] sm:$0xff]  }
 0x463   :  { %v5644_v23 = vadd.f32 %v5643_v26, %v5604_v42  ;;  %v9839_v26 = vld [vmem:[#allocation14 + $0x20] sm:$0xff]  }
 0x47e   :  { %v6207_v7 = vpop.f32.mrb[44].mxu0 }
 0x47f   :  { %v6209_v22 = vpop.f32.mrb[45].mxu0 }
 0x480   :  { %v6211_v25 = vpop.f32.mrb[46].mxu0 }
 0x481   :  { %v6212_v45 = vpop.f32.mrb[47].mxu0 }
 0x49d   :  { %v6166_v50 = vpop.f32.mrb[32].mxu1 }
 0x49e   :  { %v6208_v57 = vadd.f32 %v6207_v7, %v6166_v50  ;;  %v8490_v0 = vpop.f32.mrb[48].mxu0  ;;  %v6168_v16 = vpop.f32.mrb[33].mxu1 }
 0x49f   :  { %v6210_v61 = vadd.f32 %v6209_v22, %v6168_v16  ;;  %v8491_v19 = vpop.f32.mrb[49].mxu0  ;;  %v6170_v33 = vpop.f32.mrb[34].mxu1 }
 0x4a0   :  { %v6294_v39 = vadd.f32 %v6208_v57, %v5563_v55  ;;  %v8492_v47 = vadd.f32 %v8491_v19, %v8490_v0  ;;  %v8493_v59 = vpop.f32.mrb[50].mxu0  ;;  %v6171_v62 = vpop.f32.mrb[35].mxu1 }
 0x4a1   :  { %v6295_v11 = vadd.f32 %v6210_v61, %v5565_v41  ;;  %v8494_v13 = vpop.f32.mrb[51].mxu0 }
 0x4a2   :  { %v6314_v5 = vadd.f32 %v6302_v35, %v6294_v39 }
 0x4a3   :  { %v6315_v17 = vadd.f32 %v6306_v3, %v6295_v11 }
 0x4a4   :  { %v8281_v9 = vmul.f32 -1.442695, %v6314_v5 }
 0x4a5   :  { %v8282_v56 = vmul.f32 -1.442695, %v6315_v17 }
 0x4a6   :  { %9843 = vpow2.f32 %v8281_v9 }
 0x4a7   :  { %9845 = vpow2.f32 %v8282_v56 }
 0x4b0   :  { %v9844_v49 = vpop.eup %9843 }
 0x4b1   :  { %v9846_v10 = vpop.eup %9845  ;;  %v6326_v14 = vadd.f32 1.0, %v9844_v49 }
 0x4b2   :  { %v6327_v53 = vadd.f32 1.0, %v9846_v10 }
 0x4b3   :  { %9847 = vrcp.f32 %v6326_v14 }
 0x4b4   :  { %9849 = vrcp.f32 %v6327_v53 }
 0x4bd   :  { %v9848_v20 = vpop.eup %9847  ;;  %v6288_v28 = vpop.f32.mrb[36].mxu1 }
 0x4be   :  { %v9850_v15 = vpop.eup %9849  ;;  %v6289_v38 = vadd.f32 %v8492_v47, %v6288_v28  ;;  %v8663_v24 = vpop.f32.mrb[37].mxu1  ;;  %v6335_v27 = vpack.c.bf16 %v9848_v20, %v9848_v20 }
 0x4bf   :  { %v6291_v4 = vpop.f32.mrb[38].mxu1  ;;  %v6336_v31 = vpack.c.bf16 %v9850_v15, %v9850_v15 }
 0x4c0   :  { %v6296_v60 = vadd.f32 %v6289_v38, %v5644_v23  ;;  %v8664_v55 = vpop.f32.mrb[39].mxu1  ;;  %v8284_v23 = vld [vmem:[%s13285_s8] ss:$0 sm:$0xff] }
 0x4c1   :  { %6569 = vmatprep.mubr.bf16.mxu0 %v6336_v31 }
 0x4c2   :  { %v6316_v6 = vadd.f32 %v6310_v21, %v6296_v60  ;;  %6570 = vmatmul.mubr.bf16.vlgmr.msra.gmra.mrb[52].mxu0 %v6335_v27 }
 0x4c3   :  { %8701 = vmatprep.mubr.msk.bf16.mxu0 %vm13653_vm12, %v13638_v32  ;;  %8686 = vmatpush3.bf16.msra.mxu0 %v9835_v37 }
 0x4c4   :  { %v8283_v41 = vmul.f32 -1.442695, %v6316_v6  ;;  %8687 = vmatprep.subr.bf16.mxu0 %v13638_v32 }
 0x4c6   :  { %9851 = vpow2.f32 %v8283_v41 }
 0x4c7   :  { %8688 = vmatpush3.bf16.msra.mxu0 %v9836_v44 }
 0x4c8   :  { %8689 = vmatprep.subr.bf16.mxu0 %v13638_v32 }
 0x4cb   :  { %8690 = vmatpush3.bf16.msra.mxu0 %v9837_v43 }
 0x4cc   :  { %8691 = vmatprep.subr.bf16.mxu0 %v13638_v32 }
 0x4cf   :  { %8692 = vmatpush3.bf16.msra.mxu0 %v9838_v30 }
 0x4d0   :  { %v9852_v29 = vpop.eup %9851  ;;  %8693 = vmatprep.subr.bf16.mxu0 %v13638_v32 }
 0x4d1   :  { %v6328_v2 = vadd.f32 1.0, %v9852_v29 }
 0x4d3   :  { %9853 = vrcp.f32 %v6328_v2  ;;  %8694 = vmatpush3.bf16.msra.mxu0 %v9839_v26 }
 0x4d4   :  { %8695 = vmatprep.subr.bf16.mxu0 %v13638_v32 }
 0x4d7   :  { %8696 = vmatpush3.bf16.msra.mxu0 %v9840_v46 }
 0x4d8   :  { %8697 = vmatprep.subr.bf16.mxu0 %v13638_v32 }
 0x4db   :  { %8698 = vmatpush3.bf16.msra.mxu0 %v9841_v54 }
 0x4dc   :  { %8699 = vmatprep.subr.bf16.mxu0 %v13638_v32 }
 0x4dd   :  { %v9854_v51 = vpop.eup %9853 }
 0x4de   :  { %v6337_v12 = vpack.c.bf16 %v9854_v51, %v9854_v51 }
 0x4df   :  { %8700 = vmatpush3.bf16.msra.mxu0 %v9842_v52 }
 0x4e0   :  { %8682 = vmatmul.mubr.bf16.vlgmr.msra.gmra.mrb[40].mxu1 %v6337_v12 }
 0x595   :  { %v8521_v8 = vpop.f32.mrb[52].mxu0 }
 0x596   :  { %v8522_v18 = vpop.f32.mrb[53].mxu0 }
 0x597   :  { %v8523_v58 = vadd.f32 %v8522_v18, %v8521_v8  ;;  %v8524_v42 = vpop.f32.mrb[54].mxu0 }
 0x598   :  { %v8525_v63 = vpop.f32.mrb[55].mxu0 }
 0x599   :  { %v6572_v7 = vadd.f32 %v8523_v58, %v8284_v23 }
 0x5b3   :  { %v6611_v22 = vpop.f32.mrb[40].mxu1 }
 0x5b4   :  { %v6612_v25 = vadd.f32 %v6611_v22, %v6572_v7  ;;  %v8683_v45 = vpop.f32.mrb[41].mxu1 }
 0x5b5   :  { %v6614_v34 = vpop.f32.mrb[42].mxu1 }
 0x5b6   :  { %v8309_v40 = vmul.f32 -1.442695, %v6612_v25  ;;  %v8684_v36 = vpop.f32.mrb[43].mxu1 }
 0x5b8   :  { %9855 = vpow2.f32 %v8309_v40 }
 0x5c2   :  { %v9856_v48 = vpop.eup %9855 }
 0x5c3   :  { %v6620_v32 = vadd.f32 1.0, %v9856_v48 }
 0x5c5   :  { %9857 = vrcp.f32 %v6620_v32 }
 0x5cf   :  { %v9858_v50 = vpop.eup %9857 }
 0x5d0   :  { %v6623_v57 = vpack.c.bf16 %v9858_v50, %v9858_v50 }
 0x5d2   :  { %8702 = vmatmul.mubr.bf16.vlgmr.msra.gmra.mrb[56].mxu0 %v6623_v57 }
 0x5d3   :  { %10049 = shalt.err (!%p10046_p12)
}
 0x5d4   :  { %s10050_s0 = scalar_lea.hbm %s13288_s11, 1152 }
 0x5d5   :  { %p10051_p13 = scmp.ne.s32.totalorder %s13288_s11, %s10050_s0  ;;  %p10054_p0 = scmp.lt.u32.totalorder %s10050_s0, %s13288_s11 }
 0x5d7   :  { %p10056_p1 = pnand %p10054_p0, %p10051_p13 }
 0x5d9   :  { %10059 = shalt.err (!%p10056_p1)
}
 0x5da   :  { %6745 = dma.vmem_to_hbm [thread:$0]  %s6743_s1, 1152, %s13288_s11, [#allocation4]   ;;  %v8310_v35 = vld [vmem:[%s13287_s10] ss:$0 sm:$0xff] }
 0x5db   :  { %s10115_s5 = smov [#allocation17]  }
 0x5dc   :  { %s6752_s20 = sshll.u32 %s10115_s5, 4  ;;  %s6753_s20 = int_to_ptr.vmem [resolvable:$true] %s6752_s20 }
 0x5dd   :  { %s10060_s17 = scalar_lea.vmem %s6753_s20, 128  ;;  %p10065_p3 = scmp.lt.s32.totalorder %s6753_s20, %s6753_s20 }
 0x5de   :  { %p10061_p2 = scmp.ne.s32.totalorder %s6753_s20, %s10060_s17  ;;  %p10066_p4 = scmp.lt.s32.totalorder %s10060_s17, %s10060_s17 }
 0x5e0   :  { %p10067_p5 = por %p10066_p4, %p10065_p3 }
 0x5e2   :  { %p10068_p6 = pnand %p10067_p5, %p10061_p2 }
 0x6a5   :  { %v6729_v0 = vpop.f32.mrb[56].mxu0 }
 0x6a6   :  { %v6730_v16 = vadd.f32 %v8310_v35, %v6729_v0  ;;  %v8703_v61 = vpop.f32.mrb[57].mxu0 }
 0x6a7   :  { %v6732_v3 = vpop.f32.mrb[58].mxu0 }
 0x6a8   :  { %6735 = vst [vmem:[#allocation17] sm:$0xff] %v6730_v16  ;;  %v8704_v19 = vpop.f32.mrb[59].mxu0 }
 0x6a9   :  { %10071 = shalt.err (!%p10068_p6)
}
 0x6aa   :  { %s10072_s10 = scalar_lea.hbm %s13289_s12, 128 }
 0x6ab   :  { %p10073_p7 = scmp.ne.s32.totalorder %s13289_s12, %s10072_s10  ;;  %p10076_p8 = scmp.lt.u32.totalorder %s10072_s10, %s13289_s12 }
 0x6ad   :  { %p10078_p9 = pnand %p10076_p8, %p10073_p7 }
 0x6af   :  { %10081 = shalt.err (!%p10078_p9)
}
 0x6b0   :  { %6755 = dma.vmem_to_hbm [thread:$0]  %s6753_s20, 128, %s13289_s12, [#allocation18]  }
 0x6b1   :  { %10092 = dma.done.wait [#allocation4], 1152  }
 0x6b2   :  { %10093 = vsyncadd [#allocation4], 4294966144 }
 0x6b3   :  { %10094 = dma.done.wait [#allocation18], 128  }
 0x6b4   :  { %10095 = vsyncadd [#allocation18], 4294967168 }
 0x6b5   :  { %6762 = vsyncpa [#allocation3], 1 }
 0x6b6   :  { %6763 = vsyncpa [#allocation6], 1 }
 0x6b7   :  { %6764 = vsyncpa [#allocation9], 1 }
 0x6b8   :  { %6765 = vsyncpa [#allocation12], 1 }
 0x6b9   :  { %6766 = vsyncpa [#allocation15], 1 }
 0x6ba   :  { %6767 = vsyncpa [#allocation4], 1 }
 0x6bb   :  { %6768 = vsyncpa [#allocation18], 1 }

</bundles_post_ra>
